<compile_context>
chip_gen: v5e
topology: v5e:2x2
jax: 0.10.0
libtpu: 0.0.40
codegen_flags: <defaults>
</compile_context>

<pallas_src>
import functools

import jax
import jax.numpy as jnp
import numpy as np
from jax.experimental import pallas as pl
from jax.experimental.pallas import tpu as pltpu


# --------------------------------------------------------------------------
# Fused Pallas kernel
# --------------------------------------------------------------------------
def _agg_fused_kernel(x_ref, wx1_ref, bx1_ref, whh1_ref,
                      wx2_ref, bx2_ref, whh2_ref,
                      fcw_ref, fcb_ref,
                      logit_ref,
                      gxf_scr, gxb_scr, seq_scr, *, T, B, H):
    """Whole AggPredictor forward in one kernel.

    x_ref    : (T*B, D_in)  time-major flattened input (row = t*B + b)
    wx{l}    : (D_in_l, 8H) [W_ih_fwd | W_ih_bwd] columns (gate order i,f,g,o per dir)
    bx{l}    : (1, 8H)      (b_ih + b_hh) for fwd | bwd
    whh{l}   : (2H, 8H)     block-diag [[W_hh_fwd, 0], [0, W_hh_bwd]]
    fcw      : (2H, C), fcb: (1, C)
    logit_ref: (B, C)
    Scratch  : gxf/gxb (T, B, 4H)  per-direction gate pre-projections (time-leading
                                   so the recurrence only uses leading-axis indexing),
               seq (2, T, B, H)    layer-1 fwd/bwd outputs, time-aligned, consumed
                                   directly by the layer-2 projection.
    """
    H2, H4 = 2 * H, 4 * H

    def scatter_gates(g):
        # g: (T*B, 8H) gate pre-activations for all timesteps / both directions.
        # 4H = 128 lanes -> exact vreg-aligned split.
        gxf_scr[...] = g[:, :H4].reshape(T, B, H4)
        gxb_scr[...] = g[:, H4:].reshape(T, B, H4)

    def cell(gates, c):
        # One LSTM cell update for ONE direction, on H-wide slices (no concats).
        i = jax.nn.sigmoid(gates[:, 0 * H:1 * H])
        f = jax.nn.sigmoid(gates[:, 1 * H:2 * H])
        g = jnp.tanh(gates[:, 2 * H:3 * H])
        o = jax.nn.sigmoid(gates[:, 3 * H:4 * H])
        c_new = f * c + i * g
        return o * jnp.tanh(c_new), c_new

    def step(t, h, c_f, c_b, whh_ref):
        # One fused fwd+bwd recurrence step: single (B,2H)@(2H,8H) matmul.
        # whh is indexed at the dot so the RHS streams from VMEM (not pinned
        # in vregs across the unrolled loop).
        hh = jnp.dot(h, whh_ref[...], preferred_element_type=jnp.float32)  # (B, 8H)
        tb = T - 1 - t
        gates_f = gxf_scr[t] + hh[:, :H4]      # fwd consumes time t
        gates_b = gxb_scr[tb] + hh[:, H4:]     # bwd consumes time T-1-t
        h_f, c_f = cell(gates_f, c_f)
        h_b, c_b = cell(gates_b, c_b)
        return h_f, h_b, c_f, c_b, tb

    def run_layer(whh_ref, write_seq):
        zeros_h = jnp.zeros((B, H), jnp.float32)
        zeros_2h = jnp.zeros((B, H2), jnp.float32)

        if write_seq:
            def body(t, carry):
                h, c_f, c_b = carry
                h_f, h_b, c_f, c_b, tb = step(t, h, c_f, c_b, whh_ref)
                # Time-aligned layer-1 outputs; both stores are lane-offset-0,
                # full (B,H) blocks -> no relayout on the critical path.
                seq_scr[0, t] = h_f
                seq_scr[1, tb] = h_b
                # Re-form [h_f | h_b] exactly once, only for the next matmul.
                return jnp.concatenate([h_f, h_b], axis=-1), c_f, c_b

            jax.lax.fori_loop(0, T, body, (zeros_2h, zeros_h, zeros_h),
                              unroll=True)
            return None

        def body(t, carry):
            h, c_f, c_b, acc = carry
            h_f, h_b, c_f, c_b, _ = step(t, h, c_f, c_b, whh_ref)
            h_new = jnp.concatenate([h_f, h_b], axis=-1)
            return h_new, c_f, c_b, acc + h_new        # running sum -> mean pool

        carry = jax.lax.fori_loop(0, T, body,
                                  (zeros_2h, zeros_h, zeros_h, zeros_2h),
                                  unroll=True)
        return carry[3]

    # ---- layer 1: hoisted x->gate projection (one matmul, bias folded in) ----
    scatter_gates(jnp.dot(x_ref[...], wx1_ref[...],
                          preferred_element_type=jnp.float32) + bx1_ref[...])
    run_layer(whh1_ref, write_seq=True)

    # ---- layer 2: K-split projection reads the layer-1 slab straight from VMEM
    #      (no materialized (T*B, 2H) concat; same total MXU work). ----
    seq_f = seq_scr[0].reshape(T * B, H)
    seq_b = seq_scr[1].reshape(T * B, H)
    g2 = (jnp.dot(seq_f, wx2_ref[:H, :], preferred_element_type=jnp.float32)
          + jnp.dot(seq_b, wx2_ref[H:, :], preferred_element_type=jnp.float32)
          + bx2_ref[...])
    scatter_gates(g2)
    acc = run_layer(whh2_ref, write_seq=False)

    # ---- mean over time + FC head ----
    mean = acc * (1.0 / T)                                              # (B, 2H)
    logit_ref[...] = (jnp.dot(mean, fcw_ref[...],
                              preferred_element_type=jnp.float32)
                      + fcb_ref[...])


# --------------------------------------------------------------------------
# Wrapper
# --------------------------------------------------------------------------
def _padded_f32_bytes(shape):
    """f32 VMEM footprint of `shape` after (8,128) tiling of the minor dims."""
    shape = tuple(int(d) for d in shape)
    lead = 1
    for d in shape[:-2]:
        lead *= d
    sub = -(-shape[-2] // 8) * 8
    lane = -(-shape[-1] // 128) * 128
    return 4 * lead * sub * lane


def agg_predictor_forward(packed, x, lengths=None):
    """Fused Pallas AggPredictor.forward.  x: (B, T, input_size) float32.

    `lengths` is accepted but unused, matching the PyTorch forward (which
    ignores it and means over the full sequence).
    """
    del lengths
    H = packed["hidden_size"]
    C = packed["num_classes"]
    assert len(packed["layers"]) == 2, "fused kernel is specialized to num_layers=2"
    l1, l2 = packed["layers"]
    B, T, D = x.shape

    # Pad batch to a sublane multiple (>=8): fills vreg sublanes / MXU rows of
    # every per-step op essentially for free; padded rows never mix with real
    # ones (batch rows are independent) and are sliced off at the end.
    Bp = max(8, -(-B // 8) * 8)
    if Bp != B:
        x = jnp.pad(x, ((0, Bp - B), (0, 0), (0, 0)))
    # Time-major, flattened rows (row = t*Bp + b); tiny one-time XLA op.
    x_tm = jnp.transpose(x, (1, 0, 2)).reshape(T * Bp, D)

    # ---- VMEM footprint guard (everything is VMEM-resident, no pipelining) ----
    tensors = [(T * Bp, D), (D, 8 * H), (1, 8 * H), (2 * H, 8 * H),
               (2 * H, 8 * H), (1, 8 * H), (2 * H, 8 * H),
               (2 * H, C), (1, C), (Bp, C),
               (T, Bp, 4 * H), (T, Bp, 4 * H), (2, T, Bp, H)]
    est = sum(_padded_f32_bytes(s) for s in tensors)
    # Stay well inside v7x's 64 MiB physical VMEM (smallest of v5e/v6e/v7x).
    assert est < 48 * 1024 * 1024, (
        "VMEM footprint too large: time-tile the x->gate projection "
        "(pltpu.emit_pipeline over T chunks) before scaling T*B*H further.")
    vmem_limit = int(min(100 * 1024 * 1024, max(16 * 1024 * 1024, 2 * est)))

    kernel = functools.partial(_agg_fused_kernel, T=T, B=Bp, H=H)
    vmem = pl.BlockSpec(memory_space=pltpu.MemorySpace.VMEM)
    logits = pl.pallas_call(
        kernel,
        out_shape=jax.ShapeDtypeStruct((Bp, C), jnp.float32),
        in_specs=[vmem] * 9,
        out_specs=vmem,
        scratch_shapes=[pltpu.VMEM((T, Bp, 4 * H), jnp.float32),   # fwd gate pre-proj
                        pltpu.VMEM((T, Bp, 4 * H), jnp.float32),   # bwd gate pre-proj
                        pltpu.VMEM((2, T, Bp, H), jnp.float32)],   # layer-1 output slab
        compiler_params=pltpu.CompilerParams(vmem_limit_bytes=vmem_limit),
    )(x_tm, l1["wx"], l1["bx"], l1["whh"],
      l2["wx"], l2["bx"], l2["whh"],
      packed["fc_w"], packed["fc_b"])
    return logits[:B]


# --------------------------------------------------------------------------
# Parameter construction (PyTorch-style uniform(-k, k) init) and packing
# --------------------------------------------------------------------------
def init_params(key, input_size, hidden_size, num_layers=2, num_classes=6):
    k = 1.0 / np.sqrt(hidden_size)

    def unif(key, shape):
        return jax.random.uniform(key, shape, jnp.float32, minval=-k, maxval=k)

    layers = []
    for l in range(num_layers):
        d_in = input_size if l == 0 else 2 * hidden_size
        dirs = {}
        for d in ("fwd", "bwd"):
            key, k1, k2, k3, k4 = jax.random.split(key, 5)
            w_ih = unif(k1, (4 * hidden_size, d_in)).T                 # (d_in, 4H)
            w_hh = unif(k2, (4 * hidden_size, hidden_size)).T          # (H, 4H)
            b = unif(k3, (4 * hidden_size,)) + unif(k4, (4 * hidden_size,))
            dirs[d] = {"w_ih": w_ih, "w_hh": w_hh, "b": b.reshape(1, -1)}
        layers.append(dirs)

    key, k1, k2 = jax.random.split(key, 3)
    kf = 1.0 / np.sqrt(2 * hidden_size)
    fc_w = jax.random.uniform(k1, (num_classes, 2 * hidden_size), jnp.float32,
                              minval=-kf, maxval=kf).T                 # (2H, C)
    fc_b = jax.random.uniform(k2, (num_classes,), jnp.float32,
                              minval=-kf, maxval=kf).reshape(1, -1)    # (1, C)

    return {"lstm_layers": layers, "fc_w": fc_w, "fc_b": fc_b,
            "hidden_size": hidden_size, "num_classes": num_classes}


def pack_params(raw):
    """Build the fused-kernel weight layout (done once, outside the kernel).

    Note: the block-diagonal whh is the right choice while 2H fits a single MXU
    contraction pass (H <= 64 on v5e, <= 128 on v6e/v7x); switch to two
    per-direction (B,H)@(H,4H) matmuls per step beyond that.
    """
    H = raw["hidden_size"]
    layers = []
    for layer in raw["lstm_layers"]:
        fwd, bwd = layer["fwd"], layer["bwd"]
        wx = jnp.concatenate([fwd["w_ih"], bwd["w_ih"]], axis=1)       # (d_in, 8H)
        bx = jnp.concatenate([fwd["b"], bwd["b"]], axis=1)             # (1, 8H)
        whh = jnp.zeros((2 * H, 8 * H), jnp.float32)                   # block-diag
        whh = whh.at[0:H, 0:4 * H].set(fwd["w_hh"])
        whh = whh.at[H:2 * H, 4 * H:8 * H].set(bwd["w_hh"])
        layers.append({"wx": wx, "bx": bx, "whh": whh})
    return {"layers": layers, "fc_w": raw["fc_w"], "fc_b": raw["fc_b"],
            "hidden_size": H, "num_classes": raw["num_classes"]}


# --------------------------------------------------------------------------
# Pure-NumPy float64 reference (mirrors torch.nn.LSTM semantics)
# --------------------------------------------------------------------------
def reference_forward_np(raw, x):
    H = raw["hidden_size"]
    f64 = lambda a: np.asarray(a, np.float64)

    def sigmoid(z):
        return 1.0 / (1.0 + np.exp(-z))

    def run_dir(x_tm, p):
        Tn, Bn, _ = x_tm.shape
        w_ih, w_hh, b = f64(p["w_ih"]), f64(p["w_hh"]), f64(p["b"])
        h = np.zeros((Bn, H), np.float64)
        c = np.zeros((Bn, H), np.float64)
        outs = []
        for t in range(Tn):
            gates = x_tm[t] @ w_ih + h @ w_hh + b
            i = sigmoid(gates[:, 0 * H:1 * H])
            f = sigmoid(gates[:, 1 * H:2 * H])
            g = np.tanh(gates[:, 2 * H:3 * H])
            o = sigmoid(gates[:, 3 * H:4 * H])
            c = f * c + i * g
            h = o * np.tanh(c)
            outs.append(h)
        return np.stack(outs, axis=0)

    x_tm = np.transpose(f64(x), (1, 0, 2))
    layer_in = x_tm
    for layer in raw["lstm_layers"]:
        fwd = run_dir(layer_in, layer["fwd"])
        bwd = run_dir(layer_in[::-1], layer["bwd"])[::-1]
        layer_in = np.concatenate([fwd, bwd], axis=-1)
    mean = layer_in.mean(axis=0)
    return mean @ f64(raw["fc_w"]) + f64(raw["fc_b"])


# --------------------------------------------------------------------------
if __name__ == "__main__":
    B, T, INPUT, HIDDEN, CLASSES = 2, 8, 16, 32, 6

    key = jax.random.PRNGKey(0)
    key, kx, kp = jax.random.split(key, 3)
    x = jax.random.normal(kx, (B, T, INPUT), jnp.float32)
    lengths = jnp.full((B,), T, jnp.int32)   # accepted but unused, as in PyTorch
    raw = init_params(kp, INPUT, HIDDEN, num_layers=2, num_classes=CLASSES)
    packed = pack_params(raw)

    fwd = jax.jit(lambda xx: agg_predictor_forward(packed, xx, lengths))
    logits = jax.block_until_ready(fwd(x))

    ref = reference_forward_np(raw, np.asarray(x))
    got = np.asarray(logits)
    assert got.shape == (B, CLASSES), got.shape
    assert np.all(np.isfinite(got))
    # All-f32 kernel vs float64 NumPy reference: much tighter than before so
    # layout / packing changes can't silently introduce permutation bugs.
    np.testing.assert_allclose(got, ref, rtol=1e-4, atol=1e-4)

    print("KERNEL_OK")
</pallas_src>

<mosaic_0001>
module attributes {stable_mosaic.version = 11 : i64} {
  func.func @_agg_fused_kernel(%arg0: memref<64x16xf32, #tpu.memory_space<vmem>>, %arg1: memref<16x256xf32, #tpu.memory_space<vmem>>, %arg2: memref<1x256xf32, #tpu.memory_space<vmem>>, %arg3: memref<64x256xf32, #tpu.memory_space<vmem>>, %arg4: memref<64x256xf32, #tpu.memory_space<vmem>>, %arg5: memref<1x256xf32, #tpu.memory_space<vmem>>, %arg6: memref<64x256xf32, #tpu.memory_space<vmem>>, %arg7: memref<64x6xf32, #tpu.memory_space<vmem>>, %arg8: memref<1x6xf32, #tpu.memory_space<vmem>>, %arg9: memref<8x6xf32, #tpu.memory_space<vmem>>, %arg10: memref<8x8x128xf32, #tpu.memory_space<vmem>>, %arg11: memref<8x8x128xf32, #tpu.memory_space<vmem>>, %arg12: memref<2x8x8x32xf32, #tpu.memory_space<vmem>>) attributes {dimension_semantics = [], scalar_prefetch = 0 : i64, scratch_operands = 3 : i64, tpu.core_type = #tpu.core_type<tc>} {
    %c0 = arith.constant 0 : index
    %c0_0 = arith.constant 0 : index
    %0 = vector.load %arg0[%c0, %c0_0] : memref<64x16xf32, #tpu.memory_space<vmem>>, vector<64x16xf32>
    %c0_1 = arith.constant 0 : index
    %c0_2 = arith.constant 0 : index
    %1 = vector.load %arg1[%c0_1, %c0_2] : memref<16x256xf32, #tpu.memory_space<vmem>>, vector<16x256xf32>
    %cst = arith.constant dense<0.000000e+00> : vector<64x256xf32>
    %2 = tpu.matmul %0, %1, %cst {dimension_numbers = #tpu.dot_dimension_numbers<[1], [0], [0], [1], [0, 0, 1, 1], [], []>} : vector<64x16xf32>, vector<16x256xf32>, vector<64x256xf32> -> vector<64x256xf32>
    %c0_3 = arith.constant 0 : index
    %c0_4 = arith.constant 0 : index
    %3 = vector.load %arg2[%c0_3, %c0_4] : memref<1x256xf32, #tpu.memory_space<vmem>>, vector<1x256xf32>
    %4 = vector.broadcast %3 : vector<1x256xf32> to vector<64x256xf32>
    %5 = arith.addf %2, %4 : vector<64x256xf32>
    %6 = vector.extract_strided_slice %5 {offsets = [0, 0], sizes = [64, 128], strides = [1, 1]} : vector<64x256xf32> to vector<64x128xf32>
    %7 = vector.shape_cast %6 : vector<64x128xf32> to vector<8x8x128xf32>
    %c0_5 = arith.constant 0 : index
    %c0_6 = arith.constant 0 : index
    %c0_7 = arith.constant 0 : index
    %8 = vector.load %arg10[%c0_5, %c0_6, %c0_7] : memref<8x8x128xf32, #tpu.memory_space<vmem>>, vector<8x8x128xf32>
    tpu.vector_store %arg10[%c0_5, %c0_6, %c0_7], %7 {strides = array<i32>} : memref<8x8x128xf32, #tpu.memory_space<vmem>>, vector<8x8x128xf32>,
    %9 = vector.extract_strided_slice %5 {offsets = [0, 128], sizes = [64, 128], strides = [1, 1]} : vector<64x256xf32> to vector<64x128xf32>
    %10 = vector.shape_cast %9 : vector<64x128xf32> to vector<8x8x128xf32>
    %c0_8 = arith.constant 0 : index
    %c0_9 = arith.constant 0 : index
    %c0_10 = arith.constant 0 : index
    %11 = vector.load %arg11[%c0_8, %c0_9, %c0_10] : memref<8x8x128xf32, #tpu.memory_space<vmem>>, vector<8x8x128xf32>
    tpu.vector_store %arg11[%c0_8, %c0_9, %c0_10], %10 {strides = array<i32>} : memref<8x8x128xf32, #tpu.memory_space<vmem>>, vector<8x8x128xf32>,
    %cst_11 = arith.constant 0.000000e+00 : f32
    %12 = vector.broadcast %cst_11 : f32 to vector<8x32xf32>
    %cst_12 = arith.constant 0.000000e+00 : f32
    %13 = vector.broadcast %cst_12 : f32 to vector<8x64xf32>
    %c0_i32 = arith.constant 0 : i32
    %c0_13 = arith.constant 0 : index
    %c0_14 = arith.constant 0 : index
    %14 = vector.load %arg3[%c0_13, %c0_14] : memref<64x256xf32, #tpu.memory_space<vmem>>, vector<64x256xf32>
    %cst_15 = arith.constant dense<0.000000e+00> : vector<8x256xf32>
    %15 = tpu.matmul %13, %14, %cst_15 {dimension_numbers = #tpu.dot_dimension_numbers<[1], [0], [0], [1], [0, 0, 1, 1], [], []>} : vector<8x64xf32>, vector<64x256xf32>, vector<8x256xf32> -> vector<8x256xf32>
    %c7_i32 = arith.constant 7 : i32
    %16 = arith.subi %c7_i32, %c0_i32 : i32
    %17 = arith.index_cast %c0_i32 : i32 to index
    %c0_16 = arith.constant 0 : index
    %c0_17 = arith.constant 0 : index
    %18 = vector.load %arg10[%17, %c0_16, %c0_17] : memref<8x8x128xf32, #tpu.memory_space<vmem>>, vector<1x8x128xf32>
    %19 = vector.shape_cast %18 : vector<1x8x128xf32> to vector<8x128xf32>
    %20 = vector.extract_strided_slice %15 {offsets = [0, 0], sizes = [8, 128], strides = [1, 1]} : vector<8x256xf32> to vector<8x128xf32>
    %21 = arith.addf %19, %20 : vector<8x128xf32>
    %22 = arith.index_cast %16 : i32 to index
    %c0_18 = arith.constant 0 : index
    %c0_19 = arith.constant 0 : index
    %23 = vector.load %arg11[%22, %c0_18, %c0_19] : memref<8x8x128xf32, #tpu.memory_space<vmem>>, vector<1x8x128xf32>
    %24 = vector.shape_cast %23 : vector<1x8x128xf32> to vector<8x128xf32>
    %25 = vector.extract_strided_slice %15 {offsets = [0, 128], sizes = [8, 128], strides = [1, 1]} : vector<8x256xf32> to vector<8x128xf32>
    %26 = arith.addf %24, %25 : vector<8x128xf32>
    %27 = vector.extract_strided_slice %21 {offsets = [0, 0], sizes = [8, 32], strides = [1, 1]} : vector<8x128xf32> to vector<8x32xf32>
    %28 = arith.negf %27 : vector<8x32xf32>
    %29 = math.exp %28 : vector<8x32xf32>
    %cst_20 = arith.constant 1.000000e+00 : f32
    %30 = vector.broadcast %cst_20 : f32 to vector<8x32xf32>
    %31 = arith.addf %30, %29 : vector<8x32xf32>
    %32 = arith.divf %30, %31 : vector<8x32xf32>
    %33 = vector.extract_strided_slice %21 {offsets = [0, 32], sizes = [8, 32], strides = [1, 1]} : vector<8x128xf32> to vector<8x32xf32>
    %34 = arith.negf %33 : vector<8x32xf32>
    %35 = math.exp %34 : vector<8x32xf32>
    %cst_21 = arith.constant 1.000000e+00 : f32
    %36 = vector.broadcast %cst_21 : f32 to vector<8x32xf32>
    %37 = arith.addf %36, %35 : vector<8x32xf32>
    %38 = arith.divf %36, %37 : vector<8x32xf32>
    %39 = vector.extract_strided_slice %21 {offsets = [0, 64], sizes = [8, 32], strides = [1, 1]} : vector<8x128xf32> to vector<8x32xf32>
    %40 = math.tanh %39 : vector<8x32xf32>
    %41 = vector.extract_strided_slice %21 {offsets = [0, 96], sizes = [8, 32], strides = [1, 1]} : vector<8x128xf32> to vector<8x32xf32>
    %42 = arith.negf %41 : vector<8x32xf32>
    %43 = math.exp %42 : vector<8x32xf32>
    %cst_22 = arith.constant 1.000000e+00 : f32
    %44 = vector.broadcast %cst_22 : f32 to vector<8x32xf32>
    %45 = arith.addf %44, %43 : vector<8x32xf32>
    %46 = arith.divf %44, %45 : vector<8x32xf32>
    %47 = arith.mulf %38, %12 : vector<8x32xf32>
    %48 = arith.mulf %32, %40 : vector<8x32xf32>
    %49 = arith.addf %47, %48 : vector<8x32xf32>
    %50 = math.tanh %49 : vector<8x32xf32>
    %51 = arith.mulf %46, %50 : vector<8x32xf32>
    %52 = vector.extract_strided_slice %26 {offsets = [0, 0], sizes = [8, 32], strides = [1, 1]} : vector<8x128xf32> to vector<8x32xf32>
    %53 = arith.negf %52 : vector<8x32xf32>
    %54 = math.exp %53 : vector<8x32xf32>
    %cst_23 = arith.constant 1.000000e+00 : f32
    %55 = vector.broadcast %cst_23 : f32 to vector<8x32xf32>
    %56 = arith.addf %55, %54 : vector<8x32xf32>
    %57 = arith.divf %55, %56 : vector<8x32xf32>
    %58 = vector.extract_strided_slice %26 {offsets = [0, 32], sizes = [8, 32], strides = [1, 1]} : vector<8x128xf32> to vector<8x32xf32>
    %59 = arith.negf %58 : vector<8x32xf32>
    %60 = math.exp %59 : vector<8x32xf32>
    %cst_24 = arith.constant 1.000000e+00 : f32
    %61 = vector.broadcast %cst_24 : f32 to vector<8x32xf32>
    %62 = arith.addf %61, %60 : vector<8x32xf32>
    %63 = arith.divf %61, %62 : vector<8x32xf32>
    %64 = vector.extract_strided_slice %26 {offsets = [0, 64], sizes = [8, 32], strides = [1, 1]} : vector<8x128xf32> to vector<8x32xf32>
    %65 = math.tanh %64 : vector<8x32xf32>
    %66 = vector.extract_strided_slice %26 {offsets = [0, 96], sizes = [8, 32], strides = [1, 1]} : vector<8x128xf32> to vector<8x32xf32>
    %67 = arith.negf %66 : vector<8x32xf32>
    %68 = math.exp %67 : vector<8x32xf32>
    %cst_25 = arith.constant 1.000000e+00 : f32
    %69 = vector.broadcast %cst_25 : f32 to vector<8x32xf32>
    %70 = arith.addf %69, %68 : vector<8x32xf32>
    %71 = arith.divf %69, %70 : vector<8x32xf32>
    %72 = arith.mulf %63, %12 : vector<8x32xf32>
    %73 = arith.mulf %57, %65 : vector<8x32xf32>
    %74 = arith.addf %72, %73 : vector<8x32xf32>
    %75 = math.tanh %74 : vector<8x32xf32>
    %76 = arith.mulf %71, %75 : vector<8x32xf32>
    %c0_26 = arith.constant 0 : index
    %77 = arith.index_cast %c0_i32 : i32 to index
    %c0_27 = arith.constant 0 : index
    %c0_28 = arith.constant 0 : index
    %78 = vector.load %arg12[%c0_26, %77, %c0_27, %c0_28] : memref<2x8x8x32xf32, #tpu.memory_space<vmem>>, vector<1x1x8x32xf32>
    %79 = vector.shape_cast %78 : vector<1x1x8x32xf32> to vector<8x32xf32>
    %80 = vector.shape_cast %51 : vector<8x32xf32> to vector<1x1x8x32xf32>
    tpu.vector_store %arg12[%c0_26, %77, %c0_27, %c0_28], %80 {strides = array<i32>} : memref<2x8x8x32xf32, #tpu.memory_space<vmem>>, vector<1x1x8x32xf32>,
    %c1 = arith.constant 1 : index
    %81 = arith.index_cast %16 : i32 to index
    %c0_29 = arith.constant 0 : index
    %c0_30 = arith.constant 0 : index
    %82 = vector.load %arg12[%c1, %81, %c0_29, %c0_30] : memref<2x8x8x32xf32, #tpu.memory_space<vmem>>, vector<1x1x8x32xf32>
    %83 = vector.shape_cast %82 : vector<1x1x8x32xf32> to vector<8x32xf32>
    %84 = vector.shape_cast %76 : vector<8x32xf32> to vector<1x1x8x32xf32>
    tpu.vector_store %arg12[%c1, %81, %c0_29, %c0_30], %84 {strides = array<i32>} : memref<2x8x8x32xf32, #tpu.memory_space<vmem>>, vector<1x1x8x32xf32>,
    %85 = tpu.concatenate %51, %76 in 1 : vector<8x32xf32>, vector<8x32xf32> -> vector<8x64xf32>
    %c1_i32 = arith.constant 1 : i32
    %c0_31 = arith.constant 0 : index
    %c0_32 = arith.constant 0 : index
    %86 = vector.load %arg3[%c0_31, %c0_32] : memref<64x256xf32, #tpu.memory_space<vmem>>, vector<64x256xf32>
    %cst_33 = arith.constant dense<0.000000e+00> : vector<8x256xf32>
    %87 = tpu.matmul %85, %86, %cst_33 {dimension_numbers = #tpu.dot_dimension_numbers<[1], [0], [0], [1], [0, 0, 1, 1], [], []>} : vector<8x64xf32>, vector<64x256xf32>, vector<8x256xf32> -> vector<8x256xf32>
    %c7_i32_34 = arith.constant 7 : i32
    %88 = arith.subi %c7_i32_34, %c1_i32 : i32
    %89 = arith.index_cast %c1_i32 : i32 to index
    %c0_35 = arith.constant 0 : index
    %c0_36 = arith.constant 0 : index
    %90 = vector.load %arg10[%89, %c0_35, %c0_36] : memref<8x8x128xf32, #tpu.memory_space<vmem>>, vector<1x8x128xf32>
    %91 = vector.shape_cast %90 : vector<1x8x128xf32> to vector<8x128xf32>
    %92 = vector.extract_strided_slice %87 {offsets = [0, 0], sizes = [8, 128], strides = [1, 1]} : vector<8x256xf32> to vector<8x128xf32>
    %93 = arith.addf %91, %92 : vector<8x128xf32>
    %94 = arith.index_cast %88 : i32 to index
    %c0_37 = arith.constant 0 : index
    %c0_38 = arith.constant 0 : index
    %95 = vector.load %arg11[%94, %c0_37, %c0_38] : memref<8x8x128xf32, #tpu.memory_space<vmem>>, vector<1x8x128xf32>
    %96 = vector.shape_cast %95 : vector<1x8x128xf32> to vector<8x128xf32>
    %97 = vector.extract_strided_slice %87 {offsets = [0, 128], sizes = [8, 128], strides = [1, 1]} : vector<8x256xf32> to vector<8x128xf32>
    %98 = arith.addf %96, %97 : vector<8x128xf32>
    %99 = vector.extract_strided_slice %93 {offsets = [0, 0], sizes = [8, 32], strides = [1, 1]} : vector<8x128xf32> to vector<8x32xf32>
    %100 = arith.negf %99 : vector<8x32xf32>
    %101 = math.exp %100 : vector<8x32xf32>
    %cst_39 = arith.constant 1.000000e+00 : f32
    %102 = vector.broadcast %cst_39 : f32 to vector<8x32xf32>
    %103 = arith.addf %102, %101 : vector<8x32xf32>
    %104 = arith.divf %102, %103 : vector<8x32xf32>
    %105 = vector.extract_strided_slice %93 {offsets = [0, 32], sizes = [8, 32], strides = [1, 1]} : vector<8x128xf32> to vector<8x32xf32>
    %106 = arith.negf %105 : vector<8x32xf32>
    %107 = math.exp %106 : vector<8x32xf32>
    %cst_40 = arith.constant 1.000000e+00 : f32
    %108 = vector.broadcast %cst_40 : f32 to vector<8x32xf32>
    %109 = arith.addf %108, %107 : vector<8x32xf32>
    %110 = arith.divf %108, %109 : vector<8x32xf32>
    %111 = vector.extract_strided_slice %93 {offsets = [0, 64], sizes = [8, 32], strides = [1, 1]} : vector<8x128xf32> to vector<8x32xf32>
    %112 = math.tanh %111 : vector<8x32xf32>
    %113 = vector.extract_strided_slice %93 {offsets = [0, 96], sizes = [8, 32], strides = [1, 1]} : vector<8x128xf32> to vector<8x32xf32>
    %114 = arith.negf %113 : vector<8x32xf32>
    %115 = math.exp %114 : vector<8x32xf32>
    %cst_41 = arith.constant 1.000000e+00 : f32
    %116 = vector.broadcast %cst_41 : f32 to vector<8x32xf32>
    %117 = arith.addf %116, %115 : vector<8x32xf32>
    %118 = arith.divf %116, %117 : vector<8x32xf32>
    %119 = arith.mulf %110, %49 : vector<8x32xf32>
    %120 = arith.mulf %104, %112 : vector<8x32xf32>
    %121 = arith.addf %119, %120 : vector<8x32xf32>
    %122 = math.tanh %121 : vector<8x32xf32>
    %123 = arith.mulf %118, %122 : vector<8x32xf32>
    %124 = vector.extract_strided_slice %98 {offsets = [0, 0], sizes = [8, 32], strides = [1, 1]} : vector<8x128xf32> to vector<8x32xf32>
    %125 = arith.negf %124 : vector<8x32xf32>
    %126 = math.exp %125 : vector<8x32xf32>
    %cst_42 = arith.constant 1.000000e+00 : f32
    %127 = vector.broadcast %cst_42 : f32 to vector<8x32xf32>
    %128 = arith.addf %127, %126 : vector<8x32xf32>
    %129 = arith.divf %127, %128 : vector<8x32xf32>
    %130 = vector.extract_strided_slice %98 {offsets = [0, 32], sizes = [8, 32], strides = [1, 1]} : vector<8x128xf32> to vector<8x32xf32>
    %131 = arith.negf %130 : vector<8x32xf32>
    %132 = math.exp %131 : vector<8x32xf32>
    %cst_43 = arith.constant 1.000000e+00 : f32
    %133 = vector.broadcast %cst_43 : f32 to vector<8x32xf32>
    %134 = arith.addf %133, %132 : vector<8x32xf32>
    %135 = arith.divf %133, %134 : vector<8x32xf32>
    %136 = vector.extract_strided_slice %98 {offsets = [0, 64], sizes = [8, 32], strides = [1, 1]} : vector<8x128xf32> to vector<8x32xf32>
    %137 = math.tanh %136 : vector<8x32xf32>
    %138 = vector.extract_strided_slice %98 {offsets = [0, 96], sizes = [8, 32], strides = [1, 1]} : vector<8x128xf32> to vector<8x32xf32>
    %139 = arith.negf %138 : vector<8x32xf32>
    %140 = math.exp %139 : vector<8x32xf32>
    %cst_44 = arith.constant 1.000000e+00 : f32
    %141 = vector.broadcast %cst_44 : f32 to vector<8x32xf32>
    %142 = arith.addf %141, %140 : vector<8x32xf32>
    %143 = arith.divf %141, %142 : vector<8x32xf32>
    %144 = arith.mulf %135, %74 : vector<8x32xf32>
    %145 = arith.mulf %129, %137 : vector<8x32xf32>
    %146 = arith.addf %144, %145 : vector<8x32xf32>
    %147 = math.tanh %146 : vector<8x32xf32>
    %148 = arith.mulf %143, %147 : vector<8x32xf32>
    %c0_45 = arith.constant 0 : index
    %149 = arith.index_cast %c1_i32 : i32 to index
    %c0_46 = arith.constant 0 : index
    %c0_47 = arith.constant 0 : index
    %150 = vector.load %arg12[%c0_45, %149, %c0_46, %c0_47] : memref<2x8x8x32xf32, #tpu.memory_space<vmem>>, vector<1x1x8x32xf32>
    %151 = vector.shape_cast %150 : vector<1x1x8x32xf32> to vector<8x32xf32>
    %152 = vector.shape_cast %123 : vector<8x32xf32> to vector<1x1x8x32xf32>
    tpu.vector_store %arg12[%c0_45, %149, %c0_46, %c0_47], %152 {strides = array<i32>} : memref<2x8x8x32xf32, #tpu.memory_space<vmem>>, vector<1x1x8x32xf32>,
    %c1_48 = arith.constant 1 : index
    %153 = arith.index_cast %88 : i32 to index
    %c0_49 = arith.constant 0 : index
    %c0_50 = arith.constant 0 : index
    %154 = vector.load %arg12[%c1_48, %153, %c0_49, %c0_50] : memref<2x8x8x32xf32, #tpu.memory_space<vmem>>, vector<1x1x8x32xf32>
    %155 = vector.shape_cast %154 : vector<1x1x8x32xf32> to vector<8x32xf32>
    %156 = vector.shape_cast %148 : vector<8x32xf32> to vector<1x1x8x32xf32>
    tpu.vector_store %arg12[%c1_48, %153, %c0_49, %c0_50], %156 {strides = array<i32>} : memref<2x8x8x32xf32, #tpu.memory_space<vmem>>, vector<1x1x8x32xf32>,
    %157 = tpu.concatenate %123, %148 in 1 : vector<8x32xf32>, vector<8x32xf32> -> vector<8x64xf32>
    %c2_i32 = arith.constant 2 : i32
    %c0_51 = arith.constant 0 : index
    %c0_52 = arith.constant 0 : index
    %158 = vector.load %arg3[%c0_51, %c0_52] : memref<64x256xf32, #tpu.memory_space<vmem>>, vector<64x256xf32>
    %cst_53 = arith.constant dense<0.000000e+00> : vector<8x256xf32>
    %159 = tpu.matmul %157, %158, %cst_53 {dimension_numbers = #tpu.dot_dimension_numbers<[1], [0], [0], [1], [0, 0, 1, 1], [], []>} : vector<8x64xf32>, vector<64x256xf32>, vector<8x256xf32> -> vector<8x256xf32>
    %c7_i32_54 = arith.constant 7 : i32
    %160 = arith.subi %c7_i32_54, %c2_i32 : i32
    %161 = arith.index_cast %c2_i32 : i32 to index
    %c0_55 = arith.constant 0 : index
    %c0_56 = arith.constant 0 : index
    %162 = vector.load %arg10[%161, %c0_55, %c0_56] : memref<8x8x128xf32, #tpu.memory_space<vmem>>, vector<1x8x128xf32>
    %163 = vector.shape_cast %162 : vector<1x8x128xf32> to vector<8x128xf32>
    %164 = vector.extract_strided_slice %159 {offsets = [0, 0], sizes = [8, 128], strides = [1, 1]} : vector<8x256xf32> to vector<8x128xf32>
    %165 = arith.addf %163, %164 : vector<8x128xf32>
    %166 = arith.index_cast %160 : i32 to index
    %c0_57 = arith.constant 0 : index
    %c0_58 = arith.constant 0 : index
    %167 = vector.load %arg11[%166, %c0_57, %c0_58] : memref<8x8x128xf32, #tpu.memory_space<vmem>>, vector<1x8x128xf32>
    %168 = vector.shape_cast %167 : vector<1x8x128xf32> to vector<8x128xf32>
    %169 = vector.extract_strided_slice %159 {offsets = [0, 128], sizes = [8, 128], strides = [1, 1]} : vector<8x256xf32> to vector<8x128xf32>
    %170 = arith.addf %168, %169 : vector<8x128xf32>
    %171 = vector.extract_strided_slice %165 {offsets = [0, 0], sizes = [8, 32], strides = [1, 1]} : vector<8x128xf32> to vector<8x32xf32>
    %172 = arith.negf %171 : vector<8x32xf32>
    %173 = math.exp %172 : vector<8x32xf32>
    %cst_59 = arith.constant 1.000000e+00 : f32
    %174 = vector.broadcast %cst_59 : f32 to vector<8x32xf32>
    %175 = arith.addf %174, %173 : vector<8x32xf32>
    %176 = arith.divf %174, %175 : vector<8x32xf32>
    %177 = vector.extract_strided_slice %165 {offsets = [0, 32], sizes = [8, 32], strides = [1, 1]} : vector<8x128xf32> to vector<8x32xf32>
    %178 = arith.negf %177 : vector<8x32xf32>
    %179 = math.exp %178 : vector<8x32xf32>
    %cst_60 = arith.constant 1.000000e+00 : f32
    %180 = vector.broadcast %cst_60 : f32 to vector<8x32xf32>
    %181 = arith.addf %180, %179 : vector<8x32xf32>
    %182 = arith.divf %180, %181 : vector<8x32xf32>
    %183 = vector.extract_strided_slice %165 {offsets = [0, 64], sizes = [8, 32], strides = [1, 1]} : vector<8x128xf32> to vector<8x32xf32>
    %184 = math.tanh %183 : vector<8x32xf32>
    %185 = vector.extract_strided_slice %165 {offsets = [0, 96], sizes = [8, 32], strides = [1, 1]} : vector<8x128xf32> to vector<8x32xf32>
    %186 = arith.negf %185 : vector<8x32xf32>
    %187 = math.exp %186 : vector<8x32xf32>
    %cst_61 = arith.constant 1.000000e+00 : f32
    %188 = vector.broadcast %cst_61 : f32 to vector<8x32xf32>
    %189 = arith.addf %188, %187 : vector<8x32xf32>
    %190 = arith.divf %188, %189 : vector<8x32xf32>
    %191 = arith.mulf %182, %121 : vector<8x32xf32>
    %192 = arith.mulf %176, %184 : vector<8x32xf32>
    %193 = arith.addf %191, %192 : vector<8x32xf32>
    %194 = math.tanh %193 : vector<8x32xf32>
    %195 = arith.mulf %190, %194 : vector<8x32xf32>
    %196 = vector.extract_strided_slice %170 {offsets = [0, 0], sizes = [8, 32], strides = [1, 1]} : vector<8x128xf32> to vector<8x32xf32>
    %197 = arith.negf %196 : vector<8x32xf32>
    %198 = math.exp %197 : vector<8x32xf32>
    %cst_62 = arith.constant 1.000000e+00 : f32
    %199 = vector.broadcast %cst_62 : f32 to vector<8x32xf32>
    %200 = arith.addf %199, %198 : vector<8x32xf32>
    %201 = arith.divf %199, %200 : vector<8x32xf32>
    %202 = vector.extract_strided_slice %170 {offsets = [0, 32], sizes = [8, 32], strides = [1, 1]} : vector<8x128xf32> to vector<8x32xf32>
    %203 = arith.negf %202 : vector<8x32xf32>
    %204 = math.exp %203 : vector<8x32xf32>
    %cst_63 = arith.constant 1.000000e+00 : f32
    %205 = vector.broadcast %cst_63 : f32 to vector<8x32xf32>
    %206 = arith.addf %205, %204 : vector<8x32xf32>
    %207 = arith.divf %205, %206 : vector<8x32xf32>
    %208 = vector.extract_strided_slice %170 {offsets = [0, 64], sizes = [8, 32], strides = [1, 1]} : vector<8x128xf32> to vector<8x32xf32>
    %209 = math.tanh %208 : vector<8x32xf32>
    %210 = vector.extract_strided_slice %170 {offsets = [0, 96], sizes = [8, 32], strides = [1, 1]} : vector<8x128xf32> to vector<8x32xf32>
    %211 = arith.negf %210 : vector<8x32xf32>
    %212 = math.exp %211 : vector<8x32xf32>
    %cst_64 = arith.constant 1.000000e+00 : f32
    %213 = vector.broadcast %cst_64 : f32 to vector<8x32xf32>
    %214 = arith.addf %213, %212 : vector<8x32xf32>
    %215 = arith.divf %213, %214 : vector<8x32xf32>
    %216 = arith.mulf %207, %146 : vector<8x32xf32>
    %217 = arith.mulf %201, %209 : vector<8x32xf32>
    %218 = arith.addf %216, %217 : vector<8x32xf32>
    %219 = math.tanh %218 : vector<8x32xf32>
    %220 = arith.mulf %215, %219 : vector<8x32xf32>
    %c0_65 = arith.constant 0 : index
    %221 = arith.index_cast %c2_i32 : i32 to index
    %c0_66 = arith.constant 0 : index
    %c0_67 = arith.constant 0 : index
    %222 = vector.load %arg12[%c0_65, %221, %c0_66, %c0_67] : memref<2x8x8x32xf32, #tpu.memory_space<vmem>>, vector<1x1x8x32xf32>
    %223 = vector.shape_cast %222 : vector<1x1x8x32xf32> to vector<8x32xf32>
    %224 = vector.shape_cast %195 : vector<8x32xf32> to vector<1x1x8x32xf32>
    tpu.vector_store %arg12[%c0_65, %221, %c0_66, %c0_67], %224 {strides = array<i32>} : memref<2x8x8x32xf32, #tpu.memory_space<vmem>>, vector<1x1x8x32xf32>,
    %c1_68 = arith.constant 1 : index
    %225 = arith.index_cast %160 : i32 to index
    %c0_69 = arith.constant 0 : index
    %c0_70 = arith.constant 0 : index
    %226 = vector.load %arg12[%c1_68, %225, %c0_69, %c0_70] : memref<2x8x8x32xf32, #tpu.memory_space<vmem>>, vector<1x1x8x32xf32>
    %227 = vector.shape_cast %226 : vector<1x1x8x32xf32> to vector<8x32xf32>
    %228 = vector.shape_cast %220 : vector<8x32xf32> to vector<1x1x8x32xf32>
    tpu.vector_store %arg12[%c1_68, %225, %c0_69, %c0_70], %228 {strides = array<i32>} : memref<2x8x8x32xf32, #tpu.memory_space<vmem>>, vector<1x1x8x32xf32>,
    %229 = tpu.concatenate %195, %220 in 1 : vector<8x32xf32>, vector<8x32xf32> -> vector<8x64xf32>
    %c3_i32 = arith.constant 3 : i32
    %c0_71 = arith.constant 0 : index
    %c0_72 = arith.constant 0 : index
    %230 = vector.load %arg3[%c0_71, %c0_72] : memref<64x256xf32, #tpu.memory_space<vmem>>, vector<64x256xf32>
    %cst_73 = arith.constant dense<0.000000e+00> : vector<8x256xf32>
    %231 = tpu.matmul %229, %230, %cst_73 {dimension_numbers = #tpu.dot_dimension_numbers<[1], [0], [0], [1], [0, 0, 1, 1], [], []>} : vector<8x64xf32>, vector<64x256xf32>, vector<8x256xf32> -> vector<8x256xf32>
    %c7_i32_74 = arith.constant 7 : i32
    %232 = arith.subi %c7_i32_74, %c3_i32 : i32
    %233 = arith.index_cast %c3_i32 : i32 to index
    %c0_75 = arith.constant 0 : index
    %c0_76 = arith.constant 0 : index
    %234 = vector.load %arg10[%233, %c0_75, %c0_76] : memref<8x8x128xf32, #tpu.memory_space<vmem>>, vector<1x8x128xf32>
    %235 = vector.shape_cast %234 : vector<1x8x128xf32> to vector<8x128xf32>
    %236 = vector.extract_strided_slice %231 {offsets = [0, 0], sizes = [8, 128], strides = [1, 1]} : vector<8x256xf32> to vector<8x128xf32>
    %237 = arith.addf %235, %236 : vector<8x128xf32>
    %238 = arith.index_cast %232 : i32 to index
    %c0_77 = arith.constant 0 : index
    %c0_78 = arith.constant 0 : index
    %239 = vector.load %arg11[%238, %c0_77, %c0_78] : memref<8x8x128xf32, #tpu.memory_space<vmem>>, vector<1x8x128xf32>
    %240 = vector.shape_cast %239 : vector<1x8x128xf32> to vector<8x128xf32>
    %241 = vector.extract_strided_slice %231 {offsets = [0, 128], sizes = [8, 128], strides = [1, 1]} : vector<8x256xf32> to vector<8x128xf32>
    %242 = arith.addf %240, %241 : vector<8x128xf32>
    %243 = vector.extract_strided_slice %237 {offsets = [0, 0], sizes = [8, 32], strides = [1, 1]} : vector<8x128xf32> to vector<8x32xf32>
    %244 = arith.negf %243 : vector<8x32xf32>
    %245 = math.exp %244 : vector<8x32xf32>
    %cst_79 = arith.constant 1.000000e+00 : f32
    %246 = vector.broadcast %cst_79 : f32 to vector<8x32xf32>
    %247 = arith.addf %246, %245 : vector<8x32xf32>
    %248 = arith.divf %246, %247 : vector<8x32xf32>
    %249 = vector.extract_strided_slice %237 {offsets = [0, 32], sizes = [8, 32], strides = [1, 1]} : vector<8x128xf32> to vector<8x32xf32>
    %250 = arith.negf %249 : vector<8x32xf32>
    %251 = math.exp %250 : vector<8x32xf32>
    %cst_80 = arith.constant 1.000000e+00 : f32
    %252 = vector.broadcast %cst_80 : f32 to vector<8x32xf32>
    %253 = arith.addf %252, %251 : vector<8x32xf32>
    %254 = arith.divf %252, %253 : vector<8x32xf32>
    %255 = vector.extract_strided_slice %237 {offsets = [0, 64], sizes = [8, 32], strides = [1, 1]} : vector<8x128xf32> to vector<8x32xf32>
    %256 = math.tanh %255 : vector<8x32xf32>
    %257 = vector.extract_strided_slice %237 {offsets = [0, 96], sizes = [8, 32], strides = [1, 1]} : vector<8x128xf32> to vector<8x32xf32>
    %258 = arith.negf %257 : vector<8x32xf32>
    %259 = math.exp %258 : vector<8x32xf32>
    %cst_81 = arith.constant 1.000000e+00 : f32
    %260 = vector.broadcast %cst_81 : f32 to vector<8x32xf32>
    %261 = arith.addf %260, %259 : vector<8x32xf32>
    %262 = arith.divf %260, %261 : vector<8x32xf32>
    %263 = arith.mulf %254, %193 : vector<8x32xf32>
    %264 = arith.mulf %248, %256 : vector<8x32xf32>
    %265 = arith.addf %263, %264 : vector<8x32xf32>
    %266 = math.tanh %265 : vector<8x32xf32>
    %267 = arith.mulf %262, %266 : vector<8x32xf32>
    %268 = vector.extract_strided_slice %242 {offsets = [0, 0], sizes = [8, 32], strides = [1, 1]} : vector<8x128xf32> to vector<8x32xf32>
    %269 = arith.negf %268 : vector<8x32xf32>
    %270 = math.exp %269 : vector<8x32xf32>
    %cst_82 = arith.constant 1.000000e+00 : f32
    %271 = vector.broadcast %cst_82 : f32 to vector<8x32xf32>
    %272 = arith.addf %271, %270 : vector<8x32xf32>
    %273 = arith.divf %271, %272 : vector<8x32xf32>
    %274 = vector.extract_strided_slice %242 {offsets = [0, 32], sizes = [8, 32], strides = [1, 1]} : vector<8x128xf32> to vector<8x32xf32>
    %275 = arith.negf %274 : vector<8x32xf32>
    %276 = math.exp %275 : vector<8x32xf32>
    %cst_83 = arith.constant 1.000000e+00 : f32
    %277 = vector.broadcast %cst_83 : f32 to vector<8x32xf32>
    %278 = arith.addf %277, %276 : vector<8x32xf32>
    %279 = arith.divf %277, %278 : vector<8x32xf32>
    %280 = vector.extract_strided_slice %242 {offsets = [0, 64], sizes = [8, 32], strides = [1, 1]} : vector<8x128xf32> to vector<8x32xf32>
    %281 = math.tanh %280 : vector<8x32xf32>
    %282 = vector.extract_strided_slice %242 {offsets = [0, 96], sizes = [8, 32], strides = [1, 1]} : vector<8x128xf32> to vector<8x32xf32>
    %283 = arith.negf %282 : vector<8x32xf32>
    %284 = math.exp %283 : vector<8x32xf32>
    %cst_84 = arith.constant 1.000000e+00 : f32
    %285 = vector.broadcast %cst_84 : f32 to vector<8x32xf32>
    %286 = arith.addf %285, %284 : vector<8x32xf32>
    %287 = arith.divf %285, %286 : vector<8x32xf32>
    %288 = arith.mulf %279, %218 : vector<8x32xf32>
    %289 = arith.mulf %273, %281 : vector<8x32xf32>
    %290 = arith.addf %288, %289 : vector<8x32xf32>
    %291 = math.tanh %290 : vector<8x32xf32>
    %292 = arith.mulf %287, %291 : vector<8x32xf32>
    %c0_85 = arith.constant 0 : index
    %293 = arith.index_cast %c3_i32 : i32 to index
    %c0_86 = arith.constant 0 : index
    %c0_87 = arith.constant 0 : index
    %294 = vector.load %arg12[%c0_85, %293, %c0_86, %c0_87] : memref<2x8x8x32xf32, #tpu.memory_space<vmem>>, vector<1x1x8x32xf32>
    %295 = vector.shape_cast %294 : vector<1x1x8x32xf32> to vector<8x32xf32>
    %296 = vector.shape_cast %267 : vector<8x32xf32> to vector<1x1x8x32xf32>
    tpu.vector_store %arg12[%c0_85, %293, %c0_86, %c0_87], %296 {strides = array<i32>} : memref<2x8x8x32xf32, #tpu.memory_space<vmem>>, vector<1x1x8x32xf32>,
    %c1_88 = arith.constant 1 : index
    %297 = arith.index_cast %232 : i32 to index
    %c0_89 = arith.constant 0 : index
    %c0_90 = arith.constant 0 : index
    %298 = vector.load %arg12[%c1_88, %297, %c0_89, %c0_90] : memref<2x8x8x32xf32, #tpu.memory_space<vmem>>, vector<1x1x8x32xf32>
    %299 = vector.shape_cast %298 : vector<1x1x8x32xf32> to vector<8x32xf32>
    %300 = vector.shape_cast %292 : vector<8x32xf32> to vector<1x1x8x32xf32>
    tpu.vector_store %arg12[%c1_88, %297, %c0_89, %c0_90], %300 {strides = array<i32>} : memref<2x8x8x32xf32, #tpu.memory_space<vmem>>, vector<1x1x8x32xf32>,
    %301 = tpu.concatenate %267, %292 in 1 : vector<8x32xf32>, vector<8x32xf32> -> vector<8x64xf32>
    %c4_i32 = arith.constant 4 : i32
    %c0_91 = arith.constant 0 : index
    %c0_92 = arith.constant 0 : index
    %302 = vector.load %arg3[%c0_91, %c0_92] : memref<64x256xf32, #tpu.memory_space<vmem>>, vector<64x256xf32>
    %cst_93 = arith.constant dense<0.000000e+00> : vector<8x256xf32>
    %303 = tpu.matmul %301, %302, %cst_93 {dimension_numbers = #tpu.dot_dimension_numbers<[1], [0], [0], [1], [0, 0, 1, 1], [], []>} : vector<8x64xf32>, vector<64x256xf32>, vector<8x256xf32> -> vector<8x256xf32>
    %c7_i32_94 = arith.constant 7 : i32
    %304 = arith.subi %c7_i32_94, %c4_i32 : i32
    %305 = arith.index_cast %c4_i32 : i32 to index
    %c0_95 = arith.constant 0 : index
    %c0_96 = arith.constant 0 : index
    %306 = vector.load %arg10[%305, %c0_95, %c0_96] : memref<8x8x128xf32, #tpu.memory_space<vmem>>, vector<1x8x128xf32>
    %307 = vector.shape_cast %306 : vector<1x8x128xf32> to vector<8x128xf32>
    %308 = vector.extract_strided_slice %303 {offsets = [0, 0], sizes = [8, 128], strides = [1, 1]} : vector<8x256xf32> to vector<8x128xf32>
    %309 = arith.addf %307, %308 : vector<8x128xf32>
    %310 = arith.index_cast %304 : i32 to index
    %c0_97 = arith.constant 0 : index
    %c0_98 = arith.constant 0 : index
    %311 = vector.load %arg11[%310, %c0_97, %c0_98] : memref<8x8x128xf32, #tpu.memory_space<vmem>>, vector<1x8x128xf32>
    %312 = vector.shape_cast %311 : vector<1x8x128xf32> to vector<8x128xf32>
    %313 = vector.extract_strided_slice %303 {offsets = [0, 128], sizes = [8, 128], strides = [1, 1]} : vector<8x256xf32> to vector<8x128xf32>
    %314 = arith.addf %312, %313 : vector<8x128xf32>
    %315 = vector.extract_strided_slice %309 {offsets = [0, 0], sizes = [8, 32], strides = [1, 1]} : vector<8x128xf32> to vector<8x32xf32>
    %316 = arith.negf %315 : vector<8x32xf32>
    %317 = math.exp %316 : vector<8x32xf32>
    %cst_99 = arith.constant 1.000000e+00 : f32
    %318 = vector.broadcast %cst_99 : f32 to vector<8x32xf32>
    %319 = arith.addf %318, %317 : vector<8x32xf32>
    %320 = arith.divf %318, %319 : vector<8x32xf32>
    %321 = vector.extract_strided_slice %309 {offsets = [0, 32], sizes = [8, 32], strides = [1, 1]} : vector<8x128xf32> to vector<8x32xf32>
    %322 = arith.negf %321 : vector<8x32xf32>
    %323 = math.exp %322 : vector<8x32xf32>
    %cst_100 = arith.constant 1.000000e+00 : f32
    %324 = vector.broadcast %cst_100 : f32 to vector<8x32xf32>
    %325 = arith.addf %324, %323 : vector<8x32xf32>
    %326 = arith.divf %324, %325 : vector<8x32xf32>
    %327 = vector.extract_strided_slice %309 {offsets = [0, 64], sizes = [8, 32], strides = [1, 1]} : vector<8x128xf32> to vector<8x32xf32>
    %328 = math.tanh %327 : vector<8x32xf32>
    %329 = vector.extract_strided_slice %309 {offsets = [0, 96], sizes = [8, 32], strides = [1, 1]} : vector<8x128xf32> to vector<8x32xf32>
    %330 = arith.negf %329 : vector<8x32xf32>
    %331 = math.exp %330 : vector<8x32xf32>
    %cst_101 = arith.constant 1.000000e+00 : f32
    %332 = vector.broadcast %cst_101 : f32 to vector<8x32xf32>
    %333 = arith.addf %332, %331 : vector<8x32xf32>
    %334 = arith.divf %332, %333 : vector<8x32xf32>
    %335 = arith.mulf %326, %265 : vector<8x32xf32>
    %336 = arith.mulf %320, %328 : vector<8x32xf32>
    %337 = arith.addf %335, %336 : vector<8x32xf32>
    %338 = math.tanh %337 : vector<8x32xf32>
    %339 = arith.mulf %334, %338 : vector<8x32xf32>
    %340 = vector.extract_strided_slice %314 {offsets = [0, 0], sizes = [8, 32], strides = [1, 1]} : vector<8x128xf32> to vector<8x32xf32>
    %341 = arith.negf %340 : vector<8x32xf32>
    %342 = math.exp %341 : vector<8x32xf32>
    %cst_102 = arith.constant 1.000000e+00 : f32
    %343 = vector.broadcast %cst_102 : f32 to vector<8x32xf32>
    %344 = arith.addf %343, %342 : vector<8x32xf32>
    %345 = arith.divf %343, %344 : vector<8x32xf32>
    %346 = vector.extract_strided_slice %314 {offsets = [0, 32], sizes = [8, 32], strides = [1, 1]} : vector<8x128xf32> to vector<8x32xf32>
    %347 = arith.negf %346 : vector<8x32xf32>
    %348 = math.exp %347 : vector<8x32xf32>
    %cst_103 = arith.constant 1.000000e+00 : f32
    %349 = vector.broadcast %cst_103 : f32 to vector<8x32xf32>
    %350 = arith.addf %349, %348 : vector<8x32xf32>
    %351 = arith.divf %349, %350 : vector<8x32xf32>
    %352 = vector.extract_strided_slice %314 {offsets = [0, 64], sizes = [8, 32], strides = [1, 1]} : vector<8x128xf32> to vector<8x32xf32>
    %353 = math.tanh %352 : vector<8x32xf32>
    %354 = vector.extract_strided_slice %314 {offsets = [0, 96], sizes = [8, 32], strides = [1, 1]} : vector<8x128xf32> to vector<8x32xf32>
    %355 = arith.negf %354 : vector<8x32xf32>
    %356 = math.exp %355 : vector<8x32xf32>
    %cst_104 = arith.constant 1.000000e+00 : f32
    %357 = vector.broadcast %cst_104 : f32 to vector<8x32xf32>
    %358 = arith.addf %357, %356 : vector<8x32xf32>
    %359 = arith.divf %357, %358 : vector<8x32xf32>
    %360 = arith.mulf %351, %290 : vector<8x32xf32>
    %361 = arith.mulf %345, %353 : vector<8x32xf32>
    %362 = arith.addf %360, %361 : vector<8x32xf32>
    %363 = math.tanh %362 : vector<8x32xf32>
    %364 = arith.mulf %359, %363 : vector<8x32xf32>
    %c0_105 = arith.constant 0 : index
    %365 = arith.index_cast %c4_i32 : i32 to index
    %c0_106 = arith.constant 0 : index
    %c0_107 = arith.constant 0 : index
    %366 = vector.load %arg12[%c0_105, %365, %c0_106, %c0_107] : memref<2x8x8x32xf32, #tpu.memory_space<vmem>>, vector<1x1x8x32xf32>
    %367 = vector.shape_cast %366 : vector<1x1x8x32xf32> to vector<8x32xf32>
    %368 = vector.shape_cast %339 : vector<8x32xf32> to vector<1x1x8x32xf32>
    tpu.vector_store %arg12[%c0_105, %365, %c0_106, %c0_107], %368 {strides = array<i32>} : memref<2x8x8x32xf32, #tpu.memory_space<vmem>>, vector<1x1x8x32xf32>,
    %c1_108 = arith.constant 1 : index
    %369 = arith.index_cast %304 : i32 to index
    %c0_109 = arith.constant 0 : index
    %c0_110 = arith.constant 0 : index
    %370 = vector.load %arg12[%c1_108, %369, %c0_109, %c0_110] : memref<2x8x8x32xf32, #tpu.memory_space<vmem>>, vector<1x1x8x32xf32>
    %371 = vector.shape_cast %370 : vector<1x1x8x32xf32> to vector<8x32xf32>
    %372 = vector.shape_cast %364 : vector<8x32xf32> to vector<1x1x8x32xf32>
    tpu.vector_store %arg12[%c1_108, %369, %c0_109, %c0_110], %372 {strides = array<i32>} : memref<2x8x8x32xf32, #tpu.memory_space<vmem>>, vector<1x1x8x32xf32>,
    %373 = tpu.concatenate %339, %364 in 1 : vector<8x32xf32>, vector<8x32xf32> -> vector<8x64xf32>
    %c5_i32 = arith.constant 5 : i32
    %c0_111 = arith.constant 0 : index
    %c0_112 = arith.constant 0 : index
    %374 = vector.load %arg3[%c0_111, %c0_112] : memref<64x256xf32, #tpu.memory_space<vmem>>, vector<64x256xf32>
    %cst_113 = arith.constant dense<0.000000e+00> : vector<8x256xf32>
    %375 = tpu.matmul %373, %374, %cst_113 {dimension_numbers = #tpu.dot_dimension_numbers<[1], [0], [0], [1], [0, 0, 1, 1], [], []>} : vector<8x64xf32>, vector<64x256xf32>, vector<8x256xf32> -> vector<8x256xf32>
    %c7_i32_114 = arith.constant 7 : i32
    %376 = arith.subi %c7_i32_114, %c5_i32 : i32
    %377 = arith.index_cast %c5_i32 : i32 to index
    %c0_115 = arith.constant 0 : index
    %c0_116 = arith.constant 0 : index
    %378 = vector.load %arg10[%377, %c0_115, %c0_116] : memref<8x8x128xf32, #tpu.memory_space<vmem>>, vector<1x8x128xf32>
    %379 = vector.shape_cast %378 : vector<1x8x128xf32> to vector<8x128xf32>
    %380 = vector.extract_strided_slice %375 {offsets = [0, 0], sizes = [8, 128], strides = [1, 1]} : vector<8x256xf32> to vector<8x128xf32>
    %381 = arith.addf %379, %380 : vector<8x128xf32>
    %382 = arith.index_cast %376 : i32 to index
    %c0_117 = arith.constant 0 : index
    %c0_118 = arith.constant 0 : index
    %383 = vector.load %arg11[%382, %c0_117, %c0_118] : memref<8x8x128xf32, #tpu.memory_space<vmem>>, vector<1x8x128xf32>
    %384 = vector.shape_cast %383 : vector<1x8x128xf32> to vector<8x128xf32>
    %385 = vector.extract_strided_slice %375 {offsets = [0, 128], sizes = [8, 128], strides = [1, 1]} : vector<8x256xf32> to vector<8x128xf32>
    %386 = arith.addf %384, %385 : vector<8x128xf32>
    %387 = vector.extract_strided_slice %381 {offsets = [0, 0], sizes = [8, 32], strides = [1, 1]} : vector<8x128xf32> to vector<8x32xf32>
    %388 = arith.negf %387 : vector<8x32xf32>
    %389 = math.exp %388 : vector<8x32xf32>
    %cst_119 = arith.constant 1.000000e+00 : f32
    %390 = vector.broadcast %cst_119 : f32 to vector<8x32xf32>
    %391 = arith.addf %390, %389 : vector<8x32xf32>
    %392 = arith.divf %390, %391 : vector<8x32xf32>
    %393 = vector.extract_strided_slice %381 {offsets = [0, 32], sizes = [8, 32], strides = [1, 1]} : vector<8x128xf32> to vector<8x32xf32>
    %394 = arith.negf %393 : vector<8x32xf32>
    %395 = math.exp %394 : vector<8x32xf32>
    %cst_120 = arith.constant 1.000000e+00 : f32
    %396 = vector.broadcast %cst_120 : f32 to vector<8x32xf32>
    %397 = arith.addf %396, %395 : vector<8x32xf32>
    %398 = arith.divf %396, %397 : vector<8x32xf32>
    %399 = vector.extract_strided_slice %381 {offsets = [0, 64], sizes = [8, 32], strides = [1, 1]} : vector<8x128xf32> to vector<8x32xf32>
    %400 = math.tanh %399 : vector<8x32xf32>
    %401 = vector.extract_strided_slice %381 {offsets = [0, 96], sizes = [8, 32], strides = [1, 1]} : vector<8x128xf32> to vector<8x32xf32>
    %402 = arith.negf %401 : vector<8x32xf32>
    %403 = math.exp %402 : vector<8x32xf32>
    %cst_121 = arith.constant 1.000000e+00 : f32
    %404 = vector.broadcast %cst_121 : f32 to vector<8x32xf32>
    %405 = arith.addf %404, %403 : vector<8x32xf32>
    %406 = arith.divf %404, %405 : vector<8x32xf32>
    %407 = arith.mulf %398, %337 : vector<8x32xf32>
    %408 = arith.mulf %392, %400 : vector<8x32xf32>
    %409 = arith.addf %407, %408 : vector<8x32xf32>
    %410 = math.tanh %409 : vector<8x32xf32>
    %411 = arith.mulf %406, %410 : vector<8x32xf32>
    %412 = vector.extract_strided_slice %386 {offsets = [0, 0], sizes = [8, 32], strides = [1, 1]} : vector<8x128xf32> to vector<8x32xf32>
    %413 = arith.negf %412 : vector<8x32xf32>
    %414 = math.exp %413 : vector<8x32xf32>
    %cst_122 = arith.constant 1.000000e+00 : f32
    %415 = vector.broadcast %cst_122 : f32 to vector<8x32xf32>
    %416 = arith.addf %415, %414 : vector<8x32xf32>
    %417 = arith.divf %415, %416 : vector<8x32xf32>
    %418 = vector.extract_strided_slice %386 {offsets = [0, 32], sizes = [8, 32], strides = [1, 1]} : vector<8x128xf32> to vector<8x32xf32>
    %419 = arith.negf %418 : vector<8x32xf32>
    %420 = math.exp %419 : vector<8x32xf32>
    %cst_123 = arith.constant 1.000000e+00 : f32
    %421 = vector.broadcast %cst_123 : f32 to vector<8x32xf32>
    %422 = arith.addf %421, %420 : vector<8x32xf32>
    %423 = arith.divf %421, %422 : vector<8x32xf32>
    %424 = vector.extract_strided_slice %386 {offsets = [0, 64], sizes = [8, 32], strides = [1, 1]} : vector<8x128xf32> to vector<8x32xf32>
    %425 = math.tanh %424 : vector<8x32xf32>
    %426 = vector.extract_strided_slice %386 {offsets = [0, 96], sizes = [8, 32], strides = [1, 1]} : vector<8x128xf32> to vector<8x32xf32>
    %427 = arith.negf %426 : vector<8x32xf32>
    %428 = math.exp %427 : vector<8x32xf32>
    %cst_124 = arith.constant 1.000000e+00 : f32
    %429 = vector.broadcast %cst_124 : f32 to vector<8x32xf32>
    %430 = arith.addf %429, %428 : vector<8x32xf32>
    %431 = arith.divf %429, %430 : vector<8x32xf32>
    %432 = arith.mulf %423, %362 : vector<8x32xf32>
    %433 = arith.mulf %417, %425 : vector<8x32xf32>
    %434 = arith.addf %432, %433 : vector<8x32xf32>
    %435 = math.tanh %434 : vector<8x32xf32>
    %436 = arith.mulf %431, %435 : vector<8x32xf32>
    %c0_125 = arith.constant 0 : index
    %437 = arith.index_cast %c5_i32 : i32 to index
    %c0_126 = arith.constant 0 : index
    %c0_127 = arith.constant 0 : index
    %438 = vector.load %arg12[%c0_125, %437, %c0_126, %c0_127] : memref<2x8x8x32xf32, #tpu.memory_space<vmem>>, vector<1x1x8x32xf32>
    %439 = vector.shape_cast %438 : vector<1x1x8x32xf32> to vector<8x32xf32>
    %440 = vector.shape_cast %411 : vector<8x32xf32> to vector<1x1x8x32xf32>
    tpu.vector_store %arg12[%c0_125, %437, %c0_126, %c0_127], %440 {strides = array<i32>} : memref<2x8x8x32xf32, #tpu.memory_space<vmem>>, vector<1x1x8x32xf32>,
    %c1_128 = arith.constant 1 : index
    %441 = arith.index_cast %376 : i32 to index
    %c0_129 = arith.constant 0 : index
    %c0_130 = arith.constant 0 : index
    %442 = vector.load %arg12[%c1_128, %441, %c0_129, %c0_130] : memref<2x8x8x32xf32, #tpu.memory_space<vmem>>, vector<1x1x8x32xf32>
    %443 = vector.shape_cast %442 : vector<1x1x8x32xf32> to vector<8x32xf32>
    %444 = vector.shape_cast %436 : vector<8x32xf32> to vector<1x1x8x32xf32>
    tpu.vector_store %arg12[%c1_128, %441, %c0_129, %c0_130], %444 {strides = array<i32>} : memref<2x8x8x32xf32, #tpu.memory_space<vmem>>, vector<1x1x8x32xf32>,
    %445 = tpu.concatenate %411, %436 in 1 : vector<8x32xf32>, vector<8x32xf32> -> vector<8x64xf32>
    %c6_i32 = arith.constant 6 : i32
    %c0_131 = arith.constant 0 : index
    %c0_132 = arith.constant 0 : index
    %446 = vector.load %arg3[%c0_131, %c0_132] : memref<64x256xf32, #tpu.memory_space<vmem>>, vector<64x256xf32>
    %cst_133 = arith.constant dense<0.000000e+00> : vector<8x256xf32>
    %447 = tpu.matmul %445, %446, %cst_133 {dimension_numbers = #tpu.dot_dimension_numbers<[1], [0], [0], [1], [0, 0, 1, 1], [], []>} : vector<8x64xf32>, vector<64x256xf32>, vector<8x256xf32> -> vector<8x256xf32>
    %c7_i32_134 = arith.constant 7 : i32
    %448 = arith.subi %c7_i32_134, %c6_i32 : i32
    %449 = arith.index_cast %c6_i32 : i32 to index
    %c0_135 = arith.constant 0 : index
    %c0_136 = arith.constant 0 : index
    %450 = vector.load %arg10[%449, %c0_135, %c0_136] : memref<8x8x128xf32, #tpu.memory_space<vmem>>, vector<1x8x128xf32>
    %451 = vector.shape_cast %450 : vector<1x8x128xf32> to vector<8x128xf32>
    %452 = vector.extract_strided_slice %447 {offsets = [0, 0], sizes = [8, 128], strides = [1, 1]} : vector<8x256xf32> to vector<8x128xf32>
    %453 = arith.addf %451, %452 : vector<8x128xf32>
    %454 = arith.index_cast %448 : i32 to index
    %c0_137 = arith.constant 0 : index
    %c0_138 = arith.constant 0 : index
    %455 = vector.load %arg11[%454, %c0_137, %c0_138] : memref<8x8x128xf32, #tpu.memory_space<vmem>>, vector<1x8x128xf32>
    %456 = vector.shape_cast %455 : vector<1x8x128xf32> to vector<8x128xf32>
    %457 = vector.extract_strided_slice %447 {offsets = [0, 128], sizes = [8, 128], strides = [1, 1]} : vector<8x256xf32> to vector<8x128xf32>
    %458 = arith.addf %456, %457 : vector<8x128xf32>
    %459 = vector.extract_strided_slice %453 {offsets = [0, 0], sizes = [8, 32], strides = [1, 1]} : vector<8x128xf32> to vector<8x32xf32>
    %460 = arith.negf %459 : vector<8x32xf32>
    %461 = math.exp %460 : vector<8x32xf32>
    %cst_139 = arith.constant 1.000000e+00 : f32
    %462 = vector.broadcast %cst_139 : f32 to vector<8x32xf32>
    %463 = arith.addf %462, %461 : vector<8x32xf32>
    %464 = arith.divf %462, %463 : vector<8x32xf32>
    %465 = vector.extract_strided_slice %453 {offsets = [0, 32], sizes = [8, 32], strides = [1, 1]} : vector<8x128xf32> to vector<8x32xf32>
    %466 = arith.negf %465 : vector<8x32xf32>
    %467 = math.exp %466 : vector<8x32xf32>
    %cst_140 = arith.constant 1.000000e+00 : f32
    %468 = vector.broadcast %cst_140 : f32 to vector<8x32xf32>
    %469 = arith.addf %468, %467 : vector<8x32xf32>
    %470 = arith.divf %468, %469 : vector<8x32xf32>
    %471 = vector.extract_strided_slice %453 {offsets = [0, 64], sizes = [8, 32], strides = [1, 1]} : vector<8x128xf32> to vector<8x32xf32>
    %472 = math.tanh %471 : vector<8x32xf32>
    %473 = vector.extract_strided_slice %453 {offsets = [0, 96], sizes = [8, 32], strides = [1, 1]} : vector<8x128xf32> to vector<8x32xf32>
    %474 = arith.negf %473 : vector<8x32xf32>
    %475 = math.exp %474 : vector<8x32xf32>
    %cst_141 = arith.constant 1.000000e+00 : f32
    %476 = vector.broadcast %cst_141 : f32 to vector<8x32xf32>
    %477 = arith.addf %476, %475 : vector<8x32xf32>
    %478 = arith.divf %476, %477 : vector<8x32xf32>
    %479 = arith.mulf %470, %409 : vector<8x32xf32>
    %480 = arith.mulf %464, %472 : vector<8x32xf32>
    %481 = arith.addf %479, %480 : vector<8x32xf32>
    %482 = math.tanh %481 : vector<8x32xf32>
    %483 = arith.mulf %478, %482 : vector<8x32xf32>
    %484 = vector.extract_strided_slice %458 {offsets = [0, 0], sizes = [8, 32], strides = [1, 1]} : vector<8x128xf32> to vector<8x32xf32>
    %485 = arith.negf %484 : vector<8x32xf32>
    %486 = math.exp %485 : vector<8x32xf32>
    %cst_142 = arith.constant 1.000000e+00 : f32
    %487 = vector.broadcast %cst_142 : f32 to vector<8x32xf32>
    %488 = arith.addf %487, %486 : vector<8x32xf32>
    %489 = arith.divf %487, %488 : vector<8x32xf32>
    %490 = vector.extract_strided_slice %458 {offsets = [0, 32], sizes = [8, 32], strides = [1, 1]} : vector<8x128xf32> to vector<8x32xf32>
    %491 = arith.negf %490 : vector<8x32xf32>
    %492 = math.exp %491 : vector<8x32xf32>
    %cst_143 = arith.constant 1.000000e+00 : f32
    %493 = vector.broadcast %cst_143 : f32 to vector<8x32xf32>
    %494 = arith.addf %493, %492 : vector<8x32xf32>
    %495 = arith.divf %493, %494 : vector<8x32xf32>
    %496 = vector.extract_strided_slice %458 {offsets = [0, 64], sizes = [8, 32], strides = [1, 1]} : vector<8x128xf32> to vector<8x32xf32>
    %497 = math.tanh %496 : vector<8x32xf32>
    %498 = vector.extract_strided_slice %458 {offsets = [0, 96], sizes = [8, 32], strides = [1, 1]} : vector<8x128xf32> to vector<8x32xf32>
    %499 = arith.negf %498 : vector<8x32xf32>
    %500 = math.exp %499 : vector<8x32xf32>
    %cst_144 = arith.constant 1.000000e+00 : f32
    %501 = vector.broadcast %cst_144 : f32 to vector<8x32xf32>
    %502 = arith.addf %501, %500 : vector<8x32xf32>
    %503 = arith.divf %501, %502 : vector<8x32xf32>
    %504 = arith.mulf %495, %434 : vector<8x32xf32>
    %505 = arith.mulf %489, %497 : vector<8x32xf32>
    %506 = arith.addf %504, %505 : vector<8x32xf32>
    %507 = math.tanh %506 : vector<8x32xf32>
    %508 = arith.mulf %503, %507 : vector<8x32xf32>
    %c0_145 = arith.constant 0 : index
    %509 = arith.index_cast %c6_i32 : i32 to index
    %c0_146 = arith.constant 0 : index
    %c0_147 = arith.constant 0 : index
    %510 = vector.load %arg12[%c0_145, %509, %c0_146, %c0_147] : memref<2x8x8x32xf32, #tpu.memory_space<vmem>>, vector<1x1x8x32xf32>
    %511 = vector.shape_cast %510 : vector<1x1x8x32xf32> to vector<8x32xf32>
    %512 = vector.shape_cast %483 : vector<8x32xf32> to vector<1x1x8x32xf32>
    tpu.vector_store %arg12[%c0_145, %509, %c0_146, %c0_147], %512 {strides = array<i32>} : memref<2x8x8x32xf32, #tpu.memory_space<vmem>>, vector<1x1x8x32xf32>,
    %c1_148 = arith.constant 1 : index
    %513 = arith.index_cast %448 : i32 to index
    %c0_149 = arith.constant 0 : index
    %c0_150 = arith.constant 0 : index
    %514 = vector.load %arg12[%c1_148, %513, %c0_149, %c0_150] : memref<2x8x8x32xf32, #tpu.memory_space<vmem>>, vector<1x1x8x32xf32>
    %515 = vector.shape_cast %514 : vector<1x1x8x32xf32> to vector<8x32xf32>
    %516 = vector.shape_cast %508 : vector<8x32xf32> to vector<1x1x8x32xf32>
    tpu.vector_store %arg12[%c1_148, %513, %c0_149, %c0_150], %516 {strides = array<i32>} : memref<2x8x8x32xf32, #tpu.memory_space<vmem>>, vector<1x1x8x32xf32>,
    %517 = tpu.concatenate %483, %508 in 1 : vector<8x32xf32>, vector<8x32xf32> -> vector<8x64xf32>
    %c7_i32_151 = arith.constant 7 : i32
    %c0_152 = arith.constant 0 : index
    %c0_153 = arith.constant 0 : index
    %518 = vector.load %arg3[%c0_152, %c0_153] : memref<64x256xf32, #tpu.memory_space<vmem>>, vector<64x256xf32>
    %cst_154 = arith.constant dense<0.000000e+00> : vector<8x256xf32>
    %519 = tpu.matmul %517, %518, %cst_154 {dimension_numbers = #tpu.dot_dimension_numbers<[1], [0], [0], [1], [0, 0, 1, 1], [], []>} : vector<8x64xf32>, vector<64x256xf32>, vector<8x256xf32> -> vector<8x256xf32>
    %c7_i32_155 = arith.constant 7 : i32
    %520 = arith.subi %c7_i32_155, %c7_i32_151 : i32
    %521 = arith.index_cast %c7_i32_151 : i32 to index
    %c0_156 = arith.constant 0 : index
    %c0_157 = arith.constant 0 : index
    %522 = vector.load %arg10[%521, %c0_156, %c0_157] : memref<8x8x128xf32, #tpu.memory_space<vmem>>, vector<1x8x128xf32>
    %523 = vector.shape_cast %522 : vector<1x8x128xf32> to vector<8x128xf32>
    %524 = vector.extract_strided_slice %519 {offsets = [0, 0], sizes = [8, 128], strides = [1, 1]} : vector<8x256xf32> to vector<8x128xf32>
    %525 = arith.addf %523, %524 : vector<8x128xf32>
    %526 = arith.index_cast %520 : i32 to index
    %c0_158 = arith.constant 0 : index
    %c0_159 = arith.constant 0 : index
    %527 = vector.load %arg11[%526, %c0_158, %c0_159] : memref<8x8x128xf32, #tpu.memory_space<vmem>>, vector<1x8x128xf32>
    %528 = vector.shape_cast %527 : vector<1x8x128xf32> to vector<8x128xf32>
    %529 = vector.extract_strided_slice %519 {offsets = [0, 128], sizes = [8, 128], strides = [1, 1]} : vector<8x256xf32> to vector<8x128xf32>
    %530 = arith.addf %528, %529 : vector<8x128xf32>
    %531 = vector.extract_strided_slice %525 {offsets = [0, 0], sizes = [8, 32], strides = [1, 1]} : vector<8x128xf32> to vector<8x32xf32>
    %532 = arith.negf %531 : vector<8x32xf32>
    %533 = math.exp %532 : vector<8x32xf32>
    %cst_160 = arith.constant 1.000000e+00 : f32
    %534 = vector.broadcast %cst_160 : f32 to vector<8x32xf32>
    %535 = arith.addf %534, %533 : vector<8x32xf32>
    %536 = arith.divf %534, %535 : vector<8x32xf32>
    %537 = vector.extract_strided_slice %525 {offsets = [0, 32], sizes = [8, 32], strides = [1, 1]} : vector<8x128xf32> to vector<8x32xf32>
    %538 = arith.negf %537 : vector<8x32xf32>
    %539 = math.exp %538 : vector<8x32xf32>
    %cst_161 = arith.constant 1.000000e+00 : f32
    %540 = vector.broadcast %cst_161 : f32 to vector<8x32xf32>
    %541 = arith.addf %540, %539 : vector<8x32xf32>
    %542 = arith.divf %540, %541 : vector<8x32xf32>
    %543 = vector.extract_strided_slice %525 {offsets = [0, 64], sizes = [8, 32], strides = [1, 1]} : vector<8x128xf32> to vector<8x32xf32>
    %544 = math.tanh %543 : vector<8x32xf32>
    %545 = vector.extract_strided_slice %525 {offsets = [0, 96], sizes = [8, 32], strides = [1, 1]} : vector<8x128xf32> to vector<8x32xf32>
    %546 = arith.negf %545 : vector<8x32xf32>
    %547 = math.exp %546 : vector<8x32xf32>
    %cst_162 = arith.constant 1.000000e+00 : f32
    %548 = vector.broadcast %cst_162 : f32 to vector<8x32xf32>
    %549 = arith.addf %548, %547 : vector<8x32xf32>
    %550 = arith.divf %548, %549 : vector<8x32xf32>
    %551 = arith.mulf %542, %481 : vector<8x32xf32>
    %552 = arith.mulf %536, %544 : vector<8x32xf32>
    %553 = arith.addf %551, %552 : vector<8x32xf32>
    %554 = math.tanh %553 : vector<8x32xf32>
    %555 = arith.mulf %550, %554 : vector<8x32xf32>
    %556 = vector.extract_strided_slice %530 {offsets = [0, 0], sizes = [8, 32], strides = [1, 1]} : vector<8x128xf32> to vector<8x32xf32>
    %557 = arith.negf %556 : vector<8x32xf32>
    %558 = math.exp %557 : vector<8x32xf32>
    %cst_163 = arith.constant 1.000000e+00 : f32
    %559 = vector.broadcast %cst_163 : f32 to vector<8x32xf32>
    %560 = arith.addf %559, %558 : vector<8x32xf32>
    %561 = arith.divf %559, %560 : vector<8x32xf32>
    %562 = vector.extract_strided_slice %530 {offsets = [0, 32], sizes = [8, 32], strides = [1, 1]} : vector<8x128xf32> to vector<8x32xf32>
    %563 = arith.negf %562 : vector<8x32xf32>
    %564 = math.exp %563 : vector<8x32xf32>
    %cst_164 = arith.constant 1.000000e+00 : f32
    %565 = vector.broadcast %cst_164 : f32 to vector<8x32xf32>
    %566 = arith.addf %565, %564 : vector<8x32xf32>
    %567 = arith.divf %565, %566 : vector<8x32xf32>
    %568 = vector.extract_strided_slice %530 {offsets = [0, 64], sizes = [8, 32], strides = [1, 1]} : vector<8x128xf32> to vector<8x32xf32>
    %569 = math.tanh %568 : vector<8x32xf32>
    %570 = vector.extract_strided_slice %530 {offsets = [0, 96], sizes = [8, 32], strides = [1, 1]} : vector<8x128xf32> to vector<8x32xf32>
    %571 = arith.negf %570 : vector<8x32xf32>
    %572 = math.exp %571 : vector<8x32xf32>
    %cst_165 = arith.constant 1.000000e+00 : f32
    %573 = vector.broadcast %cst_165 : f32 to vector<8x32xf32>
    %574 = arith.addf %573, %572 : vector<8x32xf32>
    %575 = arith.divf %573, %574 : vector<8x32xf32>
    %576 = arith.mulf %567, %506 : vector<8x32xf32>
    %577 = arith.mulf %561, %569 : vector<8x32xf32>
    %578 = arith.addf %576, %577 : vector<8x32xf32>
    %579 = math.tanh %578 : vector<8x32xf32>
    %580 = arith.mulf %575, %579 : vector<8x32xf32>
    %c0_166 = arith.constant 0 : index
    %581 = arith.index_cast %c7_i32_151 : i32 to index
    %c0_167 = arith.constant 0 : index
    %c0_168 = arith.constant 0 : index
    %582 = vector.load %arg12[%c0_166, %581, %c0_167, %c0_168] : memref<2x8x8x32xf32, #tpu.memory_space<vmem>>, vector<1x1x8x32xf32>
    %583 = vector.shape_cast %582 : vector<1x1x8x32xf32> to vector<8x32xf32>
    %584 = vector.shape_cast %555 : vector<8x32xf32> to vector<1x1x8x32xf32>
    tpu.vector_store %arg12[%c0_166, %581, %c0_167, %c0_168], %584 {strides = array<i32>} : memref<2x8x8x32xf32, #tpu.memory_space<vmem>>, vector<1x1x8x32xf32>,
    %c1_169 = arith.constant 1 : index
    %585 = arith.index_cast %520 : i32 to index
    %c0_170 = arith.constant 0 : index
    %c0_171 = arith.constant 0 : index
    %586 = vector.load %arg12[%c1_169, %585, %c0_170, %c0_171] : memref<2x8x8x32xf32, #tpu.memory_space<vmem>>, vector<1x1x8x32xf32>
    %587 = vector.shape_cast %586 : vector<1x1x8x32xf32> to vector<8x32xf32>
    %588 = vector.shape_cast %580 : vector<8x32xf32> to vector<1x1x8x32xf32>
    tpu.vector_store %arg12[%c1_169, %585, %c0_170, %c0_171], %588 {strides = array<i32>} : memref<2x8x8x32xf32, #tpu.memory_space<vmem>>, vector<1x1x8x32xf32>,
    %589 = tpu.concatenate %555, %580 in 1 : vector<8x32xf32>, vector<8x32xf32> -> vector<8x64xf32>
    %c8_i32 = arith.constant 8 : i32
    %c0_172 = arith.constant 0 : index
    %c0_173 = arith.constant 0 : index
    %c0_174 = arith.constant 0 : index
    %c0_175 = arith.constant 0 : index
    %590 = vector.load %arg12[%c0_172, %c0_173, %c0_174, %c0_175] : memref<2x8x8x32xf32, #tpu.memory_space<vmem>>, vector<1x8x8x32xf32>
    %591 = vector.shape_cast %590 : vector<1x8x8x32xf32> to vector<8x8x32xf32>
    %592 = vector.shape_cast %591 : vector<8x8x32xf32> to vector<64x32xf32>
    %c1_176 = arith.constant 1 : index
    %c0_177 = arith.constant 0 : index
    %c0_178 = arith.constant 0 : index
    %c0_179 = arith.constant 0 : index
    %593 = vector.load %arg12[%c1_176, %c0_177, %c0_178, %c0_179] : memref<2x8x8x32xf32, #tpu.memory_space<vmem>>, vector<1x8x8x32xf32>
    %594 = vector.shape_cast %593 : vector<1x8x8x32xf32> to vector<8x8x32xf32>
    %595 = vector.shape_cast %594 : vector<8x8x32xf32> to vector<64x32xf32>
    %c0_180 = arith.constant 0 : index
    %c0_181 = arith.constant 0 : index
    %596 = vector.load %arg4[%c0_180, %c0_181] : memref<64x256xf32, #tpu.memory_space<vmem>>, vector<32x256xf32>
    %cst_182 = arith.constant dense<0.000000e+00> : vector<64x256xf32>
    %597 = tpu.matmul %592, %596, %cst_182 {dimension_numbers = #tpu.dot_dimension_numbers<[1], [0], [0], [1], [0, 0, 1, 1], [], []>} : vector<64x32xf32>, vector<32x256xf32>, vector<64x256xf32> -> vector<64x256xf32>
    %c32 = arith.constant 32 : index
    %c0_183 = arith.constant 0 : index
    %598 = vector.load %arg4[%c32, %c0_183] : memref<64x256xf32, #tpu.memory_space<vmem>>, vector<32x256xf32>
    %cst_184 = arith.constant dense<0.000000e+00> : vector<64x256xf32>
    %599 = tpu.matmul %595, %598, %cst_184 {dimension_numbers = #tpu.dot_dimension_numbers<[1], [0], [0], [1], [0, 0, 1, 1], [], []>} : vector<64x32xf32>, vector<32x256xf32>, vector<64x256xf32> -> vector<64x256xf32>
    %600 = arith.addf %597, %599 : vector<64x256xf32>
    %c0_185 = arith.constant 0 : index
    %c0_186 = arith.constant 0 : index
    %601 = vector.load %arg5[%c0_185, %c0_186] : memref<1x256xf32, #tpu.memory_space<vmem>>, vector<1x256xf32>
    %602 = vector.broadcast %601 : vector<1x256xf32> to vector<64x256xf32>
    %603 = arith.addf %600, %602 : vector<64x256xf32>
    %604 = vector.extract_strided_slice %603 {offsets = [0, 0], sizes = [64, 128], strides = [1, 1]} : vector<64x256xf32> to vector<64x128xf32>
    %605 = vector.shape_cast %604 : vector<64x128xf32> to vector<8x8x128xf32>
    %c0_187 = arith.constant 0 : index
    %c0_188 = arith.constant 0 : index
    %c0_189 = arith.constant 0 : index
    %606 = vector.load %arg10[%c0_187, %c0_188, %c0_189] : memref<8x8x128xf32, #tpu.memory_space<vmem>>, vector<8x8x128xf32>
    tpu.vector_store %arg10[%c0_187, %c0_188, %c0_189], %605 {strides = array<i32>} : memref<8x8x128xf32, #tpu.memory_space<vmem>>, vector<8x8x128xf32>,
    %607 = vector.extract_strided_slice %603 {offsets = [0, 128], sizes = [64, 128], strides = [1, 1]} : vector<64x256xf32> to vector<64x128xf32>
    %608 = vector.shape_cast %607 : vector<64x128xf32> to vector<8x8x128xf32>
    %c0_190 = arith.constant 0 : index
    %c0_191 = arith.constant 0 : index
    %c0_192 = arith.constant 0 : index
    %609 = vector.load %arg11[%c0_190, %c0_191, %c0_192] : memref<8x8x128xf32, #tpu.memory_space<vmem>>, vector<8x8x128xf32>
    tpu.vector_store %arg11[%c0_190, %c0_191, %c0_192], %608 {strides = array<i32>} : memref<8x8x128xf32, #tpu.memory_space<vmem>>, vector<8x8x128xf32>,
    %cst_193 = arith.constant 0.000000e+00 : f32
    %610 = vector.broadcast %cst_193 : f32 to vector<8x32xf32>
    %cst_194 = arith.constant 0.000000e+00 : f32
    %611 = vector.broadcast %cst_194 : f32 to vector<8x64xf32>
    %c0_i32_195 = arith.constant 0 : i32
    %c0_196 = arith.constant 0 : index
    %c0_197 = arith.constant 0 : index
    %612 = vector.load %arg6[%c0_196, %c0_197] : memref<64x256xf32, #tpu.memory_space<vmem>>, vector<64x256xf32>
    %cst_198 = arith.constant dense<0.000000e+00> : vector<8x256xf32>
    %613 = tpu.matmul %611, %612, %cst_198 {dimension_numbers = #tpu.dot_dimension_numbers<[1], [0], [0], [1], [0, 0, 1, 1], [], []>} : vector<8x64xf32>, vector<64x256xf32>, vector<8x256xf32> -> vector<8x256xf32>
    %c7_i32_199 = arith.constant 7 : i32
    %614 = arith.subi %c7_i32_199, %c0_i32_195 : i32
    %615 = arith.index_cast %c0_i32_195 : i32 to index
    %c0_200 = arith.constant 0 : index
    %c0_201 = arith.constant 0 : index
    %616 = vector.load %arg10[%615, %c0_200, %c0_201] : memref<8x8x128xf32, #tpu.memory_space<vmem>>, vector<1x8x128xf32>
    %617 = vector.shape_cast %616 : vector<1x8x128xf32> to vector<8x128xf32>
    %618 = vector.extract_strided_slice %613 {offsets = [0, 0], sizes = [8, 128], strides = [1, 1]} : vector<8x256xf32> to vector<8x128xf32>
    %619 = arith.addf %617, %618 : vector<8x128xf32>
    %620 = arith.index_cast %614 : i32 to index
    %c0_202 = arith.constant 0 : index
    %c0_203 = arith.constant 0 : index
    %621 = vector.load %arg11[%620, %c0_202, %c0_203] : memref<8x8x128xf32, #tpu.memory_space<vmem>>, vector<1x8x128xf32>
    %622 = vector.shape_cast %621 : vector<1x8x128xf32> to vector<8x128xf32>
    %623 = vector.extract_strided_slice %613 {offsets = [0, 128], sizes = [8, 128], strides = [1, 1]} : vector<8x256xf32> to vector<8x128xf32>
    %624 = arith.addf %622, %623 : vector<8x128xf32>
    %625 = vector.extract_strided_slice %619 {offsets = [0, 0], sizes = [8, 32], strides = [1, 1]} : vector<8x128xf32> to vector<8x32xf32>
    %626 = arith.negf %625 : vector<8x32xf32>
    %627 = math.exp %626 : vector<8x32xf32>
    %cst_204 = arith.constant 1.000000e+00 : f32
    %628 = vector.broadcast %cst_204 : f32 to vector<8x32xf32>
    %629 = arith.addf %628, %627 : vector<8x32xf32>
    %630 = arith.divf %628, %629 : vector<8x32xf32>
    %631 = vector.extract_strided_slice %619 {offsets = [0, 32], sizes = [8, 32], strides = [1, 1]} : vector<8x128xf32> to vector<8x32xf32>
    %632 = arith.negf %631 : vector<8x32xf32>
    %633 = math.exp %632 : vector<8x32xf32>
    %cst_205 = arith.constant 1.000000e+00 : f32
    %634 = vector.broadcast %cst_205 : f32 to vector<8x32xf32>
    %635 = arith.addf %634, %633 : vector<8x32xf32>
    %636 = arith.divf %634, %635 : vector<8x32xf32>
    %637 = vector.extract_strided_slice %619 {offsets = [0, 64], sizes = [8, 32], strides = [1, 1]} : vector<8x128xf32> to vector<8x32xf32>
    %638 = math.tanh %637 : vector<8x32xf32>
    %639 = vector.extract_strided_slice %619 {offsets = [0, 96], sizes = [8, 32], strides = [1, 1]} : vector<8x128xf32> to vector<8x32xf32>
    %640 = arith.negf %639 : vector<8x32xf32>
    %641 = math.exp %640 : vector<8x32xf32>
    %cst_206 = arith.constant 1.000000e+00 : f32
    %642 = vector.broadcast %cst_206 : f32 to vector<8x32xf32>
    %643 = arith.addf %642, %641 : vector<8x32xf32>
    %644 = arith.divf %642, %643 : vector<8x32xf32>
    %645 = arith.mulf %636, %610 : vector<8x32xf32>
    %646 = arith.mulf %630, %638 : vector<8x32xf32>
    %647 = arith.addf %645, %646 : vector<8x32xf32>
    %648 = math.tanh %647 : vector<8x32xf32>
    %649 = arith.mulf %644, %648 : vector<8x32xf32>
    %650 = vector.extract_strided_slice %624 {offsets = [0, 0], sizes = [8, 32], strides = [1, 1]} : vector<8x128xf32> to vector<8x32xf32>
    %651 = arith.negf %650 : vector<8x32xf32>
    %652 = math.exp %651 : vector<8x32xf32>
    %cst_207 = arith.constant 1.000000e+00 : f32
    %653 = vector.broadcast %cst_207 : f32 to vector<8x32xf32>
    %654 = arith.addf %653, %652 : vector<8x32xf32>
    %655 = arith.divf %653, %654 : vector<8x32xf32>
    %656 = vector.extract_strided_slice %624 {offsets = [0, 32], sizes = [8, 32], strides = [1, 1]} : vector<8x128xf32> to vector<8x32xf32>
    %657 = arith.negf %656 : vector<8x32xf32>
    %658 = math.exp %657 : vector<8x32xf32>
    %cst_208 = arith.constant 1.000000e+00 : f32
    %659 = vector.broadcast %cst_208 : f32 to vector<8x32xf32>
    %660 = arith.addf %659, %658 : vector<8x32xf32>
    %661 = arith.divf %659, %660 : vector<8x32xf32>
    %662 = vector.extract_strided_slice %624 {offsets = [0, 64], sizes = [8, 32], strides = [1, 1]} : vector<8x128xf32> to vector<8x32xf32>
    %663 = math.tanh %662 : vector<8x32xf32>
    %664 = vector.extract_strided_slice %624 {offsets = [0, 96], sizes = [8, 32], strides = [1, 1]} : vector<8x128xf32> to vector<8x32xf32>
    %665 = arith.negf %664 : vector<8x32xf32>
    %666 = math.exp %665 : vector<8x32xf32>
    %cst_209 = arith.constant 1.000000e+00 : f32
    %667 = vector.broadcast %cst_209 : f32 to vector<8x32xf32>
    %668 = arith.addf %667, %666 : vector<8x32xf32>
    %669 = arith.divf %667, %668 : vector<8x32xf32>
    %670 = arith.mulf %661, %610 : vector<8x32xf32>
    %671 = arith.mulf %655, %663 : vector<8x32xf32>
    %672 = arith.addf %670, %671 : vector<8x32xf32>
    %673 = math.tanh %672 : vector<8x32xf32>
    %674 = arith.mulf %669, %673 : vector<8x32xf32>
    %675 = tpu.concatenate %649, %674 in 1 : vector<8x32xf32>, vector<8x32xf32> -> vector<8x64xf32>
    %676 = arith.addf %611, %675 : vector<8x64xf32>
    %c1_i32_210 = arith.constant 1 : i32
    %c0_211 = arith.constant 0 : index
    %c0_212 = arith.constant 0 : index
    %677 = vector.load %arg6[%c0_211, %c0_212] : memref<64x256xf32, #tpu.memory_space<vmem>>, vector<64x256xf32>
    %cst_213 = arith.constant dense<0.000000e+00> : vector<8x256xf32>
    %678 = tpu.matmul %675, %677, %cst_213 {dimension_numbers = #tpu.dot_dimension_numbers<[1], [0], [0], [1], [0, 0, 1, 1], [], []>} : vector<8x64xf32>, vector<64x256xf32>, vector<8x256xf32> -> vector<8x256xf32>
    %c7_i32_214 = arith.constant 7 : i32
    %679 = arith.subi %c7_i32_214, %c1_i32_210 : i32
    %680 = arith.index_cast %c1_i32_210 : i32 to index
    %c0_215 = arith.constant 0 : index
    %c0_216 = arith.constant 0 : index
    %681 = vector.load %arg10[%680, %c0_215, %c0_216] : memref<8x8x128xf32, #tpu.memory_space<vmem>>, vector<1x8x128xf32>
    %682 = vector.shape_cast %681 : vector<1x8x128xf32> to vector<8x128xf32>
    %683 = vector.extract_strided_slice %678 {offsets = [0, 0], sizes = [8, 128], strides = [1, 1]} : vector<8x256xf32> to vector<8x128xf32>
    %684 = arith.addf %682, %683 : vector<8x128xf32>
    %685 = arith.index_cast %679 : i32 to index
    %c0_217 = arith.constant 0 : index
    %c0_218 = arith.constant 0 : index
    %686 = vector.load %arg11[%685, %c0_217, %c0_218] : memref<8x8x128xf32, #tpu.memory_space<vmem>>, vector<1x8x128xf32>
    %687 = vector.shape_cast %686 : vector<1x8x128xf32> to vector<8x128xf32>
    %688 = vector.extract_strided_slice %678 {offsets = [0, 128], sizes = [8, 128], strides = [1, 1]} : vector<8x256xf32> to vector<8x128xf32>
    %689 = arith.addf %687, %688 : vector<8x128xf32>
    %690 = vector.extract_strided_slice %684 {offsets = [0, 0], sizes = [8, 32], strides = [1, 1]} : vector<8x128xf32> to vector<8x32xf32>
    %691 = arith.negf %690 : vector<8x32xf32>
    %692 = math.exp %691 : vector<8x32xf32>
    %cst_219 = arith.constant 1.000000e+00 : f32
    %693 = vector.broadcast %cst_219 : f32 to vector<8x32xf32>
    %694 = arith.addf %693, %692 : vector<8x32xf32>
    %695 = arith.divf %693, %694 : vector<8x32xf32>
    %696 = vector.extract_strided_slice %684 {offsets = [0, 32], sizes = [8, 32], strides = [1, 1]} : vector<8x128xf32> to vector<8x32xf32>
    %697 = arith.negf %696 : vector<8x32xf32>
    %698 = math.exp %697 : vector<8x32xf32>
    %cst_220 = arith.constant 1.000000e+00 : f32
    %699 = vector.broadcast %cst_220 : f32 to vector<8x32xf32>
    %700 = arith.addf %699, %698 : vector<8x32xf32>
    %701 = arith.divf %699, %700 : vector<8x32xf32>
    %702 = vector.extract_strided_slice %684 {offsets = [0, 64], sizes = [8, 32], strides = [1, 1]} : vector<8x128xf32> to vector<8x32xf32>
    %703 = math.tanh %702 : vector<8x32xf32>
    %704 = vector.extract_strided_slice %684 {offsets = [0, 96], sizes = [8, 32], strides = [1, 1]} : vector<8x128xf32> to vector<8x32xf32>
    %705 = arith.negf %704 : vector<8x32xf32>
    %706 = math.exp %705 : vector<8x32xf32>
    %cst_221 = arith.constant 1.000000e+00 : f32
    %707 = vector.broadcast %cst_221 : f32 to vector<8x32xf32>
    %708 = arith.addf %707, %706 : vector<8x32xf32>
    %709 = arith.divf %707, %708 : vector<8x32xf32>
    %710 = arith.mulf %701, %647 : vector<8x32xf32>
    %711 = arith.mulf %695, %703 : vector<8x32xf32>
    %712 = arith.addf %710, %711 : vector<8x32xf32>
    %713 = math.tanh %712 : vector<8x32xf32>
    %714 = arith.mulf %709, %713 : vector<8x32xf32>
    %715 = vector.extract_strided_slice %689 {offsets = [0, 0], sizes = [8, 32], strides = [1, 1]} : vector<8x128xf32> to vector<8x32xf32>
    %716 = arith.negf %715 : vector<8x32xf32>
    %717 = math.exp %716 : vector<8x32xf32>
    %cst_222 = arith.constant 1.000000e+00 : f32
    %718 = vector.broadcast %cst_222 : f32 to vector<8x32xf32>
    %719 = arith.addf %718, %717 : vector<8x32xf32>
    %720 = arith.divf %718, %719 : vector<8x32xf32>
    %721 = vector.extract_strided_slice %689 {offsets = [0, 32], sizes = [8, 32], strides = [1, 1]} : vector<8x128xf32> to vector<8x32xf32>
    %722 = arith.negf %721 : vector<8x32xf32>
    %723 = math.exp %722 : vector<8x32xf32>
    %cst_223 = arith.constant 1.000000e+00 : f32
    %724 = vector.broadcast %cst_223 : f32 to vector<8x32xf32>
    %725 = arith.addf %724, %723 : vector<8x32xf32>
    %726 = arith.divf %724, %725 : vector<8x32xf32>
    %727 = vector.extract_strided_slice %689 {offsets = [0, 64], sizes = [8, 32], strides = [1, 1]} : vector<8x128xf32> to vector<8x32xf32>
    %728 = math.tanh %727 : vector<8x32xf32>
    %729 = vector.extract_strided_slice %689 {offsets = [0, 96], sizes = [8, 32], strides = [1, 1]} : vector<8x128xf32> to vector<8x32xf32>
    %730 = arith.negf %729 : vector<8x32xf32>
    %731 = math.exp %730 : vector<8x32xf32>
    %cst_224 = arith.constant 1.000000e+00 : f32
    %732 = vector.broadcast %cst_224 : f32 to vector<8x32xf32>
    %733 = arith.addf %732, %731 : vector<8x32xf32>
    %734 = arith.divf %732, %733 : vector<8x32xf32>
    %735 = arith.mulf %726, %672 : vector<8x32xf32>
    %736 = arith.mulf %720, %728 : vector<8x32xf32>
    %737 = arith.addf %735, %736 : vector<8x32xf32>
    %738 = math.tanh %737 : vector<8x32xf32>
    %739 = arith.mulf %734, %738 : vector<8x32xf32>
    %740 = tpu.concatenate %714, %739 in 1 : vector<8x32xf32>, vector<8x32xf32> -> vector<8x64xf32>
    %741 = arith.addf %676, %740 : vector<8x64xf32>
    %c2_i32_225 = arith.constant 2 : i32
    %c0_226 = arith.constant 0 : index
    %c0_227 = arith.constant 0 : index
    %742 = vector.load %arg6[%c0_226, %c0_227] : memref<64x256xf32, #tpu.memory_space<vmem>>, vector<64x256xf32>
    %cst_228 = arith.constant dense<0.000000e+00> : vector<8x256xf32>
    %743 = tpu.matmul %740, %742, %cst_228 {dimension_numbers = #tpu.dot_dimension_numbers<[1], [0], [0], [1], [0, 0, 1, 1], [], []>} : vector<8x64xf32>, vector<64x256xf32>, vector<8x256xf32> -> vector<8x256xf32>
    %c7_i32_229 = arith.constant 7 : i32
    %744 = arith.subi %c7_i32_229, %c2_i32_225 : i32
    %745 = arith.index_cast %c2_i32_225 : i32 to index
    %c0_230 = arith.constant 0 : index
    %c0_231 = arith.constant 0 : index
    %746 = vector.load %arg10[%745, %c0_230, %c0_231] : memref<8x8x128xf32, #tpu.memory_space<vmem>>, vector<1x8x128xf32>
    %747 = vector.shape_cast %746 : vector<1x8x128xf32> to vector<8x128xf32>
    %748 = vector.extract_strided_slice %743 {offsets = [0, 0], sizes = [8, 128], strides = [1, 1]} : vector<8x256xf32> to vector<8x128xf32>
    %749 = arith.addf %747, %748 : vector<8x128xf32>
    %750 = arith.index_cast %744 : i32 to index
    %c0_232 = arith.constant 0 : index
    %c0_233 = arith.constant 0 : index
    %751 = vector.load %arg11[%750, %c0_232, %c0_233] : memref<8x8x128xf32, #tpu.memory_space<vmem>>, vector<1x8x128xf32>
    %752 = vector.shape_cast %751 : vector<1x8x128xf32> to vector<8x128xf32>
    %753 = vector.extract_strided_slice %743 {offsets = [0, 128], sizes = [8, 128], strides = [1, 1]} : vector<8x256xf32> to vector<8x128xf32>
    %754 = arith.addf %752, %753 : vector<8x128xf32>
    %755 = vector.extract_strided_slice %749 {offsets = [0, 0], sizes = [8, 32], strides = [1, 1]} : vector<8x128xf32> to vector<8x32xf32>
    %756 = arith.negf %755 : vector<8x32xf32>
    %757 = math.exp %756 : vector<8x32xf32>
    %cst_234 = arith.constant 1.000000e+00 : f32
    %758 = vector.broadcast %cst_234 : f32 to vector<8x32xf32>
    %759 = arith.addf %758, %757 : vector<8x32xf32>
    %760 = arith.divf %758, %759 : vector<8x32xf32>
    %761 = vector.extract_strided_slice %749 {offsets = [0, 32], sizes = [8, 32], strides = [1, 1]} : vector<8x128xf32> to vector<8x32xf32>
    %762 = arith.negf %761 : vector<8x32xf32>
    %763 = math.exp %762 : vector<8x32xf32>
    %cst_235 = arith.constant 1.000000e+00 : f32
    %764 = vector.broadcast %cst_235 : f32 to vector<8x32xf32>
    %765 = arith.addf %764, %763 : vector<8x32xf32>
    %766 = arith.divf %764, %765 : vector<8x32xf32>
    %767 = vector.extract_strided_slice %749 {offsets = [0, 64], sizes = [8, 32], strides = [1, 1]} : vector<8x128xf32> to vector<8x32xf32>
    %768 = math.tanh %767 : vector<8x32xf32>
    %769 = vector.extract_strided_slice %749 {offsets = [0, 96], sizes = [8, 32], strides = [1, 1]} : vector<8x128xf32> to vector<8x32xf32>
    %770 = arith.negf %769 : vector<8x32xf32>
    %771 = math.exp %770 : vector<8x32xf32>
    %cst_236 = arith.constant 1.000000e+00 : f32
    %772 = vector.broadcast %cst_236 : f32 to vector<8x32xf32>
    %773 = arith.addf %772, %771 : vector<8x32xf32>
    %774 = arith.divf %772, %773 : vector<8x32xf32>
    %775 = arith.mulf %766, %712 : vector<8x32xf32>
    %776 = arith.mulf %760, %768 : vector<8x32xf32>
    %777 = arith.addf %775, %776 : vector<8x32xf32>
    %778 = math.tanh %777 : vector<8x32xf32>
    %779 = arith.mulf %774, %778 : vector<8x32xf32>
    %780 = vector.extract_strided_slice %754 {offsets = [0, 0], sizes = [8, 32], strides = [1, 1]} : vector<8x128xf32> to vector<8x32xf32>
    %781 = arith.negf %780 : vector<8x32xf32>
    %782 = math.exp %781 : vector<8x32xf32>
    %cst_237 = arith.constant 1.000000e+00 : f32
    %783 = vector.broadcast %cst_237 : f32 to vector<8x32xf32>
    %784 = arith.addf %783, %782 : vector<8x32xf32>
    %785 = arith.divf %783, %784 : vector<8x32xf32>
    %786 = vector.extract_strided_slice %754 {offsets = [0, 32], sizes = [8, 32], strides = [1, 1]} : vector<8x128xf32> to vector<8x32xf32>
    %787 = arith.negf %786 : vector<8x32xf32>
    %788 = math.exp %787 : vector<8x32xf32>
    %cst_238 = arith.constant 1.000000e+00 : f32
    %789 = vector.broadcast %cst_238 : f32 to vector<8x32xf32>
    %790 = arith.addf %789, %788 : vector<8x32xf32>
    %791 = arith.divf %789, %790 : vector<8x32xf32>
    %792 = vector.extract_strided_slice %754 {offsets = [0, 64], sizes = [8, 32], strides = [1, 1]} : vector<8x128xf32> to vector<8x32xf32>
    %793 = math.tanh %792 : vector<8x32xf32>
    %794 = vector.extract_strided_slice %754 {offsets = [0, 96], sizes = [8, 32], strides = [1, 1]} : vector<8x128xf32> to vector<8x32xf32>
    %795 = arith.negf %794 : vector<8x32xf32>
    %796 = math.exp %795 : vector<8x32xf32>
    %cst_239 = arith.constant 1.000000e+00 : f32
    %797 = vector.broadcast %cst_239 : f32 to vector<8x32xf32>
    %798 = arith.addf %797, %796 : vector<8x32xf32>
    %799 = arith.divf %797, %798 : vector<8x32xf32>
    %800 = arith.mulf %791, %737 : vector<8x32xf32>
    %801 = arith.mulf %785, %793 : vector<8x32xf32>
    %802 = arith.addf %800, %801 : vector<8x32xf32>
    %803 = math.tanh %802 : vector<8x32xf32>
    %804 = arith.mulf %799, %803 : vector<8x32xf32>
    %805 = tpu.concatenate %779, %804 in 1 : vector<8x32xf32>, vector<8x32xf32> -> vector<8x64xf32>
    %806 = arith.addf %741, %805 : vector<8x64xf32>
    %c3_i32_240 = arith.constant 3 : i32
    %c0_241 = arith.constant 0 : index
    %c0_242 = arith.constant 0 : index
    %807 = vector.load %arg6[%c0_241, %c0_242] : memref<64x256xf32, #tpu.memory_space<vmem>>, vector<64x256xf32>
    %cst_243 = arith.constant dense<0.000000e+00> : vector<8x256xf32>
    %808 = tpu.matmul %805, %807, %cst_243 {dimension_numbers = #tpu.dot_dimension_numbers<[1], [0], [0], [1], [0, 0, 1, 1], [], []>} : vector<8x64xf32>, vector<64x256xf32>, vector<8x256xf32> -> vector<8x256xf32>
    %c7_i32_244 = arith.constant 7 : i32
    %809 = arith.subi %c7_i32_244, %c3_i32_240 : i32
    %810 = arith.index_cast %c3_i32_240 : i32 to index
    %c0_245 = arith.constant 0 : index
    %c0_246 = arith.constant 0 : index
    %811 = vector.load %arg10[%810, %c0_245, %c0_246] : memref<8x8x128xf32, #tpu.memory_space<vmem>>, vector<1x8x128xf32>
    %812 = vector.shape_cast %811 : vector<1x8x128xf32> to vector<8x128xf32>
    %813 = vector.extract_strided_slice %808 {offsets = [0, 0], sizes = [8, 128], strides = [1, 1]} : vector<8x256xf32> to vector<8x128xf32>
    %814 = arith.addf %812, %813 : vector<8x128xf32>
    %815 = arith.index_cast %809 : i32 to index
    %c0_247 = arith.constant 0 : index
    %c0_248 = arith.constant 0 : index
    %816 = vector.load %arg11[%815, %c0_247, %c0_248] : memref<8x8x128xf32, #tpu.memory_space<vmem>>, vector<1x8x128xf32>
    %817 = vector.shape_cast %816 : vector<1x8x128xf32> to vector<8x128xf32>
    %818 = vector.extract_strided_slice %808 {offsets = [0, 128], sizes = [8, 128], strides = [1, 1]} : vector<8x256xf32> to vector<8x128xf32>
    %819 = arith.addf %817, %818 : vector<8x128xf32>
    %820 = vector.extract_strided_slice %814 {offsets = [0, 0], sizes = [8, 32], strides = [1, 1]} : vector<8x128xf32> to vector<8x32xf32>
    %821 = arith.negf %820 : vector<8x32xf32>
    %822 = math.exp %821 : vector<8x32xf32>
    %cst_249 = arith.constant 1.000000e+00 : f32
    %823 = vector.broadcast %cst_249 : f32 to vector<8x32xf32>
    %824 = arith.addf %823, %822 : vector<8x32xf32>
    %825 = arith.divf %823, %824 : vector<8x32xf32>
    %826 = vector.extract_strided_slice %814 {offsets = [0, 32], sizes = [8, 32], strides = [1, 1]} : vector<8x128xf32> to vector<8x32xf32>
    %827 = arith.negf %826 : vector<8x32xf32>
    %828 = math.exp %827 : vector<8x32xf32>
    %cst_250 = arith.constant 1.000000e+00 : f32
    %829 = vector.broadcast %cst_250 : f32 to vector<8x32xf32>
    %830 = arith.addf %829, %828 : vector<8x32xf32>
    %831 = arith.divf %829, %830 : vector<8x32xf32>
    %832 = vector.extract_strided_slice %814 {offsets = [0, 64], sizes = [8, 32], strides = [1, 1]} : vector<8x128xf32> to vector<8x32xf32>
    %833 = math.tanh %832 : vector<8x32xf32>
    %834 = vector.extract_strided_slice %814 {offsets = [0, 96], sizes = [8, 32], strides = [1, 1]} : vector<8x128xf32> to vector<8x32xf32>
    %835 = arith.negf %834 : vector<8x32xf32>
    %836 = math.exp %835 : vector<8x32xf32>
    %cst_251 = arith.constant 1.000000e+00 : f32
    %837 = vector.broadcast %cst_251 : f32 to vector<8x32xf32>
    %838 = arith.addf %837, %836 : vector<8x32xf32>
    %839 = arith.divf %837, %838 : vector<8x32xf32>
    %840 = arith.mulf %831, %777 : vector<8x32xf32>
    %841 = arith.mulf %825, %833 : vector<8x32xf32>
    %842 = arith.addf %840, %841 : vector<8x32xf32>
    %843 = math.tanh %842 : vector<8x32xf32>
    %844 = arith.mulf %839, %843 : vector<8x32xf32>
    %845 = vector.extract_strided_slice %819 {offsets = [0, 0], sizes = [8, 32], strides = [1, 1]} : vector<8x128xf32> to vector<8x32xf32>
    %846 = arith.negf %845 : vector<8x32xf32>
    %847 = math.exp %846 : vector<8x32xf32>
    %cst_252 = arith.constant 1.000000e+00 : f32
    %848 = vector.broadcast %cst_252 : f32 to vector<8x32xf32>
    %849 = arith.addf %848, %847 : vector<8x32xf32>
    %850 = arith.divf %848, %849 : vector<8x32xf32>
    %851 = vector.extract_strided_slice %819 {offsets = [0, 32], sizes = [8, 32], strides = [1, 1]} : vector<8x128xf32> to vector<8x32xf32>
    %852 = arith.negf %851 : vector<8x32xf32>
    %853 = math.exp %852 : vector<8x32xf32>
    %cst_253 = arith.constant 1.000000e+00 : f32
    %854 = vector.broadcast %cst_253 : f32 to vector<8x32xf32>
    %855 = arith.addf %854, %853 : vector<8x32xf32>
    %856 = arith.divf %854, %855 : vector<8x32xf32>
    %857 = vector.extract_strided_slice %819 {offsets = [0, 64], sizes = [8, 32], strides = [1, 1]} : vector<8x128xf32> to vector<8x32xf32>
    %858 = math.tanh %857 : vector<8x32xf32>
    %859 = vector.extract_strided_slice %819 {offsets = [0, 96], sizes = [8, 32], strides = [1, 1]} : vector<8x128xf32> to vector<8x32xf32>
    %860 = arith.negf %859 : vector<8x32xf32>
    %861 = math.exp %860 : vector<8x32xf32>
    %cst_254 = arith.constant 1.000000e+00 : f32
    %862 = vector.broadcast %cst_254 : f32 to vector<8x32xf32>
    %863 = arith.addf %862, %861 : vector<8x32xf32>
    %864 = arith.divf %862, %863 : vector<8x32xf32>
    %865 = arith.mulf %856, %802 : vector<8x32xf32>
    %866 = arith.mulf %850, %858 : vector<8x32xf32>
    %867 = arith.addf %865, %866 : vector<8x32xf32>
    %868 = math.tanh %867 : vector<8x32xf32>
    %869 = arith.mulf %864, %868 : vector<8x32xf32>
    %870 = tpu.concatenate %844, %869 in 1 : vector<8x32xf32>, vector<8x32xf32> -> vector<8x64xf32>
    %871 = arith.addf %806, %870 : vector<8x64xf32>
    %c4_i32_255 = arith.constant 4 : i32
    %c0_256 = arith.constant 0 : index
    %c0_257 = arith.constant 0 : index
    %872 = vector.load %arg6[%c0_256, %c0_257] : memref<64x256xf32, #tpu.memory_space<vmem>>, vector<64x256xf32>
    %cst_258 = arith.constant dense<0.000000e+00> : vector<8x256xf32>
    %873 = tpu.matmul %870, %872, %cst_258 {dimension_numbers = #tpu.dot_dimension_numbers<[1], [0], [0], [1], [0, 0, 1, 1], [], []>} : vector<8x64xf32>, vector<64x256xf32>, vector<8x256xf32> -> vector<8x256xf32>
    %c7_i32_259 = arith.constant 7 : i32
    %874 = arith.subi %c7_i32_259, %c4_i32_255 : i32
    %875 = arith.index_cast %c4_i32_255 : i32 to index
    %c0_260 = arith.constant 0 : index
    %c0_261 = arith.constant 0 : index
    %876 = vector.load %arg10[%875, %c0_260, %c0_261] : memref<8x8x128xf32, #tpu.memory_space<vmem>>, vector<1x8x128xf32>
    %877 = vector.shape_cast %876 : vector<1x8x128xf32> to vector<8x128xf32>
    %878 = vector.extract_strided_slice %873 {offsets = [0, 0], sizes = [8, 128], strides = [1, 1]} : vector<8x256xf32> to vector<8x128xf32>
    %879 = arith.addf %877, %878 : vector<8x128xf32>
    %880 = arith.index_cast %874 : i32 to index
    %c0_262 = arith.constant 0 : index
    %c0_263 = arith.constant 0 : index
    %881 = vector.load %arg11[%880, %c0_262, %c0_263] : memref<8x8x128xf32, #tpu.memory_space<vmem>>, vector<1x8x128xf32>
    %882 = vector.shape_cast %881 : vector<1x8x128xf32> to vector<8x128xf32>
    %883 = vector.extract_strided_slice %873 {offsets = [0, 128], sizes = [8, 128], strides = [1, 1]} : vector<8x256xf32> to vector<8x128xf32>
    %884 = arith.addf %882, %883 : vector<8x128xf32>
    %885 = vector.extract_strided_slice %879 {offsets = [0, 0], sizes = [8, 32], strides = [1, 1]} : vector<8x128xf32> to vector<8x32xf32>
    %886 = arith.negf %885 : vector<8x32xf32>
    %887 = math.exp %886 : vector<8x32xf32>
    %cst_264 = arith.constant 1.000000e+00 : f32
    %888 = vector.broadcast %cst_264 : f32 to vector<8x32xf32>
    %889 = arith.addf %888, %887 : vector<8x32xf32>
    %890 = arith.divf %888, %889 : vector<8x32xf32>
    %891 = vector.extract_strided_slice %879 {offsets = [0, 32], sizes = [8, 32], strides = [1, 1]} : vector<8x128xf32> to vector<8x32xf32>
    %892 = arith.negf %891 : vector<8x32xf32>
    %893 = math.exp %892 : vector<8x32xf32>
    %cst_265 = arith.constant 1.000000e+00 : f32
    %894 = vector.broadcast %cst_265 : f32 to vector<8x32xf32>
    %895 = arith.addf %894, %893 : vector<8x32xf32>
    %896 = arith.divf %894, %895 : vector<8x32xf32>
    %897 = vector.extract_strided_slice %879 {offsets = [0, 64], sizes = [8, 32], strides = [1, 1]} : vector<8x128xf32> to vector<8x32xf32>
    %898 = math.tanh %897 : vector<8x32xf32>
    %899 = vector.extract_strided_slice %879 {offsets = [0, 96], sizes = [8, 32], strides = [1, 1]} : vector<8x128xf32> to vector<8x32xf32>
    %900 = arith.negf %899 : vector<8x32xf32>
    %901 = math.exp %900 : vector<8x32xf32>
    %cst_266 = arith.constant 1.000000e+00 : f32
    %902 = vector.broadcast %cst_266 : f32 to vector<8x32xf32>
    %903 = arith.addf %902, %901 : vector<8x32xf32>
    %904 = arith.divf %902, %903 : vector<8x32xf32>
    %905 = arith.mulf %896, %842 : vector<8x32xf32>
    %906 = arith.mulf %890, %898 : vector<8x32xf32>
    %907 = arith.addf %905, %906 : vector<8x32xf32>
    %908 = math.tanh %907 : vector<8x32xf32>
    %909 = arith.mulf %904, %908 : vector<8x32xf32>
    %910 = vector.extract_strided_slice %884 {offsets = [0, 0], sizes = [8, 32], strides = [1, 1]} : vector<8x128xf32> to vector<8x32xf32>
    %911 = arith.negf %910 : vector<8x32xf32>
    %912 = math.exp %911 : vector<8x32xf32>
    %cst_267 = arith.constant 1.000000e+00 : f32
    %913 = vector.broadcast %cst_267 : f32 to vector<8x32xf32>
    %914 = arith.addf %913, %912 : vector<8x32xf32>
    %915 = arith.divf %913, %914 : vector<8x32xf32>
    %916 = vector.extract_strided_slice %884 {offsets = [0, 32], sizes = [8, 32], strides = [1, 1]} : vector<8x128xf32> to vector<8x32xf32>
    %917 = arith.negf %916 : vector<8x32xf32>
    %918 = math.exp %917 : vector<8x32xf32>
    %cst_268 = arith.constant 1.000000e+00 : f32
    %919 = vector.broadcast %cst_268 : f32 to vector<8x32xf32>
    %920 = arith.addf %919, %918 : vector<8x32xf32>
    %921 = arith.divf %919, %920 : vector<8x32xf32>
    %922 = vector.extract_strided_slice %884 {offsets = [0, 64], sizes = [8, 32], strides = [1, 1]} : vector<8x128xf32> to vector<8x32xf32>
    %923 = math.tanh %922 : vector<8x32xf32>
    %924 = vector.extract_strided_slice %884 {offsets = [0, 96], sizes = [8, 32], strides = [1, 1]} : vector<8x128xf32> to vector<8x32xf32>
    %925 = arith.negf %924 : vector<8x32xf32>
    %926 = math.exp %925 : vector<8x32xf32>
    %cst_269 = arith.constant 1.000000e+00 : f32
    %927 = vector.broadcast %cst_269 : f32 to vector<8x32xf32>
    %928 = arith.addf %927, %926 : vector<8x32xf32>
    %929 = arith.divf %927, %928 : vector<8x32xf32>
    %930 = arith.mulf %921, %867 : vector<8x32xf32>
    %931 = arith.mulf %915, %923 : vector<8x32xf32>
    %932 = arith.addf %930, %931 : vector<8x32xf32>
    %933 = math.tanh %932 : vector<8x32xf32>
    %934 = arith.mulf %929, %933 : vector<8x32xf32>
    %935 = tpu.concatenate %909, %934 in 1 : vector<8x32xf32>, vector<8x32xf32> -> vector<8x64xf32>
    %936 = arith.addf %871, %935 : vector<8x64xf32>
    %c5_i32_270 = arith.constant 5 : i32
    %c0_271 = arith.constant 0 : index
    %c0_272 = arith.constant 0 : index
    %937 = vector.load %arg6[%c0_271, %c0_272] : memref<64x256xf32, #tpu.memory_space<vmem>>, vector<64x256xf32>
    %cst_273 = arith.constant dense<0.000000e+00> : vector<8x256xf32>
    %938 = tpu.matmul %935, %937, %cst_273 {dimension_numbers = #tpu.dot_dimension_numbers<[1], [0], [0], [1], [0, 0, 1, 1], [], []>} : vector<8x64xf32>, vector<64x256xf32>, vector<8x256xf32> -> vector<8x256xf32>
    %c7_i32_274 = arith.constant 7 : i32
    %939 = arith.subi %c7_i32_274, %c5_i32_270 : i32
    %940 = arith.index_cast %c5_i32_270 : i32 to index
    %c0_275 = arith.constant 0 : index
    %c0_276 = arith.constant 0 : index
    %941 = vector.load %arg10[%940, %c0_275, %c0_276] : memref<8x8x128xf32, #tpu.memory_space<vmem>>, vector<1x8x128xf32>
    %942 = vector.shape_cast %941 : vector<1x8x128xf32> to vector<8x128xf32>
    %943 = vector.extract_strided_slice %938 {offsets = [0, 0], sizes = [8, 128], strides = [1, 1]} : vector<8x256xf32> to vector<8x128xf32>
    %944 = arith.addf %942, %943 : vector<8x128xf32>
    %945 = arith.index_cast %939 : i32 to index
    %c0_277 = arith.constant 0 : index
    %c0_278 = arith.constant 0 : index
    %946 = vector.load %arg11[%945, %c0_277, %c0_278] : memref<8x8x128xf32, #tpu.memory_space<vmem>>, vector<1x8x128xf32>
    %947 = vector.shape_cast %946 : vector<1x8x128xf32> to vector<8x128xf32>
    %948 = vector.extract_strided_slice %938 {offsets = [0, 128], sizes = [8, 128], strides = [1, 1]} : vector<8x256xf32> to vector<8x128xf32>
    %949 = arith.addf %947, %948 : vector<8x128xf32>
    %950 = vector.extract_strided_slice %944 {offsets = [0, 0], sizes = [8, 32], strides = [1, 1]} : vector<8x128xf32> to vector<8x32xf32>
    %951 = arith.negf %950 : vector<8x32xf32>
    %952 = math.exp %951 : vector<8x32xf32>
    %cst_279 = arith.constant 1.000000e+00 : f32
    %953 = vector.broadcast %cst_279 : f32 to vector<8x32xf32>
    %954 = arith.addf %953, %952 : vector<8x32xf32>
    %955 = arith.divf %953, %954 : vector<8x32xf32>
    %956 = vector.extract_strided_slice %944 {offsets = [0, 32], sizes = [8, 32], strides = [1, 1]} : vector<8x128xf32> to vector<8x32xf32>
    %957 = arith.negf %956 : vector<8x32xf32>
    %958 = math.exp %957 : vector<8x32xf32>
    %cst_280 = arith.constant 1.000000e+00 : f32
    %959 = vector.broadcast %cst_280 : f32 to vector<8x32xf32>
    %960 = arith.addf %959, %958 : vector<8x32xf32>
    %961 = arith.divf %959, %960 : vector<8x32xf32>
    %962 = vector.extract_strided_slice %944 {offsets = [0, 64], sizes = [8, 32], strides = [1, 1]} : vector<8x128xf32> to vector<8x32xf32>
    %963 = math.tanh %962 : vector<8x32xf32>
    %964 = vector.extract_strided_slice %944 {offsets = [0, 96], sizes = [8, 32], strides = [1, 1]} : vector<8x128xf32> to vector<8x32xf32>
    %965 = arith.negf %964 : vector<8x32xf32>
    %966 = math.exp %965 : vector<8x32xf32>
    %cst_281 = arith.constant 1.000000e+00 : f32
    %967 = vector.broadcast %cst_281 : f32 to vector<8x32xf32>
    %968 = arith.addf %967, %966 : vector<8x32xf32>
    %969 = arith.divf %967, %968 : vector<8x32xf32>
    %970 = arith.mulf %961, %907 : vector<8x32xf32>
    %971 = arith.mulf %955, %963 : vector<8x32xf32>
    %972 = arith.addf %970, %971 : vector<8x32xf32>
    %973 = math.tanh %972 : vector<8x32xf32>
    %974 = arith.mulf %969, %973 : vector<8x32xf32>
    %975 = vector.extract_strided_slice %949 {offsets = [0, 0], sizes = [8, 32], strides = [1, 1]} : vector<8x128xf32> to vector<8x32xf32>
    %976 = arith.negf %975 : vector<8x32xf32>
    %977 = math.exp %976 : vector<8x32xf32>
    %cst_282 = arith.constant 1.000000e+00 : f32
    %978 = vector.broadcast %cst_282 : f32 to vector<8x32xf32>
    %979 = arith.addf %978, %977 : vector<8x32xf32>
    %980 = arith.divf %978, %979 : vector<8x32xf32>
    %981 = vector.extract_strided_slice %949 {offsets = [0, 32], sizes = [8, 32], strides = [1, 1]} : vector<8x128xf32> to vector<8x32xf32>
    %982 = arith.negf %981 : vector<8x32xf32>
    %983 = math.exp %982 : vector<8x32xf32>
    %cst_283 = arith.constant 1.000000e+00 : f32
    %984 = vector.broadcast %cst_283 : f32 to vector<8x32xf32>
    %985 = arith.addf %984, %983 : vector<8x32xf32>
    %986 = arith.divf %984, %985 : vector<8x32xf32>
    %987 = vector.extract_strided_slice %949 {offsets = [0, 64], sizes = [8, 32], strides = [1, 1]} : vector<8x128xf32> to vector<8x32xf32>
    %988 = math.tanh %987 : vector<8x32xf32>
    %989 = vector.extract_strided_slice %949 {offsets = [0, 96], sizes = [8, 32], strides = [1, 1]} : vector<8x128xf32> to vector<8x32xf32>
    %990 = arith.negf %989 : vector<8x32xf32>
    %991 = math.exp %990 : vector<8x32xf32>
    %cst_284 = arith.constant 1.000000e+00 : f32
    %992 = vector.broadcast %cst_284 : f32 to vector<8x32xf32>
    %993 = arith.addf %992, %991 : vector<8x32xf32>
    %994 = arith.divf %992, %993 : vector<8x32xf32>
    %995 = arith.mulf %986, %932 : vector<8x32xf32>
    %996 = arith.mulf %980, %988 : vector<8x32xf32>
    %997 = arith.addf %995, %996 : vector<8x32xf32>
    %998 = math.tanh %997 : vector<8x32xf32>
    %999 = arith.mulf %994, %998 : vector<8x32xf32>
    %1000 = tpu.concatenate %974, %999 in 1 : vector<8x32xf32>, vector<8x32xf32> -> vector<8x64xf32>
    %1001 = arith.addf %936, %1000 : vector<8x64xf32>
    %c6_i32_285 = arith.constant 6 : i32
    %c0_286 = arith.constant 0 : index
    %c0_287 = arith.constant 0 : index
    %1002 = vector.load %arg6[%c0_286, %c0_287] : memref<64x256xf32, #tpu.memory_space<vmem>>, vector<64x256xf32>
    %cst_288 = arith.constant dense<0.000000e+00> : vector<8x256xf32>
    %1003 = tpu.matmul %1000, %1002, %cst_288 {dimension_numbers = #tpu.dot_dimension_numbers<[1], [0], [0], [1], [0, 0, 1, 1], [], []>} : vector<8x64xf32>, vector<64x256xf32>, vector<8x256xf32> -> vector<8x256xf32>
    %c7_i32_289 = arith.constant 7 : i32
    %1004 = arith.subi %c7_i32_289, %c6_i32_285 : i32
    %1005 = arith.index_cast %c6_i32_285 : i32 to index
    %c0_290 = arith.constant 0 : index
    %c0_291 = arith.constant 0 : index
    %1006 = vector.load %arg10[%1005, %c0_290, %c0_291] : memref<8x8x128xf32, #tpu.memory_space<vmem>>, vector<1x8x128xf32>
    %1007 = vector.shape_cast %1006 : vector<1x8x128xf32> to vector<8x128xf32>
    %1008 = vector.extract_strided_slice %1003 {offsets = [0, 0], sizes = [8, 128], strides = [1, 1]} : vector<8x256xf32> to vector<8x128xf32>
    %1009 = arith.addf %1007, %1008 : vector<8x128xf32>
    %1010 = arith.index_cast %1004 : i32 to index
    %c0_292 = arith.constant 0 : index
    %c0_293 = arith.constant 0 : index
    %1011 = vector.load %arg11[%1010, %c0_292, %c0_293] : memref<8x8x128xf32, #tpu.memory_space<vmem>>, vector<1x8x128xf32>
    %1012 = vector.shape_cast %1011 : vector<1x8x128xf32> to vector<8x128xf32>
    %1013 = vector.extract_strided_slice %1003 {offsets = [0, 128], sizes = [8, 128], strides = [1, 1]} : vector<8x256xf32> to vector<8x128xf32>
    %1014 = arith.addf %1012, %1013 : vector<8x128xf32>
    %1015 = vector.extract_strided_slice %1009 {offsets = [0, 0], sizes = [8, 32], strides = [1, 1]} : vector<8x128xf32> to vector<8x32xf32>
    %1016 = arith.negf %1015 : vector<8x32xf32>
    %1017 = math.exp %1016 : vector<8x32xf32>
    %cst_294 = arith.constant 1.000000e+00 : f32
    %1018 = vector.broadcast %cst_294 : f32 to vector<8x32xf32>
    %1019 = arith.addf %1018, %1017 : vector<8x32xf32>
    %1020 = arith.divf %1018, %1019 : vector<8x32xf32>
    %1021 = vector.extract_strided_slice %1009 {offsets = [0, 32], sizes = [8, 32], strides = [1, 1]} : vector<8x128xf32> to vector<8x32xf32>
    %1022 = arith.negf %1021 : vector<8x32xf32>
    %1023 = math.exp %1022 : vector<8x32xf32>
    %cst_295 = arith.constant 1.000000e+00 : f32
    %1024 = vector.broadcast %cst_295 : f32 to vector<8x32xf32>
    %1025 = arith.addf %1024, %1023 : vector<8x32xf32>
    %1026 = arith.divf %1024, %1025 : vector<8x32xf32>
    %1027 = vector.extract_strided_slice %1009 {offsets = [0, 64], sizes = [8, 32], strides = [1, 1]} : vector<8x128xf32> to vector<8x32xf32>
    %1028 = math.tanh %1027 : vector<8x32xf32>
    %1029 = vector.extract_strided_slice %1009 {offsets = [0, 96], sizes = [8, 32], strides = [1, 1]} : vector<8x128xf32> to vector<8x32xf32>
    %1030 = arith.negf %1029 : vector<8x32xf32>
    %1031 = math.exp %1030 : vector<8x32xf32>
    %cst_296 = arith.constant 1.000000e+00 : f32
    %1032 = vector.broadcast %cst_296 : f32 to vector<8x32xf32>
    %1033 = arith.addf %1032, %1031 : vector<8x32xf32>
    %1034 = arith.divf %1032, %1033 : vector<8x32xf32>
    %1035 = arith.mulf %1026, %972 : vector<8x32xf32>
    %1036 = arith.mulf %1020, %1028 : vector<8x32xf32>
    %1037 = arith.addf %1035, %1036 : vector<8x32xf32>
    %1038 = math.tanh %1037 : vector<8x32xf32>
    %1039 = arith.mulf %1034, %1038 : vector<8x32xf32>
    %1040 = vector.extract_strided_slice %1014 {offsets = [0, 0], sizes = [8, 32], strides = [1, 1]} : vector<8x128xf32> to vector<8x32xf32>
    %1041 = arith.negf %1040 : vector<8x32xf32>
    %1042 = math.exp %1041 : vector<8x32xf32>
    %cst_297 = arith.constant 1.000000e+00 : f32
    %1043 = vector.broadcast %cst_297 : f32 to vector<8x32xf32>
    %1044 = arith.addf %1043, %1042 : vector<8x32xf32>
    %1045 = arith.divf %1043, %1044 : vector<8x32xf32>
    %1046 = vector.extract_strided_slice %1014 {offsets = [0, 32], sizes = [8, 32], strides = [1, 1]} : vector<8x128xf32> to vector<8x32xf32>
    %1047 = arith.negf %1046 : vector<8x32xf32>
    %1048 = math.exp %1047 : vector<8x32xf32>
    %cst_298 = arith.constant 1.000000e+00 : f32
    %1049 = vector.broadcast %cst_298 : f32 to vector<8x32xf32>
    %1050 = arith.addf %1049, %1048 : vector<8x32xf32>
    %1051 = arith.divf %1049, %1050 : vector<8x32xf32>
    %1052 = vector.extract_strided_slice %1014 {offsets = [0, 64], sizes = [8, 32], strides = [1, 1]} : vector<8x128xf32> to vector<8x32xf32>
    %1053 = math.tanh %1052 : vector<8x32xf32>
    %1054 = vector.extract_strided_slice %1014 {offsets = [0, 96], sizes = [8, 32], strides = [1, 1]} : vector<8x128xf32> to vector<8x32xf32>
    %1055 = arith.negf %1054 : vector<8x32xf32>
    %1056 = math.exp %1055 : vector<8x32xf32>
    %cst_299 = arith.constant 1.000000e+00 : f32
    %1057 = vector.broadcast %cst_299 : f32 to vector<8x32xf32>
    %1058 = arith.addf %1057, %1056 : vector<8x32xf32>
    %1059 = arith.divf %1057, %1058 : vector<8x32xf32>
    %1060 = arith.mulf %1051, %997 : vector<8x32xf32>
    %1061 = arith.mulf %1045, %1053 : vector<8x32xf32>
    %1062 = arith.addf %1060, %1061 : vector<8x32xf32>
    %1063 = math.tanh %1062 : vector<8x32xf32>
    %1064 = arith.mulf %1059, %1063 : vector<8x32xf32>
    %1065 = tpu.concatenate %1039, %1064 in 1 : vector<8x32xf32>, vector<8x32xf32> -> vector<8x64xf32>
    %1066 = arith.addf %1001, %1065 : vector<8x64xf32>
    %c7_i32_300 = arith.constant 7 : i32
    %c0_301 = arith.constant 0 : index
    %c0_302 = arith.constant 0 : index
    %1067 = vector.load %arg6[%c0_301, %c0_302] : memref<64x256xf32, #tpu.memory_space<vmem>>, vector<64x256xf32>
    %cst_303 = arith.constant dense<0.000000e+00> : vector<8x256xf32>
    %1068 = tpu.matmul %1065, %1067, %cst_303 {dimension_numbers = #tpu.dot_dimension_numbers<[1], [0], [0], [1], [0, 0, 1, 1], [], []>} : vector<8x64xf32>, vector<64x256xf32>, vector<8x256xf32> -> vector<8x256xf32>
    %c7_i32_304 = arith.constant 7 : i32
    %1069 = arith.subi %c7_i32_304, %c7_i32_300 : i32
    %1070 = arith.index_cast %c7_i32_300 : i32 to index
    %c0_305 = arith.constant 0 : index
    %c0_306 = arith.constant 0 : index
    %1071 = vector.load %arg10[%1070, %c0_305, %c0_306] : memref<8x8x128xf32, #tpu.memory_space<vmem>>, vector<1x8x128xf32>
    %1072 = vector.shape_cast %1071 : vector<1x8x128xf32> to vector<8x128xf32>
    %1073 = vector.extract_strided_slice %1068 {offsets = [0, 0], sizes = [8, 128], strides = [1, 1]} : vector<8x256xf32> to vector<8x128xf32>
    %1074 = arith.addf %1072, %1073 : vector<8x128xf32>
    %1075 = arith.index_cast %1069 : i32 to index
    %c0_307 = arith.constant 0 : index
    %c0_308 = arith.constant 0 : index
    %1076 = vector.load %arg11[%1075, %c0_307, %c0_308] : memref<8x8x128xf32, #tpu.memory_space<vmem>>, vector<1x8x128xf32>
    %1077 = vector.shape_cast %1076 : vector<1x8x128xf32> to vector<8x128xf32>
    %1078 = vector.extract_strided_slice %1068 {offsets = [0, 128], sizes = [8, 128], strides = [1, 1]} : vector<8x256xf32> to vector<8x128xf32>
    %1079 = arith.addf %1077, %1078 : vector<8x128xf32>
    %1080 = vector.extract_strided_slice %1074 {offsets = [0, 0], sizes = [8, 32], strides = [1, 1]} : vector<8x128xf32> to vector<8x32xf32>
    %1081 = arith.negf %1080 : vector<8x32xf32>
    %1082 = math.exp %1081 : vector<8x32xf32>
    %cst_309 = arith.constant 1.000000e+00 : f32
    %1083 = vector.broadcast %cst_309 : f32 to vector<8x32xf32>
    %1084 = arith.addf %1083, %1082 : vector<8x32xf32>
    %1085 = arith.divf %1083, %1084 : vector<8x32xf32>
    %1086 = vector.extract_strided_slice %1074 {offsets = [0, 32], sizes = [8, 32], strides = [1, 1]} : vector<8x128xf32> to vector<8x32xf32>
    %1087 = arith.negf %1086 : vector<8x32xf32>
    %1088 = math.exp %1087 : vector<8x32xf32>
    %cst_310 = arith.constant 1.000000e+00 : f32
    %1089 = vector.broadcast %cst_310 : f32 to vector<8x32xf32>
    %1090 = arith.addf %1089, %1088 : vector<8x32xf32>
    %1091 = arith.divf %1089, %1090 : vector<8x32xf32>
    %1092 = vector.extract_strided_slice %1074 {offsets = [0, 64], sizes = [8, 32], strides = [1, 1]} : vector<8x128xf32> to vector<8x32xf32>
    %1093 = math.tanh %1092 : vector<8x32xf32>
    %1094 = vector.extract_strided_slice %1074 {offsets = [0, 96], sizes = [8, 32], strides = [1, 1]} : vector<8x128xf32> to vector<8x32xf32>
    %1095 = arith.negf %1094 : vector<8x32xf32>
    %1096 = math.exp %1095 : vector<8x32xf32>
    %cst_311 = arith.constant 1.000000e+00 : f32
    %1097 = vector.broadcast %cst_311 : f32 to vector<8x32xf32>
    %1098 = arith.addf %1097, %1096 : vector<8x32xf32>
    %1099 = arith.divf %1097, %1098 : vector<8x32xf32>
    %1100 = arith.mulf %1091, %1037 : vector<8x32xf32>
    %1101 = arith.mulf %1085, %1093 : vector<8x32xf32>
    %1102 = arith.addf %1100, %1101 : vector<8x32xf32>
    %1103 = math.tanh %1102 : vector<8x32xf32>
    %1104 = arith.mulf %1099, %1103 : vector<8x32xf32>
    %1105 = vector.extract_strided_slice %1079 {offsets = [0, 0], sizes = [8, 32], strides = [1, 1]} : vector<8x128xf32> to vector<8x32xf32>
    %1106 = arith.negf %1105 : vector<8x32xf32>
    %1107 = math.exp %1106 : vector<8x32xf32>
    %cst_312 = arith.constant 1.000000e+00 : f32
    %1108 = vector.broadcast %cst_312 : f32 to vector<8x32xf32>
    %1109 = arith.addf %1108, %1107 : vector<8x32xf32>
    %1110 = arith.divf %1108, %1109 : vector<8x32xf32>
    %1111 = vector.extract_strided_slice %1079 {offsets = [0, 32], sizes = [8, 32], strides = [1, 1]} : vector<8x128xf32> to vector<8x32xf32>
    %1112 = arith.negf %1111 : vector<8x32xf32>
    %1113 = math.exp %1112 : vector<8x32xf32>
    %cst_313 = arith.constant 1.000000e+00 : f32
    %1114 = vector.broadcast %cst_313 : f32 to vector<8x32xf32>
    %1115 = arith.addf %1114, %1113 : vector<8x32xf32>
    %1116 = arith.divf %1114, %1115 : vector<8x32xf32>
    %1117 = vector.extract_strided_slice %1079 {offsets = [0, 64], sizes = [8, 32], strides = [1, 1]} : vector<8x128xf32> to vector<8x32xf32>
    %1118 = math.tanh %1117 : vector<8x32xf32>
    %1119 = vector.extract_strided_slice %1079 {offsets = [0, 96], sizes = [8, 32], strides = [1, 1]} : vector<8x128xf32> to vector<8x32xf32>
    %1120 = arith.negf %1119 : vector<8x32xf32>
    %1121 = math.exp %1120 : vector<8x32xf32>
    %cst_314 = arith.constant 1.000000e+00 : f32
    %1122 = vector.broadcast %cst_314 : f32 to vector<8x32xf32>
    %1123 = arith.addf %1122, %1121 : vector<8x32xf32>
    %1124 = arith.divf %1122, %1123 : vector<8x32xf32>
    %1125 = arith.mulf %1116, %1062 : vector<8x32xf32>
    %1126 = arith.mulf %1110, %1118 : vector<8x32xf32>
    %1127 = arith.addf %1125, %1126 : vector<8x32xf32>
    %1128 = math.tanh %1127 : vector<8x32xf32>
    %1129 = arith.mulf %1124, %1128 : vector<8x32xf32>
    %1130 = tpu.concatenate %1104, %1129 in 1 : vector<8x32xf32>, vector<8x32xf32> -> vector<8x64xf32>
    %1131 = arith.addf %1066, %1130 : vector<8x64xf32>
    %c8_i32_315 = arith.constant 8 : i32
    %cst_316 = arith.constant 1.250000e-01 : f32
    %1132 = vector.broadcast %cst_316 : f32 to vector<8x64xf32>
    %1133 = arith.mulf %1131, %1132 : vector<8x64xf32>
    %c0_317 = arith.constant 0 : index
    %c0_318 = arith.constant 0 : index
    %1134 = vector.load %arg7[%c0_317, %c0_318] : memref<64x6xf32, #tpu.memory_space<vmem>>, vector<64x6xf32>
    %cst_319 = arith.constant dense<0.000000e+00> : vector<8x6xf32>
    %1135 = tpu.matmul %1133, %1134, %cst_319 {dimension_numbers = #tpu.dot_dimension_numbers<[1], [0], [0], [1], [0, 0, 1, 1], [], []>} : vector<8x64xf32>, vector<64x6xf32>, vector<8x6xf32> -> vector<8x6xf32>
    %c0_320 = arith.constant 0 : index
    %c0_321 = arith.constant 0 : index
    %1136 = vector.load %arg8[%c0_320, %c0_321] : memref<1x6xf32, #tpu.memory_space<vmem>>, vector<1x6xf32>
    %1137 = vector.broadcast %1136 : vector<1x6xf32> to vector<8x6xf32>
    %1138 = arith.addf %1135, %1137 : vector<8x6xf32>
    %c0_322 = arith.constant 0 : index
    %c0_323 = arith.constant 0 : index
    %1139 = vector.load %arg9[%c0_322, %c0_323] : memref<8x6xf32, #tpu.memory_space<vmem>>, vector<8x6xf32>
    tpu.vector_store %arg9[%c0_322, %c0_323], %1138 {strides = array<i32>} : memref<8x6xf32, #tpu.memory_space<vmem>>, vector<8x6xf32>,
    return
  }
}

</mosaic_0001>

<bundles_post_ra>
// kernel: _lambda_.1
= control target key start
LH: loop header
LB: loop body
LE: loop exit
PB: predicated region body
PF: predicated region fallthrough
CT: control target
= control target key end

     0   :  { %14 = vsyncpa [#allocation6], 0  ;;  %s4233_s0 = inlined_call_operand.vmem [shape: f32[64,16], index: 0, kind: input, shape index: {}]   ;;  %s4234_s1 = inlined_call_operand.hbm [shape: f32[16,256], index: 1, kind: input, shape index: {}]   ;;  %s4235_s2 = inlined_call_operand.vmem [shape: f32[1,256], index: 2, kind: input, shape index: {}]   ;;  %s4236_s3 = inlined_call_operand.hbm [shape: f32[64,256], index: 3, kind: input, shape index: {}]   ;;  %s4237_s4 = inlined_call_operand.hbm [shape: f32[64,256], index: 4, kind: input, shape index: {}]   ;;  %s4238_s5 = inlined_call_operand.vmem [shape: f32[1,256], index: 5, kind: input, shape index: {}]   ;;  %s4239_s6 = inlined_call_operand.vmem [shape: f32[64,256], index: 6, kind: input, shape index: {}]   ;;  %s4240_s7 = inlined_call_operand.vmem [shape: f32[64,6], index: 7, kind: input, shape index: {}]   ;;  %s4241_s8 = inlined_call_operand.vmem [shape: f32[1,6], index: 8, kind: input, shape index: {}]   ;;  %s4242_s9 = inlined_call_operand.vmem [shape: f32[8,6], index: 9, kind: output, shape index: {}]  }
   0x1   :  { %15 = vsyncpa [#allocation8], 0  ;;  %s37_s11 = sshll.u32 %s4236_s3, 4  ;;  %s3292_s12 = smov [#allocation7]   ;;  %s38_s11 = int_to_ptr.hbm [resolvable:$true] %s37_s11 }
   0x2   :  { %s39_s13 = sshll.u32 %s3292_s12, 4  ;;  %s22_s16 = sshll.u32 %s4234_s1, 4  ;;  %s40_s13 = int_to_ptr.vmem [resolvable:$true] %s39_s13  ;;  %s23_s16 = int_to_ptr.hbm [resolvable:$true] %s22_s16 }
   0x3   :  { %s3293_s17 = smov 256   ;;  %s3294_s18 = smov 16  }
   0x4   :  { %45 = dma.hbm_to_vmem [thread:$0]  %s38_s11, 2048, %s40_s13, [#allocation8], %s3293_s17, %s3293_s17, %s3294_s18  }
   0x5   :  { %s3295_s19 = smov [#allocation5]   ;;  %s50_s23 = sshll.u32 %s4237_s4, 4  ;;  %s51_s23 = int_to_ptr.hbm [resolvable:$true] %s50_s23 }
   0x6   :  { %s24_s20 = sshll.u32 %s3295_s19, 4  ;;  %s3296_s3 = smov [#allocation9]   ;;  %s25_s20 = int_to_ptr.vmem [resolvable:$true] %s24_s20 }
   0x7   :  { %30 = dma.hbm_to_vmem [thread:$0]  %s23_s16, 512, %s25_s20, [#allocation6], %s3293_s17, %s3293_s17, %s3294_s18  }
   0x8   :  { %s52_s24 = sshll.u32 %s3296_s3, 4  ;;  %s53_s24 = int_to_ptr.vmem [resolvable:$true] %s52_s24 }
   0x9   :  { %58 = dma.hbm_to_vmem [thread:$0]  %s51_s23, 2048, %s53_s24, [#allocation8], %s3293_s17, %s3293_s17, %s3294_s18  }
   0xa   :  { %3288 = dma.done.wait [#allocation6], 512  }
   0xb   :  { %3289 = vsyncadd [#allocation6], 4294966784 }
   0xc   :  { %3290 = dma.done.wait [#allocation8], 4096  }
   0xd   :  { %3291 = vsyncadd [#allocation8], 4294963200  ;;  %v90_v0 = vld [vmem:[#allocation5 + $0x18] sm:$0xff]  ;;  %v3359_v1 = vld [vmem:[#allocation7 + $0x70] sm:$0xff]  ;;  %vm97_vm0 = vcmask 130048   ;;  %v3297_v19 = vmov 0.0  }
   0xe   :  { %v88_v2 = vld [vmem:[#allocation5 + $0x8] sm:$0xff]  ;;  %177 = vmatpush.msra.mxu1 %v90_v0  ;;  %248 = vmatpush.msra.mxu2 %v3359_v1  ;;  %v3362_v3 = vld [vmem:[#allocation7 + $0x60] sm:$0xff]  ;;  %v3367_v5 = vld [vmem:[#allocation7 + $0x50] sm:$0xff]  ;;  %vm363_vm9 = vcmask 261120   ;;  %vm236_vm10 = vcmask 523264  }
   0xf   :  { %v79_v4 = vld [vmem:[%s4233_s0] sm:$0xff]  ;;  %v89_v7 = vld [vmem:[#allocation5 + $0x10] sm:$0xff]  ;;  %v3374_v9 = vld [vmem:[#allocation7 + $0x78] sm:$0xff] }
  0x10   :  { %178 = vmatpush.msra.mxu1 %v88_v2  ;;  %249 = vmatpush.msra.mxu2 %v3362_v3  ;;  %v3371_v6 = vld [vmem:[#allocation7 + $0x40] sm:$0xff]  ;;  %v3376_v10 = vld [vmem:[#allocation7 + $0x30] sm:$0xff]  ;;  %v3379_v11 = vld [vmem:[#allocation7 + $0x68] sm:$0xff] }
  0x11   :  { %2850 = vmatmul.msk.f32.vlgmr.msra.gmra.mxu1 %vm97_vm0, %v79_v4  ;;  %v87_v8 = vld [vmem:[#allocation5] sm:$0xff]  ;;  %136 = vmatpush.msra.mxu0 %v89_v7  ;;  %v80_v13 = vld [vmem:[%s4233_s0 + $0x8] sm:$0xff]  ;;  %v3392_v14 = vld [vmem:[#allocation7 + $0x10] sm:$0xff] }
  0x12   :  { %250 = vmatpush.msra.mxu2 %v3367_v5  ;;  %268 = vmatpush.msra.mxu3 %v3374_v9  ;;  %v3383_v12 = vld [vmem:[#allocation7 + $0x20] sm:$0xff]  ;;  %v3399_v16 = vld [vmem:[#allocation7 + $0x58] sm:$0xff]  ;;  %v3401_v17 = vld [vmem:[#allocation7 + $0x48] sm:$0xff] }
  0x13   :  { %887 = vmatpush.msrb.mxu1 %v3374_v9  ;;  %137 = vmatpush.msra.mxu0 %v87_v8  ;;  %v3397_v15 = vld [vmem:[#allocation7] sm:$0xff]  ;;  %v3406_v18 = vld [vmem:[#allocation7 + $0x38] sm:$0xff]  ;;  %v3413_v20 = vld [vmem:[#allocation7 + $0x28] sm:$0xff] }
  0x14   :  { %251 = vmatpush.msra.mxu2 %v3371_v6  ;;  %2842 = vmatmul.msk.f32.vlgmr.msra.gmra.mxu0 %vm97_vm0, %v79_v4  ;;  %v81_v21 = vld [vmem:[%s4233_s0 + $0x10] sm:$0xff]  ;;  %v3426_v22 = vld [vmem:[#allocation7 + $0x18] sm:$0xff]  ;;  %v3428_v23 = vld [vmem:[#allocation7 + $0x8] sm:$0xff] }
  0x15   :  { %269 = vmatpush.msra.mxu3 %v3379_v11  ;;  %888 = vmatpush.msrb.mxu1 %v3379_v11  ;;  %v82_v24 = vld [vmem:[%s4233_s0 + $0x18] sm:$0xff]  ;;  %v83_v25 = vld [vmem:[%s4233_s0 + $0x20] sm:$0xff]  ;;  %v84_v26 = vld [vmem:[%s4233_s0 + $0x28] sm:$0xff] }
  0x16   :  { %252 = vmatpush.msra.mxu2 %v3376_v10  ;;  %867 = vmatpush.msrb.mxu0 %v3359_v1  ;;  %v85_v27 = vld [vmem:[%s4233_s0 + $0x30] sm:$0xff]  ;;  %v86_v28 = vld [vmem:[%s4233_s0 + $0x38] sm:$0xff]  ;;  %v91_v29 = vld [vmem:[%s4235_s2] sm:$0x3]  ;;  %s3298_s0 = smov 64   ;;  %s3299_s2 = smov 32  }
  0x17   :  { %270 = vmatpush.msra.mxu3 %v3399_v16  ;;  %889 = vmatpush.msrb.mxu1 %v3399_v16  ;;  %v94_v30 = vperm.slane %v91_v29, 1  ;;  %v3504_v35 = vperm.slane %v91_v29, 0 }
  0x18   :  { %253 = vmatpush.msra.mxu2 %v3383_v12  ;;  %868 = vmatpush.msrb.mxu0 %v3362_v3 }
  0x19   :  { %2851 = vmatmul.msk.f32.gmra.mxu1 %vm97_vm0, %v80_v13  ;;  %271 = vmatpush.msra.mxu3 %v3401_v17 }
  0x1a   :  { %254 = vmatpush.msra.mxu2 %v3392_v14  ;;  %869 = vmatpush.msrb.mxu0 %v3367_v5 }
  0x1b   :  { %272 = vmatpush.msra.mxu3 %v3406_v18  ;;  %890 = vmatpush.msrb.mxu1 %v3401_v17 }
  0x1c   :  { %255 = vmatpush.msra.mxu2 %v3397_v15  ;;  %2843 = vmatmul.msk.f32.gmra.mxu0 %vm97_vm0, %v80_v13 }
  0x1d   :  { %256 = vmatmul.f32.vlgmr.msra.gmra.mxu2 %v3297_v19  ;;  %870 = vmatpush.msrb.mxu0 %v3371_v6 }
  0x1e   :  { %402 = vmatpush.msrb.mxu2 %v3359_v1  ;;  %273 = vmatpush.msra.mxu3 %v3413_v20 }
  0x1f   :  { %871 = vmatpush.msrb.mxu0 %v3376_v10  ;;  %891 = vmatpush.msrb.mxu1 %v3406_v18 }
  0x20   :  { %403 = vmatpush.msrb.mxu2 %v3362_v3  ;;  %274 = vmatpush.msra.mxu3 %v3426_v22 }
  0x21   :  { %2852 = vmatmul.msk.f32.gmra.mxu1 %vm97_vm0, %v81_v21  ;;  %872 = vmatpush.msrb.mxu0 %v3383_v12 }
  0x22   :  { %404 = vmatpush.msrb.mxu2 %v3367_v5  ;;  %275 = vmatpush.msra.mxu3 %v3428_v23 }
  0x23   :  { %276 = vmatmul.f32.vlgmr.msra.gmra.mxu3 %v3297_v19  ;;  %892 = vmatpush.msrb.mxu1 %v3413_v20 }
  0x24   :  { %405 = vmatpush.msrb.mxu2 %v3371_v6  ;;  %2844 = vmatmul.msk.f32.gmra.mxu0 %vm97_vm0, %v81_v21 }
  0x25   :  { %422 = vmatpush.msrb.mxu3 %v3374_v9  ;;  %873 = vmatpush.msrb.mxu0 %v3392_v14 }
  0x26   :  { %406 = vmatpush.msrb.mxu2 %v3376_v10  ;;  %893 = vmatpush.msrb.mxu1 %v3426_v22 }
  0x27   :  { %423 = vmatpush.msrb.mxu3 %v3379_v11  ;;  %874 = vmatpush.msrb.mxu0 %v3397_v15 }
  0x28   :  { %407 = vmatpush.msrb.mxu2 %v3383_v12  ;;  %894 = vmatpush.msrb.mxu1 %v3428_v23 }
  0x29   :  { %2853 = vmatmul.msk.f32.gmra.mxu1 %vm97_vm0, %v82_v24  ;;  %424 = vmatpush.msrb.mxu3 %v3399_v16 }
  0x2a   :  { %408 = vmatpush.msrb.mxu2 %v3392_v14 }
  0x2b   :  { %425 = vmatpush.msrb.mxu3 %v3401_v17 }
  0x2c   :  { %409 = vmatpush.msrb.mxu2 %v3397_v15  ;;  %2845 = vmatmul.msk.f32.gmra.mxu0 %vm97_vm0, %v82_v24 }
  0x2d   :  { %426 = vmatpush.msrb.mxu3 %v3406_v18 }
  0x2e   :  { %557 = vmatpush.msra.mxu2 %v3359_v1 }
  0x2f   :  { %427 = vmatpush.msrb.mxu3 %v3413_v20 }
  0x30   :  { %558 = vmatpush.msra.mxu2 %v3362_v3 }
  0x31   :  { %2854 = vmatmul.msk.f32.gmra.mxu1 %vm97_vm0, %v83_v25  ;;  %428 = vmatpush.msrb.mxu3 %v3426_v22 }
  0x32   :  { %559 = vmatpush.msra.mxu2 %v3367_v5 }
  0x33   :  { %429 = vmatpush.msrb.mxu3 %v3428_v23 }
  0x34   :  { %560 = vmatpush.msra.mxu2 %v3371_v6  ;;  %2846 = vmatmul.msk.f32.gmra.mxu0 %vm97_vm0, %v83_v25 }
  0x35   :  { %577 = vmatpush.msra.mxu3 %v3374_v9 }
  0x36   :  { %561 = vmatpush.msra.mxu2 %v3376_v10 }
  0x37   :  { %578 = vmatpush.msra.mxu3 %v3379_v11 }
  0x38   :  { %562 = vmatpush.msra.mxu2 %v3383_v12 }
  0x39   :  { %2855 = vmatmul.msk.f32.gmra.mxu1 %vm97_vm0, %v84_v26  ;;  %579 = vmatpush.msra.mxu3 %v3399_v16 }
  0x3a   :  { %563 = vmatpush.msra.mxu2 %v3392_v14 }
  0x3b   :  { %580 = vmatpush.msra.mxu3 %v3401_v17 }
  0x3c   :  { %564 = vmatpush.msra.mxu2 %v3397_v15  ;;  %2847 = vmatmul.msk.f32.gmra.mxu0 %vm97_vm0, %v84_v26 }
  0x3d   :  { %581 = vmatpush.msra.mxu3 %v3406_v18 }
  0x3f   :  { %582 = vmatpush.msra.mxu3 %v3413_v20 }
  0x41   :  { %2856 = vmatmul.msk.f32.gmra.mxu1 %vm97_vm0, %v85_v27  ;;  %583 = vmatpush.msra.mxu3 %v3426_v22 }
  0x43   :  { %584 = vmatpush.msra.mxu3 %v3428_v23 }
  0x44   :  { %2848 = vmatmul.msk.f32.gmra.mxu0 %vm97_vm0, %v85_v27 }
  0x49   :  { %2857 = vmatmul.msk.f32.gmra.mxu1 %vm97_vm0, %v86_v28 }
  0x4c   :  { %2849 = vmatmul.msk.f32.gmra.mxu0 %vm97_vm0, %v86_v28 }
  0x8e   :  { %v180_v31 = vpop.f32.mrf.mxu1 }
  0x8f   :  { %v3500_v32 = vadd.f32 %v180_v31, %v94_v30 }
  0x91   :  { %v139_v36 = vpop.f32.mrf.mxu0 }
  0x92   :  { %v140_v37 = vadd.f32 %v139_v36, %v3504_v35 }
  0x96   :  { %v183_v33 = vpop.f32.mrf.mxu1 }
  0x97   :  { %v3502_v34 = vadd.f32 %v183_v33, %v94_v30 }
  0x9e   :  { %v186_v38 = vpop.f32.mrf.mxu1 }
  0x9f   :  { %v3507_v39 = vadd.f32 %v186_v38, %v94_v30 }
  0xa0   :  { %v257_v40 = vpop.f32.mrf.mxu2 }
  0xa1   :  { %v281_v41 = vadd.f32 %v257_v40, %v140_v37 }
  0xa3   :  { %2960 = vtanh.f32 %v281_v41  ;;  %v2858_v56 = vmul.f32 -1.442695, %v281_v41 }
  0xa6   :  { %v189_v42 = vpop.f32.mrf.mxu1  ;;  %v277_v52 = vpop.f32.mrf.mxu3 }
  0xa7   :  { %v3509_v43 = vadd.f32 %v189_v42, %v94_v30 }
  0xa9   :  { %v2961_v44 = vpop.eup %2960 }
  0xaa   :  { %307 = vrot.lane.b32.xlu0 %v2961_v44, %s3298_s0 }
  0xae   :  { %v192_v45 = vpop.f32.mrf.mxu1 }
  0xaf   :  { %v3512_v46 = vadd.f32 %v192_v45, %v94_v30 }
  0xb6   :  { %v195_v47 = vpop.f32.mrf.mxu1 }
  0xb7   :  { %v3514_v48 = vadd.f32 %v195_v47, %v94_v30 }
  0xbe   :  { %v198_v49 = vpop.f32.mrf.mxu1 }
  0xbf   :  { %v3516_v50 = vadd.f32 %v198_v49, %v94_v30 }
  0xc6   :  { %v201_v51 = vpop.f32.mrf.mxu1 }
  0xc7   :  { %v202_v53 = vadd.f32 %v201_v51, %v94_v30 }
  0xc9   :  { %v284_v54 = vadd.f32 %v277_v52, %v202_v53 }
  0xcb   :  { %2962 = vtanh.f32 %v284_v54  ;;  %v2859_v4 = vmul.f32 -1.442695, %v284_v54 }
  0xcc   :  { %2964 = vpow2.f32 %v2858_v56 }
  0xd1   :  { %v2963_v55 = vpop.eup %2962 }
  0xd2   :  { %344 = vrot.lane.b32.xlu0 %v2963_v55, %s3298_s0  ;;  %v2965_v57 = vpop.eup %2964 }
  0xd3   :  { %v288_v58 = vadd.f32 1.0, %v2965_v57 }
  0xd5   :  { %2966 = vrcp.f32 %v288_v58  ;;  %vm294_vm1 = vweird.f32 %v288_v58  ;;  %v300_v63 = vand.u32 2147483648, %v288_v58  ;;  %v298_v2 = vand.u32 2147483647, %v288_v58 }
  0xd6   :  { %2968 = vpow2.f32 %v2859_v4 }
  0xd7   :  { %v301_v7 = vor.u32 1.1754944e-38, %v300_v63  ;;  %vm299_vm4 = vcmp.eq.f32.partialorder %v298_v2, 8.507059e+37 }
  0xdb   :  { %v2967_v59 = vpop.eup %2966 }
  0xdc   :  { %v290_v60 = vmul.f32 %v2967_v59, %v288_v58  ;;  %vm295_vm2 = vweird.f32 %v2967_v59  ;;  %v2969_v25 = vpop.eup %2968 }
  0xdd   :  { %vm296_vm3 = vmor %vm294_vm1, %vm295_vm2  ;;  %v325_v26 = vadd.f32 1.0, %v2969_v25 }
  0xde   :  { %v291_v61 = vsub.f32 1.0, %v290_v60 }
  0xdf   :  { %2970 = vrcp.f32 %v325_v26  ;;  %v337_v33 = vand.u32 2147483648, %v325_v26  ;;  %vm331_vm6 = vweird.f32 %v325_v26  ;;  %v335_v36 = vand.u32 2147483647, %v325_v26 }
  0xe0   :  { %v292_v62 = vmul.f32 %v2967_v59, %v291_v61 }
  0xe1   :  { %v338_v38 = vor.u32 1.1754944e-38, %v337_v33  ;;  %vm336_vm8 = vcmp.eq.f32.partialorder %v335_v36, 8.507059e+37 }
  0xe2   :  { %v293_v0 = vadd.f32 %v2967_v59, %v292_v62 }
  0xe4   :  { %v297_v8 = vsel %vm296_vm3, %v2967_v59, %v293_v0 }
  0xe5   :  { %v302_v21 = vsel %vm299_vm4, %v301_v7, %v297_v8  ;;  %v2971_v27 = vpop.eup %2970 }
  0xe6   :  { %v327_v28 = vmul.f32 %v2971_v27, %v325_v26  ;;  %vm332_vm5 = vweird.f32 %v2971_v27  ;;  %v305_v44 = vmul.f32 0.0, %v302_v21 }
  0xe7   :  { %vm333_vm7 = vmor %vm331_vm6, %vm332_vm5 }
  0xe8   :  { %v328_v29 = vsub.f32 1.0, %v327_v28 }
  0xea   :  { %v329_v30 = vmul.f32 %v2971_v27, %v328_v29 }
  0xec   :  { %v330_v31 = vadd.f32 %v2971_v27, %v329_v30 }
  0xee   :  { %v334_v37 = vsel %vm333_vm7, %v2971_v27, %v330_v31 }
  0xef   :  { %v339_v40 = vsel %vm336_vm8, %v338_v38, %v334_v37 }
  0xf0   :  { %v342_v51 = vmul.f32 0.0, %v339_v40 }
 0x11c   :  { %v308_v13 = vpop.permute.xlu0 %307 }
 0x11d   :  { %v310_v24 = vmul.f32 %v308_v13, %v302_v21 }
 0x11f   :  { %312 = vrot.lane.b32.xlu1 %v310_v24, %s3299_s2 }
 0x144   :  { %v345_v41 = vpop.permute.xlu0 %344 }
 0x145   :  { %v347_v42 = vmul.f32 %v345_v41, %v339_v40 }
 0x147   :  { %349 = vrot.lane.b32.xlu1 %v347_v42, %s3299_s2 }
 0x191   :  { %v313_v45 = vpop.permute.xlu1 %312 }
 0x192   :  { %v3521_v47 = vadd.f32 %v313_v45, %v305_v44 }
 0x194   :  { %2972 = vtanh.f32 %v3521_v47 }
 0x19a   :  { %v2973_v49 = vpop.eup %2972 }
 0x19b   :  { %318 = vrot.lane.b32.xlu2 %v2973_v49, %s3298_s0 }
 0x1b9   :  { %v350_v52 = vpop.permute.xlu1 %349 }
 0x1ba   :  { %v3525_v53 = vadd.f32 %v350_v52, %v342_v51 }
 0x1bc   :  { %2974 = vtanh.f32 %v3525_v53 }
 0x1c2   :  { %v2975_v54 = vpop.eup %2974 }
 0x1c3   :  { %355 = vrot.lane.b32.xlu2 %v2975_v54, %s3298_s0 }
 0x1f5   :  { %v319_v55 = vpop.permute.xlu2 %318 }
 0x1f6   :  { %v321_v56 = vmul.f32 %v319_v55, %v302_v21 }
 0x1f8   :  { %360 = vrot.lane.b32.xlu0 %v321_v56, %s3299_s2 }
 0x21d   :  { %v356_v57 = vpop.permute.xlu2 %355 }
 0x21e   :  { %v3530_v58 = vmul.f32 %v356_v57, %v339_v40 }
 0x220   :  { %371 = vrot.lane.b32.xlu1 %v3530_v58, %s3298_s0 }
 0x26a   :  { %v361_v59 = vpop.permute.xlu0 %360 }
 0x26b   :  { %364 = vst.msk [vmem:[#allocation4] sm:$0xff] %vm363_vm9, %v361_v59 }
 0x292   :  { %v372_v60 = vpop.permute.xlu1 %371 }
 0x293   :  { %v374_v61 = vsel %vm363_vm9, %v361_v59, %v372_v60 }
 0x294   :  { %2860 = vmatmul.msk.f32.vlgmr.msrb.gmra.mxu2 %vm236_vm10, %v374_v61  ;;  %2861 = vmatmul.msk.f32.vlgmr.msrb.gmra.mxu3 %vm236_vm10, %v374_v61 }
 0x295   :  { %712 = vmatpush.msrb.mxu2 %v3359_v1  ;;  %732 = vmatpush.msrb.mxu3 %v3374_v9  ;;  %v142_v1 = vpop.f32.mrf.mxu0 }
 0x297   :  { %713 = vmatpush.msrb.mxu2 %v3362_v3  ;;  %733 = vmatpush.msrb.mxu3 %v3379_v11  ;;  %v143_v3 = vadd.f32 %v142_v1, %v3504_v35 }
 0x299   :  { %714 = vmatpush.msrb.mxu2 %v3367_v5  ;;  %734 = vmatpush.msrb.mxu3 %v3399_v16 }
 0x29b   :  { %715 = vmatpush.msrb.mxu2 %v3371_v6  ;;  %735 = vmatpush.msrb.mxu3 %v3401_v17 }
 0x29d   :  { %716 = vmatpush.msrb.mxu2 %v3376_v10  ;;  %736 = vmatpush.msrb.mxu3 %v3406_v18  ;;  %v145_v60 = vpop.f32.mrf.mxu0 }
 0x29e   :  { %v146_v61 = vadd.f32 %v145_v60, %v3504_v35 }
 0x29f   :  { %717 = vmatpush.msrb.mxu2 %v3383_v12  ;;  %737 = vmatpush.msrb.mxu3 %v3413_v20 }
 0x2a1   :  { %718 = vmatpush.msrb.mxu2 %v3392_v14  ;;  %738 = vmatpush.msrb.mxu3 %v3426_v22 }
 0x2a3   :  { %719 = vmatpush.msrb.mxu2 %v3397_v15  ;;  %739 = vmatpush.msrb.mxu3 %v3428_v23 }
 0x317   :  { %v411_v5 = vpop.f32.mrf.mxu2  ;;  %v431_v6 = vpop.f32.mrf.mxu3 }
 0x318   :  { %v436_v9 = vadd.f32 %v411_v5, %v143_v3  ;;  %v439_v10 = vadd.f32 %v431_v6, %v3516_v50 }
 0x31a   :  { %2976 = vtanh.f32 %v436_v9  ;;  %v2862_v14 = vmul.f32 -1.442695, %v436_v9  ;;  %v2863_v18 = vmul.f32 -1.442695, %v439_v10 }
 0x31b   :  { %2978 = vtanh.f32 %v439_v10 }
 0x31c   :  { %2980 = vpow2.f32 %v2862_v14 }
 0x320   :  { %v2977_v11 = vpop.eup %2976 }
 0x321   :  { %v2979_v12 = vpop.eup %2978  ;;  %462 = vrot.lane.b32.xlu2 %v2977_v11, %s3298_s0 }
 0x322   :  { %499 = vrot.lane.b32.xlu0 %v2979_v12, %s3298_s0  ;;  %v2981_v15 = vpop.eup %2980 }
 0x323   :  { %v443_v16 = vadd.f32 1.0, %v2981_v15 }
 0x325   :  { %2982 = vrcp.f32 %v443_v16  ;;  %v455_v0 = vand.u32 2147483648, %v443_v16  ;;  %vm449_vm12 = vweird.f32 %v443_v16  ;;  %v453_v2 = vand.u32 2147483647, %v443_v16 }
 0x326   :  { %2984 = vpow2.f32 %v2863_v18 }
 0x327   :  { %v456_v7 = vor.u32 1.1754944e-38, %v455_v0  ;;  %vm454_vm14 = vcmp.eq.f32.partialorder %v453_v2, 8.507059e+37 }
 0x32b   :  { %v2983_v17 = vpop.eup %2982 }
 0x32c   :  { %v445_v20 = vmul.f32 %v2983_v17, %v443_v16  ;;  %v2985_v50 = vpop.eup %2984  ;;  %vm450_vm11 = vweird.f32 %v2983_v17 }
 0x32d   :  { %v480_v62 = vadd.f32 1.0, %v2985_v50  ;;  %vm451_vm13 = vmor %vm449_vm12, %vm450_vm11 }
 0x32e   :  { %v446_v22 = vsub.f32 1.0, %v445_v20 }
 0x32f   :  { %2986 = vrcp.f32 %v480_v62  ;;  %v492_v29 = vand.u32 2147483648, %v480_v62  ;;  %vm486_vm0 = vweird.f32 %v480_v62  ;;  %v490_v30 = vand.u32 2147483647, %v480_v62 }
 0x330   :  { %v447_v23 = vmul.f32 %v2983_v17, %v446_v22 }
 0x331   :  { %v493_v33 = vor.u32 1.1754944e-38, %v492_v29  ;;  %vm491_vm2 = vcmp.eq.f32.partialorder %v490_v30, 8.507059e+37 }
 0x332   :  { %v448_v63 = vadd.f32 %v2983_v17, %v447_v23 }
 0x334   :  { %v452_v4 = vsel %vm451_vm13, %v2983_v17, %v448_v63 }
 0x335   :  { %v457_v13 = vsel %vm454_vm14, %v456_v7, %v452_v4  ;;  %v2987_v24 = vpop.eup %2986 }
 0x336   :  { %v482_v25 = vmul.f32 %v2987_v24, %v480_v62  ;;  %vm487_vm15 = vweird.f32 %v2987_v24  ;;  %v460_v40 = vmul.f32 %v457_v13, %v3521_v47 }
 0x337   :  { %vm488_vm1 = vmor %vm486_vm0, %vm487_vm15 }
 0x338   :  { %v483_v26 = vsub.f32 1.0, %v482_v25 }
 0x33a   :  { %v484_v27 = vmul.f32 %v2987_v24, %v483_v26 }
 0x33c   :  { %v485_v28 = vadd.f32 %v2987_v24, %v484_v27 }
 0x33e   :  { %v489_v31 = vsel %vm488_vm1, %v2987_v24, %v485_v28 }
 0x33f   :  { %v494_v37 = vsel %vm491_vm2, %v493_v33, %v489_v31 }
 0x340   :  { %v497_v41 = vmul.f32 %v494_v37, %v3525_v53 }
 0x37b   :  { %v463_v8 = vpop.permute.xlu2 %462 }
 0x37c   :  { %v465_v21 = vmul.f32 %v463_v8, %v457_v13 }
 0x37e   :  { %467 = vrot.lane.b32.xlu1 %v465_v21, %s3299_s2 }
 0x394   :  { %v500_v36 = vpop.permute.xlu0 %499 }
 0x395   :  { %v502_v38 = vmul.f32 %v500_v36, %v494_v37 }
 0x397   :  { %504 = vrot.lane.b32.xlu2 %v502_v38, %s3299_s2 }
 0x3f0   :  { %v468_v42 = vpop.permute.xlu1 %467 }
 0x3f1   :  { %v505_v44 = vpop.permute.xlu2 %504  ;;  %v3562_v45 = vadd.f32 %v468_v42, %v460_v40 }
 0x3f2   :  { %v3564_v49 = vadd.f32 %v505_v44, %v497_v41 }
 0x3f3   :  { %2988 = vtanh.f32 %v3562_v45 }
 0x3f4   :  { %2990 = vtanh.f32 %v3564_v49 }
 0x3f9   :  { %v2989_v51 = vpop.eup %2988 }
 0x3fa   :  { %v2991_v52 = vpop.eup %2990  ;;  %473 = vrot.lane.b32.xlu0 %v2989_v51, %s3298_s0 }
 0x3fb   :  { %510 = vrot.lane.b32.xlu1 %v2991_v52, %s3298_s0 }
 0x46c   :  { %v474_v54 = vpop.permute.xlu0 %473 }
 0x46d   :  { %v511_v47 = vpop.permute.xlu1 %510  ;;  %v476_v55 = vmul.f32 %v474_v54, %v457_v13 }
 0x46e   :  { %v3570_v53 = vmul.f32 %v511_v47, %v494_v37 }
 0x46f   :  { %515 = vrot.lane.b32.xlu2 %v476_v55, %s3299_s2 }
 0x470   :  { %526 = vrot.lane.b32.xlu0 %v3570_v53, %s3298_s0 }
 0x4c9   :  { %v516_v56 = vpop.permute.xlu2 %515 }
 0x4ca   :  { %519 = vst.msk [vmem:[#allocation4 + $0x8] sm:$0xff] %vm363_vm9, %v516_v56 }
 0x4e2   :  { %v527_v57 = vpop.permute.xlu0 %526 }
 0x4e3   :  { %v529_v59 = vsel %vm363_vm9, %v516_v56, %v527_v57  ;;  %v148_v57 = vpop.f32.mrf.mxu0 }
 0x4e4   :  { %2864 = vmatmul.msk.f32.vlgmr.msra.gmra.mxu2 %vm236_vm10, %v529_v59  ;;  %2865 = vmatmul.msk.f32.vlgmr.msra.gmra.mxu3 %vm236_vm10, %v529_v59  ;;  %v149_v59 = vadd.f32 %v148_v57, %v3504_v35 }
 0x567   :  { %v566_v1 = vpop.f32.mrf.mxu2  ;;  %v586_v3 = vpop.f32.mrf.mxu3 }
 0x568   :  { %v591_v5 = vadd.f32 %v566_v1, %v146_v61  ;;  %v594_v6 = vadd.f32 %v586_v3, %v3514_v48 }
 0x56a   :  { %2992 = vtanh.f32 %v591_v5  ;;  %v2867_v11 = vmul.f32 -1.442695, %v594_v6  ;;  %v2866_v16 = vmul.f32 -1.442695, %v591_v5 }
 0x56b   :  { %2994 = vtanh.f32 %v594_v6 }
 0x56c   :  { %2996 = vpow2.f32 %v2867_v11 }
 0x570   :  { %v2993_v9 = vpop.eup %2992 }
 0x571   :  { %v2995_v10 = vpop.eup %2994  ;;  %617 = vrot.lane.b32.xlu1 %v2993_v9, %s3298_s0 }
 0x572   :  { %654 = vrot.lane.b32.xlu2 %v2995_v10, %s3298_s0  ;;  %v2997_v12 = vpop.eup %2996 }
 0x573   :  { %v635_v14 = vadd.f32 1.0, %v2997_v12 }
 0x575   :  { %2998 = vrcp.f32 %v635_v14  ;;  %v647_v50 = vand.u32 2147483648, %v635_v14  ;;  %vm641_vm4 = vweird.f32 %v635_v14  ;;  %v645_v62 = vand.u32 2147483647, %v635_v14 }
 0x576   :  { %3000 = vpow2.f32 %v2866_v16 }
 0x577   :  { %v648_v0 = vor.u32 1.1754944e-38, %v647_v50  ;;  %vm646_vm6 = vcmp.eq.f32.partialorder %v645_v62, 8.507059e+37 }
 0x57b   :  { %v2999_v15 = vpop.eup %2998 }
 0x57c   :  { %v637_v17 = vmul.f32 %v2999_v15, %v635_v14  ;;  %v3001_v20 = vpop.eup %3000  ;;  %vm642_vm3 = vweird.f32 %v2999_v15 }
 0x57d   :  { %v598_v22 = vadd.f32 1.0, %v3001_v20  ;;  %vm643_vm5 = vmor %vm641_vm4, %vm642_vm3 }
 0x57e   :  { %v638_v18 = vsub.f32 1.0, %v637_v17 }
 0x57f   :  { %3002 = vrcp.f32 %v598_v22  ;;  %v610_v26 = vand.u32 2147483648, %v598_v22  ;;  %vm604_vm8 = vweird.f32 %v598_v22  ;;  %v608_v27 = vand.u32 2147483647, %v598_v22 }
 0x580   :  { %v639_v48 = vmul.f32 %v2999_v15, %v638_v18 }
 0x581   :  { %v611_v29 = vor.u32 1.1754944e-38, %v610_v26  ;;  %vm609_vm12 = vcmp.eq.f32.partialorder %v608_v27, 8.507059e+37 }
 0x582   :  { %v640_v23 = vadd.f32 %v2999_v15, %v639_v48 }
 0x584   :  { %v644_v63 = vsel %vm643_vm5, %v2999_v15, %v640_v23 }
 0x585   :  { %v649_v4 = vsel %vm646_vm6, %v648_v0, %v644_v63  ;;  %v3003_v7 = vpop.eup %3002 }
 0x586   :  { %v600_v13 = vmul.f32 %v3003_v7, %v598_v22  ;;  %vm605_vm7 = vweird.f32 %v3003_v7  ;;  %v652_v36 = vmul.f32 %v649_v4, %v3564_v49 }
 0x587   :  { %vm606_vm11 = vmor %vm604_vm8, %vm605_vm7 }
 0x588   :  { %v601_v21 = vsub.f32 1.0, %v600_v13 }
 0x58a   :  { %v602_v24 = vmul.f32 %v3003_v7, %v601_v21 }
 0x58c   :  { %v603_v25 = vadd.f32 %v3003_v7, %v602_v24 }
 0x58e   :  { %v607_v28 = vsel %vm606_vm11, %v3003_v7, %v603_v25 }
 0x58f   :  { %v612_v31 = vsel %vm609_vm12, %v611_v29, %v607_v28 }
 0x590   :  { %v615_v41 = vmul.f32 %v612_v31, %v3562_v45 }
 0x5cc   :  { %v655_v2 = vpop.permute.xlu2 %654 }
 0x5cd   :  { %v657_v8 = vmul.f32 %v655_v2, %v649_v4 }
 0x5cf   :  { %659 = vrot.lane.b32.xlu1 %v657_v8, %s3299_s2 }
 0x5e3   :  { %v618_v30 = vpop.permute.xlu1 %617 }
 0x5e4   :  { %v620_v33 = vmul.f32 %v618_v30, %v612_v31 }
 0x5e6   :  { %622 = vrot.lane.b32.xlu0 %v620_v33, %s3299_s2 }
 0x641   :  { %v660_v37 = vpop.permute.xlu1 %659 }
 0x642   :  { %v3586_v38 = vadd.f32 %v660_v37, %v652_v36 }
 0x644   :  { %3004 = vtanh.f32 %v3586_v38 }
 0x64a   :  { %v3005_v40 = vpop.eup %3004 }
 0x64b   :  { %665 = vrot.lane.b32.xlu0 %v3005_v40, %s3298_s0 }
 0x658   :  { %v623_v42 = vpop.permute.xlu0 %622 }
 0x659   :  { %v3591_v44 = vadd.f32 %v623_v42, %v615_v41 }
 0x65b   :  { %3006 = vtanh.f32 %v3591_v44 }
 0x661   :  { %v3007_v51 = vpop.eup %3006 }
 0x662   :  { %628 = vrot.lane.b32.xlu2 %v3007_v51, %s3298_s0 }
 0x6bc   :  { %v629_v52 = vpop.permute.xlu2 %628 }
 0x6bd   :  { %v666_v49 = vpop.permute.xlu0 %665  ;;  %v631_v54 = vmul.f32 %v629_v52, %v612_v31 }
 0x6be   :  { %v3595_v47 = vmul.f32 %v666_v49, %v649_v4 }
 0x6bf   :  { %670 = vrot.lane.b32.xlu1 %v631_v54, %s3299_s2 }
 0x6c0   :  { %681 = vrot.lane.b32.xlu2 %v3595_v47, %s3298_s0 }
 0x71a   :  { %v682_v55 = vpop.permute.xlu2 %681 }
 0x731   :  { %v671_v45 = vpop.permute.xlu1 %670 }
 0x732   :  { %674 = vst.msk [vmem:[#allocation4 + $0x10] sm:$0xff] %vm363_vm9, %v671_v45  ;;  %v684_v56 = vsel %vm363_vm9, %v671_v45, %v682_v55  ;;  %v151_v45 = vpop.f32.mrf.mxu0 }
 0x733   :  { %2868 = vmatmul.msk.f32.vlgmr.msrb.gmra.mxu2 %vm236_vm10, %v684_v56  ;;  %2869 = vmatmul.msk.f32.vlgmr.msrb.gmra.mxu3 %vm236_vm10, %v684_v56 }
 0x73a   :  { %v3629_v56 = vpop.f32.mrf.mxu0 }
 0x742   :  { %v3631_v57 = vpop.f32.mrf.mxu0 }
 0x7b6   :  { %v721_v60 = vpop.f32.mrf.mxu2  ;;  %v741_v61 = vpop.f32.mrf.mxu3 }
 0x7b7   :  { %v746_v1 = vadd.f32 %v721_v60, %v149_v59  ;;  %v749_v3 = vadd.f32 %v741_v61, %v3512_v46  ;;  %v3633_v59 = vpop.f32.mrf.mxu0  ;;  %v152_v60 = vadd.f32 %v151_v45, %v3504_v35  ;;  %v1007_v45 = vld [vmem:[#allocation7 + $0x60] sm:$0xff] }
 0x7b9   :  { %3008 = vtanh.f32 %v746_v1  ;;  %v2870_v9 = vmul.f32 -1.442695, %v746_v1  ;;  %v2871_v10 = vmul.f32 -1.442695, %v749_v3 }
 0x7ba   :  { %3010 = vtanh.f32 %v749_v3 }
 0x7bb   :  { %3012 = vpow2.f32 %v2870_v9 }
 0x7bc   :  { %3014 = vpow2.f32 %v2871_v10 }
 0x7bf   :  { %v3009_v5 = vpop.eup %3008 }
 0x7c0   :  { %v3011_v6 = vpop.eup %3010  ;;  %772 = vrot.lane.b32.xlu0 %v3009_v5, %s3298_s0 }
 0x7c1   :  { %809 = vrot.lane.b32.xlu1 %v3011_v6, %s3298_s0  ;;  %v3013_v11 = vpop.eup %3012 }
 0x7c2   :  { %v3015_v12 = vpop.eup %3014  ;;  %v753_v14 = vadd.f32 1.0, %v3013_v11 }
 0x7c3   :  { %v790_v15 = vadd.f32 1.0, %v3015_v12 }
 0x7c4   :  { %3016 = vrcp.f32 %v753_v14  ;;  %v765_v63 = vand.u32 2147483648, %v753_v14  ;;  %vm759_vm15 = vweird.f32 %v753_v14  ;;  %v763_v2 = vand.u32 2147483647, %v753_v14 }
 0x7c5   :  { %3018 = vrcp.f32 %v790_v15  ;;  %v802_v0 = vand.u32 2147483648, %v790_v15  ;;  %vm796_vm0 = vweird.f32 %v790_v15  ;;  %v800_v4 = vand.u32 2147483647, %v790_v15 }
 0x7c6   :  { %v766_v13 = vor.u32 1.1754944e-38, %v765_v63  ;;  %vm764_vm3 = vcmp.eq.f32.partialorder %v763_v2, 8.507059e+37 }
 0x7c7   :  { %v803_v21 = vor.u32 1.1754944e-38, %v802_v0  ;;  %vm801_vm4 = vcmp.eq.f32.partialorder %v800_v4, 8.507059e+37 }
 0x7ca   :  { %v3017_v16 = vpop.eup %3016 }
 0x7cb   :  { %v3019_v46 = vpop.eup %3018  ;;  %v755_v17 = vmul.f32 %v3017_v16, %v753_v14  ;;  %vm760_vm13 = vweird.f32 %v3017_v16 }
 0x7cc   :  { %v792_v18 = vmul.f32 %v3019_v46, %v790_v15  ;;  %vm797_vm14 = vweird.f32 %v3019_v46  ;;  %vm761_vm1 = vmor %vm759_vm15, %vm760_vm13 }
 0x7cd   :  { %v756_v20 = vsub.f32 1.0, %v755_v17  ;;  %vm798_vm2 = vmor %vm796_vm0, %vm797_vm14 }
 0x7ce   :  { %v793_v48 = vsub.f32 1.0, %v792_v18 }
 0x7cf   :  { %v757_v22 = vmul.f32 %v3017_v16, %v756_v20 }
 0x7d0   :  { %v794_v23 = vmul.f32 %v3019_v46, %v793_v48 }
 0x7d1   :  { %v758_v50 = vadd.f32 %v3017_v16, %v757_v22 }
 0x7d2   :  { %v795_v62 = vadd.f32 %v3019_v46, %v794_v23 }
 0x7d3   :  { %v762_v7 = vsel %vm761_vm1, %v3017_v16, %v758_v50 }
 0x7d4   :  { %v799_v8 = vsel %vm798_vm2, %v3019_v46, %v795_v62  ;;  %v767_v25 = vsel %vm764_vm3, %v766_v13, %v762_v7 }
 0x7d5   :  { %v804_v27 = vsel %vm801_vm4, %v803_v21, %v799_v8  ;;  %v770_v30 = vmul.f32 %v767_v25, %v3591_v44 }
 0x7d6   :  { %v807_v37 = vmul.f32 %v804_v27, %v3586_v38 }
 0x832   :  { %v773_v24 = vpop.permute.xlu0 %772 }
 0x833   :  { %v810_v26 = vpop.permute.xlu1 %809  ;;  %v775_v28 = vmul.f32 %v773_v24, %v767_v25 }
 0x834   :  { %v812_v29 = vmul.f32 %v810_v26, %v804_v27 }
 0x835   :  { %777 = vrot.lane.b32.xlu2 %v775_v28, %s3299_s2 }
 0x836   :  { %814 = vrot.lane.b32.xlu0 %v812_v29, %s3299_s2 }
 0x88f   :  { %v778_v31 = vpop.permute.xlu2 %777 }
 0x890   :  { %v3611_v33 = vadd.f32 %v778_v31, %v770_v30 }
 0x892   :  { %3020 = vtanh.f32 %v3611_v33 }
 0x898   :  { %v3021_v36 = vpop.eup %3020 }
 0x899   :  { %783 = vrot.lane.b32.xlu1 %v3021_v36, %s3298_s0 }
 0x8a8   :  { %v815_v40 = vpop.permute.xlu0 %814 }
 0x8a9   :  { %v3616_v41 = vadd.f32 %v815_v40, %v807_v37 }
 0x8ab   :  { %3022 = vtanh.f32 %v3616_v41 }
 0x8b1   :  { %v3023_v42 = vpop.eup %3022 }
 0x8b2   :  { %820 = vrot.lane.b32.xlu2 %v3023_v42, %s3298_s0 }
 0x90b   :  { %v784_v51 = vpop.permute.xlu1 %783 }
 0x90c   :  { %v821_v44 = vpop.permute.xlu2 %820  ;;  %v786_v52 = vmul.f32 %v784_v51, %v767_v25 }
 0x90d   :  { %v3620_v49 = vmul.f32 %v821_v44, %v804_v27 }
 0x90e   :  { %825 = vrot.lane.b32.xlu0 %v786_v52, %s3299_s2 }
 0x90f   :  { %836 = vrot.lane.b32.xlu1 %v3620_v49, %s3298_s0 }
 0x980   :  { %v826_v54 = vpop.permute.xlu0 %825 }
 0x981   :  { %829 = vst.msk [vmem:[#allocation4 + $0x18] sm:$0xff] %vm363_vm9, %v826_v54  ;;  %v837_v38 = vpop.permute.xlu1 %836 }
 0x982   :  { %v839_v55 = vsel %vm363_vm9, %v826_v54, %v837_v38  ;;  %v1009_v38 = vld [vmem:[#allocation7 + $0x70] sm:$0xff] }
 0x983   :  { %2872 = vmatmul.msk.f32.vlgmr.msrb.gmra.mxu0 %vm236_vm10, %v839_v55  ;;  %2873 = vmatmul.msk.f32.vlgmr.msrb.gmra.mxu1 %vm236_vm10, %v839_v55  ;;  %v1010_v55 = vld [vmem:[#allocation7 + $0x78] sm:$0xff] }
 0x984   :  { %1022 = vmatpush.msra.mxu2 %v1009_v38  ;;  %1042 = vmatpush.msra.mxu3 %v1010_v55 }
 0x985   :  { %1177 = vmatpush.msra.mxu0 %v1009_v38  ;;  %1197 = vmatpush.msra.mxu1 %v1010_v55 }
 0x986   :  { %1023 = vmatpush.msra.mxu2 %v1007_v45 }
 0x987   :  { %1178 = vmatpush.msra.mxu0 %v1007_v45 }
 0xa00   :  { %v876_v61 = vpop.f32.mrf.mxu0  ;;  %v896_v1 = vpop.f32.mrf.mxu1 }
 0xa01   :  { %v901_v3 = vadd.f32 %v876_v61, %v152_v60  ;;  %v904_v5 = vadd.f32 %v896_v1, %v3509_v43  ;;  %v1008_v60 = vld [vmem:[#allocation7 + $0x68] sm:$0xff]  ;;  %v1005_v61 = vld [vmem:[#allocation7 + $0x50] sm:$0xff]  ;;  %v1006_v1 = vld [vmem:[#allocation7 + $0x58] sm:$0xff] }
 0xa02   :  { %1043 = vmatpush.msra.mxu3 %v1008_v60  ;;  %1198 = vmatpush.msra.mxu1 %v1008_v60 }
 0xa03   :  { %3024 = vtanh.f32 %v901_v3  ;;  %v2874_v10 = vmul.f32 -1.442695, %v901_v3  ;;  %v2875_v15 = vmul.f32 -1.442695, %v904_v5  ;;  %v1003_v3 = vld [vmem:[#allocation7 + $0x40] sm:$0xff]  ;;  %1024 = vmatpush.msra.mxu2 %v1005_v61  ;;  %1179 = vmatpush.msra.mxu0 %v1005_v61 }
 0xa04   :  { %3026 = vtanh.f32 %v904_v5  ;;  %v1004_v5 = vld [vmem:[#allocation7 + $0x48] sm:$0xff]  ;;  %1044 = vmatpush.msra.mxu3 %v1006_v1  ;;  %1199 = vmatpush.msra.mxu1 %v1006_v1 }
 0xa05   :  { %3028 = vpow2.f32 %v2874_v10  ;;  %1025 = vmatpush.msra.mxu2 %v1003_v3  ;;  %v999_v10 = vld [vmem:[#allocation7 + $0x20] sm:$0xff]  ;;  %1180 = vmatpush.msra.mxu0 %v1003_v3 }
 0xa06   :  { %1045 = vmatpush.msra.mxu3 %v1004_v5  ;;  %1200 = vmatpush.msra.mxu1 %v1004_v5 }
 0xa09   :  { %v3025_v6 = vpop.eup %3024 }
 0xa0a   :  { %v3027_v9 = vpop.eup %3026  ;;  %927 = vrot.lane.b32.xlu2 %v3025_v6, %s3298_s0  ;;  %v1001_v6 = vld [vmem:[#allocation7 + $0x30] sm:$0xff] }
 0xa0b   :  { %964 = vrot.lane.b32.xlu0 %v3027_v9, %s3298_s0  ;;  %v3029_v11 = vpop.eup %3028  ;;  %v1002_v9 = vld [vmem:[#allocation7 + $0x38] sm:$0xff]  ;;  %1026 = vmatpush.msra.mxu2 %v1001_v6 }
 0xa0c   :  { %v908_v12 = vadd.f32 1.0, %v3029_v11  ;;  %v1000_v11 = vld [vmem:[#allocation7 + $0x28] sm:$0xff]  ;;  %1046 = vmatpush.msra.mxu3 %v1002_v9  ;;  %1181 = vmatpush.msra.mxu0 %v1001_v6 }
 0xa0d   :  { %1201 = vmatpush.msra.mxu1 %v1002_v9  ;;  %1027 = vmatpush.msra.mxu2 %v999_v10 }
 0xa0e   :  { %3030 = vrcp.f32 %v908_v12  ;;  %v920_v48 = vand.u32 2147483648, %v908_v12  ;;  %vm914_vm6 = vweird.f32 %v908_v12  ;;  %v918_v22 = vand.u32 2147483647, %v908_v12  ;;  %1047 = vmatpush.msra.mxu3 %v1000_v11  ;;  %1182 = vmatpush.msra.mxu0 %v999_v10 }
 0xa0f   :  { %3032 = vpow2.f32 %v2875_v15  ;;  %1202 = vmatpush.msra.mxu1 %v1000_v11  ;;  %v995_v15 = vld [vmem:[#allocation7] sm:$0xff] }
 0xa10   :  { %v921_v50 = vor.u32 1.1754944e-38, %v920_v48  ;;  %vm919_vm8 = vcmp.eq.f32.partialorder %v918_v22, 8.507059e+37 }
 0xa14   :  { %v3031_v14 = vpop.eup %3030 }
 0xa15   :  { %v910_v16 = vmul.f32 %v3031_v14, %v908_v12  ;;  %v3033_v43 = vpop.eup %3032  ;;  %vm915_vm5 = vweird.f32 %v3031_v14  ;;  %v997_v12 = vld [vmem:[#allocation7 + $0x10] sm:$0xff] }
 0xa16   :  { %v945_v18 = vadd.f32 1.0, %v3033_v43  ;;  %vm916_vm7 = vmor %vm914_vm6, %vm915_vm5  ;;  %1028 = vmatpush.msra.mxu2 %v997_v12  ;;  %1183 = vmatpush.msra.mxu0 %v997_v12 }
 0xa17   :  { %v911_v46 = vsub.f32 1.0, %v910_v16  ;;  %v996_v16 = vld [vmem:[#allocation7 + $0x8] sm:$0xff] }
 0xa18   :  { %3034 = vrcp.f32 %v945_v18  ;;  %v957_v21 = vand.u32 2147483648, %v945_v18  ;;  %vm951_vm12 = vweird.f32 %v945_v18  ;;  %v955_v24 = vand.u32 2147483647, %v945_v18  ;;  %1029 = vmatpush.msra.mxu2 %v995_v15  ;;  %1184 = vmatpush.msra.mxu0 %v995_v15 }
 0xa19   :  { %v912_v17 = vmul.f32 %v3031_v14, %v911_v46 }
 0xa1a   :  { %v958_v26 = vor.u32 1.1754944e-38, %v957_v21  ;;  %vm956_vm14 = vcmp.eq.f32.partialorder %v955_v24, 8.507059e+37  ;;  %1332 = vmatpush.msrb.mxu2 %v1009_v38 }
 0xa1b   :  { %v913_v20 = vadd.f32 %v3031_v14, %v912_v17 }
 0xa1c   :  { %1333 = vmatpush.msrb.mxu2 %v1007_v45 }
 0xa1d   :  { %v917_v23 = vsel %vm916_vm7, %v3031_v14, %v913_v20  ;;  %v998_v14 = vld [vmem:[#allocation7 + $0x18] sm:$0xff] }
 0xa1e   :  { %v922_v63 = vsel %vm919_vm8, %v921_v50, %v917_v23  ;;  %v3035_v2 = vpop.eup %3034  ;;  %1048 = vmatpush.msra.mxu3 %v998_v14  ;;  %1203 = vmatpush.msra.mxu1 %v998_v14 }
 0xa1f   :  { %v947_v4 = vmul.f32 %v3035_v2, %v945_v18  ;;  %vm952_vm11 = vweird.f32 %v3035_v2  ;;  %v925_v30 = vmul.f32 %v922_v63, %v3611_v33  ;;  %1334 = vmatpush.msrb.mxu2 %v1005_v61  ;;  %v155_v18 = vadd.f32 %v3629_v56, %v3504_v35 }
 0xa20   :  { %vm953_vm13 = vmor %vm951_vm12, %vm952_vm11  ;;  %1049 = vmatpush.msra.mxu3 %v996_v16  ;;  %1204 = vmatpush.msra.mxu1 %v996_v16 }
 0xa21   :  { %v948_v7 = vsub.f32 1.0, %v947_v4  ;;  %1335 = vmatpush.msrb.mxu2 %v1003_v3 }
 0xa22   :  { %1352 = vmatpush.msrb.mxu3 %v1010_v55 }
 0xa23   :  { %v949_v8 = vmul.f32 %v3035_v2, %v948_v7  ;;  %1336 = vmatpush.msrb.mxu2 %v1001_v6 }
 0xa24   :  { %1353 = vmatpush.msrb.mxu3 %v1008_v60 }
 0xa25   :  { %v950_v13 = vadd.f32 %v3035_v2, %v949_v8  ;;  %1337 = vmatpush.msrb.mxu2 %v999_v10 }
 0xa26   :  { %1354 = vmatpush.msrb.mxu3 %v1006_v1 }
 0xa27   :  { %v954_v25 = vsel %vm953_vm13, %v3035_v2, %v950_v13  ;;  %1338 = vmatpush.msrb.mxu2 %v997_v12 }
 0xa28   :  { %v959_v28 = vsel %vm956_vm14, %v958_v26, %v954_v25  ;;  %1355 = vmatpush.msrb.mxu3 %v1004_v5 }
 0xa29   :  { %v962_v31 = vmul.f32 %v959_v28, %v3616_v41  ;;  %1339 = vmatpush.msrb.mxu2 %v995_v15 }
 0xa2a   :  { %1356 = vmatpush.msrb.mxu3 %v1002_v9 }
 0xa2c   :  { %1357 = vmatpush.msrb.mxu3 %v1000_v11 }
 0xa2e   :  { %1358 = vmatpush.msrb.mxu3 %v998_v14 }
 0xa30   :  { %1359 = vmatpush.msrb.mxu3 %v996_v16 }
 0xa64   :  { %v928_v62 = vpop.permute.xlu2 %927 }
 0xa65   :  { %v930_v0 = vmul.f32 %v928_v62, %v922_v63 }
 0xa67   :  { %932 = vrot.lane.b32.xlu1 %v930_v0, %s3299_s2 }
 0xa7d   :  { %v965_v27 = vpop.permute.xlu0 %964 }
 0xa7e   :  { %v967_v29 = vmul.f32 %v965_v27, %v959_v28 }
 0xa80   :  { %969 = vrot.lane.b32.xlu2 %v967_v29, %s3299_s2 }
 0xad9   :  { %v933_v36 = vpop.permute.xlu1 %932 }
 0xada   :  { %v970_v37 = vpop.permute.xlu2 %969  ;;  %v3643_v40 = vadd.f32 %v933_v36, %v925_v30 }
 0xadb   :  { %v3645_v42 = vadd.f32 %v970_v37, %v962_v31 }
 0xadc   :  { %3036 = vtanh.f32 %v3643_v40 }
 0xadd   :  { %3038 = vtanh.f32 %v3645_v42 }
 0xae2   :  { %v3037_v51 = vpop.eup %3036 }
 0xae3   :  { %v3039_v44 = vpop.eup %3038  ;;  %938 = vrot.lane.b32.xlu0 %v3037_v51, %s3298_s0 }
 0xae4   :  { %975 = vrot.lane.b32.xlu1 %v3039_v44, %s3298_s0 }
 0xb55   :  { %v939_v52 = vpop.permute.xlu0 %938 }
 0xb56   :  { %v976_v33 = vpop.permute.xlu1 %975  ;;  %v941_v54 = vmul.f32 %v939_v52, %v922_v63 }
 0xb57   :  { %v3651_v41 = vmul.f32 %v976_v33, %v959_v28 }
 0xb58   :  { %980 = vrot.lane.b32.xlu2 %v941_v54, %s3299_s2 }
 0xb59   :  { %991 = vrot.lane.b32.xlu0 %v3651_v41, %s3298_s0 }
 0xbb2   :  { %v981_v46 = vpop.permute.xlu2 %980 }
 0xbb3   :  { %984 = vst.msk [vmem:[#allocation4 + $0x20] sm:$0xff] %vm363_vm9, %v981_v46 }
 0xbcb   :  { %v992_v17 = vpop.permute.xlu0 %991 }
 0xbcc   :  { %v994_v43 = vsel %vm363_vm9, %v981_v46, %v992_v17 }
 0xbcd   :  { %2876 = vmatmul.msk.f32.vlgmr.msra.gmra.mxu2 %vm236_vm10, %v994_v43  ;;  %2877 = vmatmul.msk.f32.vlgmr.msra.gmra.mxu3 %vm236_vm10, %v994_v43  ;;  %v158_v43 = vadd.f32 %v3631_v57, %v3504_v35 }
 0xc50   :  { %v1031_v20 = vpop.f32.mrf.mxu2  ;;  %v1051_v48 = vpop.f32.mrf.mxu3 }
 0xc51   :  { %v1056_v22 = vadd.f32 %v1031_v20, %v155_v18  ;;  %v1059_v23 = vadd.f32 %v1051_v48, %v3507_v39 }
 0xc53   :  { %3040 = vtanh.f32 %v1056_v22  ;;  %v2879_v63 = vmul.f32 -1.442695, %v1059_v23  ;;  %v2878_v56 = vmul.f32 -1.442695, %v1056_v22 }
 0xc54   :  { %3042 = vtanh.f32 %v1059_v23 }
 0xc55   :  { %3044 = vpow2.f32 %v2879_v63 }
 0xc59   :  { %v3041_v50 = vpop.eup %3040 }
 0xc5a   :  { %v3043_v62 = vpop.eup %3042  ;;  %1082 = vrot.lane.b32.xlu1 %v3041_v50, %s3298_s0 }
 0xc5b   :  { %1119 = vrot.lane.b32.xlu2 %v3043_v62, %s3298_s0  ;;  %v3045_v0 = vpop.eup %3044 }
 0xc5c   :  { %v1100_v2 = vadd.f32 1.0, %v3045_v0 }
 0xc5e   :  { %3046 = vrcp.f32 %v1100_v2  ;;  %v1112_v25 = vand.u32 2147483648, %v1100_v2  ;;  %vm1106_vm0 = vweird.f32 %v1100_v2  ;;  %v1110_v26 = vand.u32 2147483647, %v1100_v2 }
 0xc5f   :  { %3048 = vpow2.f32 %v2878_v56 }
 0xc60   :  { %v1113_v28 = vor.u32 1.1754944e-38, %v1112_v25  ;;  %vm1111_vm2 = vcmp.eq.f32.partialorder %v1110_v26, 8.507059e+37 }
 0xc64   :  { %v3047_v4 = vpop.eup %3046 }
 0xc65   :  { %v1102_v7 = vmul.f32 %v3047_v4, %v1100_v2  ;;  %v3049_v13 = vpop.eup %3048  ;;  %vm1107_vm15 = vweird.f32 %v3047_v4 }
 0xc66   :  { %v1063_v21 = vadd.f32 1.0, %v3049_v13  ;;  %vm1108_vm1 = vmor %vm1106_vm0, %vm1107_vm15 }
 0xc67   :  { %v1103_v8 = vsub.f32 1.0, %v1102_v7 }
 0xc68   :  { %3050 = vrcp.f32 %v1063_v21  ;;  %v1075_v33 = vand.u32 2147483648, %v1063_v21  ;;  %vm1069_vm4 = vweird.f32 %v1063_v21  ;;  %v1073_v54 = vand.u32 2147483647, %v1063_v21 }
 0xc69   :  { %v1104_v39 = vmul.f32 %v3047_v4, %v1103_v8 }
 0xc6a   :  { %v1076_v55 = vor.u32 1.1754944e-38, %v1075_v33  ;;  %vm1074_vm6 = vcmp.eq.f32.partialorder %v1073_v54, 8.507059e+37 }
 0xc6b   :  { %v1105_v24 = vadd.f32 %v3047_v4, %v1104_v39 }
 0xc6d   :  { %v1109_v27 = vsel %vm1108_vm1, %v3047_v4, %v1105_v24 }
 0xc6e   :  { %v1114_v30 = vsel %vm1111_vm2, %v1113_v28, %v1109_v27  ;;  %v3051_v31 = vpop.eup %3050 }
 0xc6f   :  { %v1065_v37 = vmul.f32 %v3051_v31, %v1063_v21  ;;  %vm1070_vm3 = vweird.f32 %v3051_v31  ;;  %v1117_v1 = vmul.f32 %v1114_v30, %v3645_v42 }
 0xc70   :  { %vm1071_vm5 = vmor %vm1069_vm4, %vm1070_vm3 }
 0xc71   :  { %v1066_v51 = vsub.f32 1.0, %v1065_v37 }
 0xc73   :  { %v1067_v44 = vmul.f32 %v3051_v31, %v1066_v51 }
 0xc75   :  { %v1068_v52 = vadd.f32 %v3051_v31, %v1067_v44 }
 0xc77   :  { %v1072_v38 = vsel %vm1071_vm5, %v3051_v31, %v1068_v52 }
 0xc78   :  { %v1077_v60 = vsel %vm1074_vm6, %v1076_v55, %v1072_v38 }
 0xc79   :  { %v1080_v9 = vmul.f32 %v1077_v60, %v3643_v40 }
 0xcb5   :  { %v1120_v29 = vpop.permute.xlu2 %1119 }
 0xcb6   :  { %v1122_v36 = vmul.f32 %v1120_v29, %v1114_v30 }
 0xcb8   :  { %1124 = vrot.lane.b32.xlu1 %v1122_v36, %s3299_s2 }
 0xccc   :  { %v1083_v45 = vpop.permute.xlu1 %1082 }
 0xccd   :  { %v1085_v61 = vmul.f32 %v1083_v45, %v1077_v60 }
 0xccf   :  { %1087 = vrot.lane.b32.xlu0 %v1085_v61, %s3299_s2 }
 0xd2a   :  { %v1125_v3 = vpop.permute.xlu1 %1124 }
 0xd2b   :  { %v3668_v5 = vadd.f32 %v1125_v3, %v1117_v1 }
 0xd2d   :  { %3052 = vtanh.f32 %v3668_v5 }
 0xd33   :  { %v3053_v6 = vpop.eup %3052 }
 0xd34   :  { %1130 = vrot.lane.b32.xlu0 %v3053_v6, %s3298_s0 }
 0xd41   :  { %v1088_v10 = vpop.permute.xlu0 %1087 }
 0xd42   :  { %v3673_v11 = vadd.f32 %v1088_v10, %v1080_v9 }
 0xd44   :  { %3054 = vtanh.f32 %v3673_v11 }
 0xd4a   :  { %v3055_v12 = vpop.eup %3054 }
 0xd4b   :  { %1093 = vrot.lane.b32.xlu2 %v3055_v12, %s3298_s0 }
 0xda5   :  { %v1094_v14 = vpop.permute.xlu2 %1093 }
 0xda6   :  { %v1131_v42 = vpop.permute.xlu0 %1130  ;;  %v1096_v15 = vmul.f32 %v1094_v14, %v1077_v60 }
 0xda7   :  { %v3677_v16 = vmul.f32 %v1131_v42, %v1114_v30 }
 0xda8   :  { %1135 = vrot.lane.b32.xlu1 %v1096_v15, %s3299_s2  ;;  %v1477_v15 = vld [vmem:[#allocation9 + $0x30] sm:$0xff] }
 0xda9   :  { %1146 = vrot.lane.b32.xlu2 %v3677_v16, %s3298_s0  ;;  %1629 = vmatpush.msra.mxu2 %v1477_v15 }
 0xe03   :  { %v1147_v46 = vpop.permute.xlu2 %1146 }
 0xe1a   :  { %v1136_v40 = vpop.permute.xlu1 %1135 }
 0xe1b   :  { %1139 = vst.msk [vmem:[#allocation4 + $0x28] sm:$0xff] %vm363_vm9, %v1136_v40  ;;  %v1149_v17 = vsel %vm363_vm9, %v1136_v40, %v1147_v46  ;;  %v1475_v46 = vld [vmem:[#allocation9 + $0x20] sm:$0xff]  ;;  %v1476_v40 = vld [vmem:[#allocation9 + $0x28] sm:$0xff] }
 0xe1c   :  { %2880 = vmatmul.msk.f32.vlgmr.msra.gmra.mxu0 %vm236_vm10, %v1149_v17  ;;  %2881 = vmatmul.msk.f32.vlgmr.msra.gmra.mxu1 %vm236_vm10, %v1149_v17  ;;  %v1473_v17 = vld [vmem:[#allocation9 + $0x10] sm:$0xff] }
 0xe1d   :  { %1630 = vmatpush.msra.mxu2 %v1475_v46 }
 0xe1f   :  { %1631 = vmatpush.msra.mxu2 %v1473_v17 }
 0xe99   :  { %v1186_v18 = vpop.f32.mrf.mxu0  ;;  %v1206_v20 = vpop.f32.mrf.mxu1 }
 0xe9a   :  { %v1211_v48 = vadd.f32 %v1186_v18, %v158_v43  ;;  %v1214_v22 = vadd.f32 %v1206_v20, %v3502_v34  ;;  %v1474_v43 = vld [vmem:[#allocation9 + $0x18] sm:$0xff]  ;;  %v1471_v18 = vld [vmem:[#allocation9] sm:$0xff]  ;;  %v1472_v20 = vld [vmem:[#allocation9 + $0x8] sm:$0xff] }
 0xe9b   :  { %1632 = vmatpush.msra.mxu2 %v1471_v18 }
 0xe9c   :  { %3056 = vtanh.f32 %v1211_v48  ;;  %v2882_v62 = vmul.f32 -1.442695, %v1211_v48  ;;  %v2883_v63 = vmul.f32 -1.442695, %v1214_v22 }
 0xe9d   :  { %3058 = vtanh.f32 %v1214_v22 }
 0xe9e   :  { %3060 = vpow2.f32 %v2882_v62  ;;  %v1456_v62 = vld [vmem:[#allocation4 + $0x8] sm:$0xff] }
 0xe9f   :  { %3062 = vpow2.f32 %v2883_v63  ;;  %v1457_v63 = vld [vmem:[#allocation4 + $0x10] sm:$0xff] }
 0xea2   :  { %v3057_v23 = vpop.eup %3056 }
 0xea3   :  { %v3059_v50 = vpop.eup %3058  ;;  %1237 = vrot.lane.b32.xlu0 %v3057_v23, %s3298_s0 }
 0xea4   :  { %1274 = vrot.lane.b32.xlu1 %v3059_v50, %s3298_s0  ;;  %v3061_v0 = vpop.eup %3060  ;;  %v1455_v50 = vld [vmem:[#allocation4] sm:$0xff] }
 0xea5   :  { %v3063_v2 = vpop.eup %3062  ;;  %v1218_v57 = vadd.f32 1.0, %v3061_v0  ;;  %v1458_v0 = vld [vmem:[#allocation4 + $0x18] sm:$0xff] }
 0xea6   :  { %v1255_v4 = vadd.f32 1.0, %v3063_v2  ;;  %v1459_v2 = vld [vmem:[#allocation4 + $0x20] sm:$0xff] }
 0xea7   :  { %3064 = vrcp.f32 %v1218_v57  ;;  %v1230_v27 = vand.u32 2147483648, %v1218_v57  ;;  %vm1224_vm11 = vweird.f32 %v1218_v57  ;;  %v1228_v29 = vand.u32 2147483647, %v1218_v57 }
 0xea8   :  { %3066 = vrcp.f32 %v1255_v4  ;;  %v1267_v28 = vand.u32 2147483648, %v1255_v4  ;;  %vm1261_vm12 = vweird.f32 %v1255_v4  ;;  %v1265_v30 = vand.u32 2147483647, %v1255_v4 }
 0xea9   :  { %v1231_v37 = vor.u32 1.1754944e-38, %v1230_v27  ;;  %vm1229_vm15 = vcmp.eq.f32.partialorder %v1228_v29, 8.507059e+37 }
 0xeaa   :  { %v1268_v51 = vor.u32 1.1754944e-38, %v1267_v28  ;;  %vm1266_vm0 = vcmp.eq.f32.partialorder %v1265_v30, 8.507059e+37 }
 0xead   :  { %v3065_v56 = vpop.eup %3064 }
 0xeae   :  { %v3067_v34 = vpop.eup %3066  ;;  %v1220_v7 = vmul.f32 %v3065_v56, %v1218_v57  ;;  %vm1225_vm7 = vweird.f32 %v3065_v56  ;;  %v1460_v57 = vld [vmem:[#allocation4 + $0x28] sm:$0xff] }
 0xeaf   :  { %v1257_v8 = vmul.f32 %v3067_v34, %v1255_v4  ;;  %vm1262_vm8 = vweird.f32 %v3067_v34  ;;  %vm1226_vm13 = vmor %vm1224_vm11, %vm1225_vm7 }
 0xeb0   :  { %v1221_v13 = vsub.f32 1.0, %v1220_v7  ;;  %vm1263_vm14 = vmor %vm1261_vm12, %vm1262_vm8 }
 0xeb1   :  { %v1258_v39 = vsub.f32 1.0, %v1257_v8 }
 0xeb2   :  { %v1222_v21 = vmul.f32 %v3065_v56, %v1221_v13 }
 0xeb3   :  { %v1259_v24 = vmul.f32 %v3067_v34, %v1258_v39 }
 0xeb4   :  { %v1223_v25 = vadd.f32 %v3065_v56, %v1222_v21 }
 0xeb5   :  { %v1260_v26 = vadd.f32 %v3067_v34, %v1259_v24 }
 0xeb6   :  { %v1227_v31 = vsel %vm1226_vm13, %v3065_v56, %v1223_v25  ;;  %v161_v56 = vadd.f32 %v3633_v59, %v3504_v35 }
 0xeb7   :  { %v1264_v36 = vsel %vm1263_vm14, %v3067_v34, %v1260_v26  ;;  %v1232_v52 = vsel %vm1229_vm15, %v1231_v37, %v1227_v31 }
 0xeb8   :  { %v1269_v54 = vsel %vm1266_vm0, %v1268_v51, %v1264_v36  ;;  %v1235_v45 = vmul.f32 %v1232_v52, %v3673_v11 }
 0xeb9   :  { %v1272_v3 = vmul.f32 %v1269_v54, %v3668_v5  ;;  %v1478_v5 = vld [vmem:[#allocation9 + $0x38] sm:$0xff] }
 0xeba   :  { %1670 = vmatpush.msra.mxu3 %v1478_v5 }
 0xebc   :  { %1671 = vmatpush.msra.mxu3 %v1476_v40 }
 0xebe   :  { %1672 = vmatpush.msra.mxu3 %v1474_v43 }
 0xec0   :  { %1673 = vmatpush.msra.mxu3 %v1472_v20 }
 0xf15   :  { %v1238_v44 = vpop.permute.xlu0 %1237 }
 0xf16   :  { %v1275_v33 = vpop.permute.xlu1 %1274  ;;  %v1240_v38 = vmul.f32 %v1238_v44, %v1232_v52 }
 0xf17   :  { %v1277_v55 = vmul.f32 %v1275_v33, %v1269_v54 }
 0xf18   :  { %1242 = vrot.lane.b32.xlu2 %v1240_v38, %s3299_s2 }
 0xf19   :  { %1279 = vrot.lane.b32.xlu0 %v1277_v55, %s3299_s2 }
 0xf72   :  { %v1243_v60 = vpop.permute.xlu2 %1242 }
 0xf73   :  { %v3694_v61 = vadd.f32 %v1243_v60, %v1235_v45 }
 0xf75   :  { %3068 = vtanh.f32 %v3694_v61 }
 0xf7b   :  { %v3069_v1 = vpop.eup %3068 }
 0xf7c   :  { %1248 = vrot.lane.b32.xlu1 %v3069_v1, %s3298_s0 }
 0xf8b   :  { %v1280_v6 = vpop.permute.xlu0 %1279 }
 0xf8c   :  { %v3699_v9 = vadd.f32 %v1280_v6, %v1272_v3 }
 0xf8e   :  { %3070 = vtanh.f32 %v3699_v9 }
 0xf94   :  { %v3071_v10 = vpop.eup %3070 }
 0xf95   :  { %1285 = vrot.lane.b32.xlu2 %v3071_v10, %s3298_s0 }
 0xfee   :  { %v1249_v12 = vpop.permute.xlu1 %1248 }
 0xfef   :  { %v1286_v11 = vpop.permute.xlu2 %1285  ;;  %v1251_v14 = vmul.f32 %v1249_v12, %v1232_v52 }
 0xff0   :  { %v3703_v42 = vmul.f32 %v1286_v11, %v1269_v54 }
 0xff1   :  { %1290 = vrot.lane.b32.xlu0 %v1251_v14, %s3299_s2 }
 0xff2   :  { %1301 = vrot.lane.b32.xlu1 %v3703_v42, %s3298_s0 }
0x1063   :  { %v1291_v48 = vpop.permute.xlu0 %1290 }
0x1064   :  { %1294 = vst.msk [vmem:[#allocation4 + $0x30] sm:$0xff] %vm363_vm9, %v1291_v48  ;;  %v1302_v22 = vpop.permute.xlu1 %1301 }
0x1065   :  { %v1304_v23 = vsel %vm363_vm9, %v1291_v48, %v1302_v22 }
0x1066   :  { %2884 = vmatmul.msk.f32.vlgmr.msrb.gmra.mxu2 %vm236_vm10, %v1304_v23  ;;  %2885 = vmatmul.msk.f32.vlgmr.msrb.gmra.mxu3 %vm236_vm10, %v1304_v23 }
0x106b   :  { %v1461_v4 = vld [vmem:[#allocation4 + $0x30] sm:$0xff] }
0x106e   :  { %2904 = vmatmul.msk.f32.vlgmr.msra.gmra.mxu2 %vm363_vm9, %v1455_v50  ;;  %2912 = vmatmul.msk.f32.vlgmr.msra.gmra.mxu3 %vm363_vm9, %v1455_v50  ;;  %v1485_v50 = vld [vmem:[#allocation9 + $0x70] sm:$0xff] }
0x106f   :  { %1523 = vmatpush.msrb.mxu0 %v1485_v50 }
0x1076   :  { %2905 = vmatmul.msk.f32.gmra.mxu2 %vm363_vm9, %v1456_v62  ;;  %2913 = vmatmul.msk.f32.gmra.mxu3 %vm363_vm9, %v1456_v62  ;;  %v1484_v62 = vld [vmem:[#allocation9 + $0x68] sm:$0xff] }
0x107e   :  { %2906 = vmatmul.msk.f32.gmra.mxu2 %vm363_vm9, %v1457_v63  ;;  %2914 = vmatmul.msk.f32.gmra.mxu3 %vm363_vm9, %v1457_v63  ;;  %v1483_v63 = vld [vmem:[#allocation9 + $0x60] sm:$0xff] }
0x107f   :  { %1524 = vmatpush.msrb.mxu0 %v1483_v63 }
0x1086   :  { %2907 = vmatmul.msk.f32.gmra.mxu2 %vm363_vm9, %v1458_v0  ;;  %2915 = vmatmul.msk.f32.gmra.mxu3 %vm363_vm9, %v1458_v0  ;;  %v1481_v0 = vld [vmem:[#allocation9 + $0x50] sm:$0xff] }
0x1087   :  { %1525 = vmatpush.msrb.mxu0 %v1481_v0 }
0x108e   :  { %2908 = vmatmul.msk.f32.gmra.mxu2 %vm363_vm9, %v1459_v2  ;;  %2916 = vmatmul.msk.f32.gmra.mxu3 %vm363_vm9, %v1459_v2  ;;  %v1480_v2 = vld [vmem:[#allocation9 + $0x48] sm:$0xff] }
0x1096   :  { %2909 = vmatmul.msk.f32.gmra.mxu2 %vm363_vm9, %v1460_v57  ;;  %2917 = vmatmul.msk.f32.gmra.mxu3 %vm363_vm9, %v1460_v57  ;;  %v1479_v57 = vld [vmem:[#allocation9 + $0x40] sm:$0xff] }
0x1097   :  { %1526 = vmatpush.msrb.mxu0 %v1479_v57 }
0x109e   :  { %2910 = vmatmul.msk.f32.gmra.mxu2 %vm363_vm9, %v1461_v4  ;;  %2918 = vmatmul.msk.f32.gmra.mxu3 %vm363_vm9, %v1461_v4  ;;  %v3767_v4 = vld [vmem:[%s4239_s6 + $0x68] sm:$0xff] }
0x10e9   :  { %v1341_v34 = vpop.f32.mrf.mxu2  ;;  %v1361_v7 = vpop.f32.mrf.mxu3 }
0x10ea   :  { %v1366_v8 = vadd.f32 %v1341_v34, %v161_v56  ;;  %v1368_v13 = vadd.f32 %v1361_v7, %v3500_v32  ;;  %v3774_v56 = vld [vmem:[%s4239_s6 + $0x58] sm:$0xff]  ;;  %v3782_v7 = vld [vmem:[%s4239_s6 + $0x70] sm:$0xff] }
0x10eb   :  { %1761 = vmatpush.msra.mxu0 %v3782_v7  ;;  %1892 = vmatpush.msrb.mxu2 %v3782_v7 }
0x10ec   :  { %3072 = vtanh.f32 %v1366_v8  ;;  %v2887_v24 = vmul.f32 -1.442695, %v1368_v13  ;;  %v2886_v35 = vmul.f32 -1.442695, %v1366_v8  ;;  %v3787_v8 = vld [vmem:[%s4239_s6 + $0x48] sm:$0xff] }
0x10ed   :  { %3074 = vtanh.f32 %v1368_v13 }
0x10ee   :  { %3076 = vpow2.f32 %v2887_v24  ;;  %v3804_v24 = vld [vmem:[%s4239_s6 + $0x38] sm:$0xff] }
0x10f2   :  { %v3073_v39 = vpop.eup %3072 }
0x10f3   :  { %v3075_v21 = vpop.eup %3074  ;;  %1391 = vrot.lane.b32.xlu1 %v3073_v39, %s3298_s0 }
0x10f4   :  { %1428 = vrot.lane.b32.xlu2 %v3075_v21, %s3298_s0  ;;  %v3077_v25 = vpop.eup %3076  ;;  %v3799_v21 = vld [vmem:[%s4239_s6 + $0x60] sm:$0xff] }
0x10f5   :  { %v1409_v26 = vadd.f32 1.0, %v3077_v25  ;;  %1762 = vmatpush.msra.mxu0 %v3799_v21  ;;  %1893 = vmatpush.msrb.mxu2 %v3799_v21 }
0x10f7   :  { %3078 = vrcp.f32 %v1409_v26  ;;  %v1421_v36 = vand.u32 2147483648, %v1409_v26  ;;  %vm1415_vm2 = vweird.f32 %v1409_v26  ;;  %v1419_v37 = vand.u32 2147483647, %v1409_v26 }
0x10f8   :  { %3080 = vpow2.f32 %v2886_v35  ;;  %v3821_v35 = vld [vmem:[%s4239_s6 + $0x28] sm:$0xff] }
0x10f9   :  { %v1422_v44 = vor.u32 1.1754944e-38, %v1421_v36  ;;  %vm1420_vm4 = vcmp.eq.f32.partialorder %v1419_v37, 8.507059e+37  ;;  %v3854_v36 = vld [vmem:[%s4239_s6 + $0x8] sm:$0xff]  ;;  %v3859_v37 = vld [vmem:[%s4239_s6 + $0x20] sm:$0xff] }
0x10fd   :  { %v3079_v27 = vpop.eup %3078 }
0x10fe   :  { %v1411_v59 = vmul.f32 %v3079_v27, %v1409_v26  ;;  %v3081_v29 = vpop.eup %3080  ;;  %vm1416_vm1 = vweird.f32 %v3079_v27 }
0x10ff   :  { %v1372_v30 = vadd.f32 1.0, %v3081_v29  ;;  %vm1417_vm3 = vmor %vm1415_vm2, %vm1416_vm1  ;;  %v3833_v29 = vld [vmem:[%s4239_s6 + $0x40] sm:$0xff] }
0x1100   :  { %v1412_v28 = vsub.f32 1.0, %v1411_v59 }
0x1101   :  { %3082 = vrcp.f32 %v1372_v30  ;;  %v1384_v3 = vand.u32 2147483648, %v1372_v30  ;;  %vm1378_vm6 = vweird.f32 %v1372_v30  ;;  %v1382_v6 = vand.u32 2147483647, %v1372_v30 }
0x1102   :  { %v1413_v32 = vmul.f32 %v3079_v27, %v1412_v28 }
0x1103   :  { %v1385_v12 = vor.u32 1.1754944e-38, %v1384_v3  ;;  %vm1383_vm8 = vcmp.eq.f32.partialorder %v1382_v6, 8.507059e+37 }
0x1104   :  { %v1414_v31 = vadd.f32 %v3079_v27, %v1413_v32  ;;  %v3838_v32 = vld [vmem:[%s4239_s6 + $0x18] sm:$0xff] }
0x1106   :  { %v1418_v51 = vsel %vm1417_vm3, %v3079_v27, %v1414_v31  ;;  %v3816_v27 = vld [vmem:[%s4239_s6 + $0x50] sm:$0xff] }
0x1107   :  { %v1423_v33 = vsel %vm1420_vm4, %v1422_v44, %v1418_v51  ;;  %v3083_v54 = vpop.eup %3082  ;;  %1763 = vmatpush.msra.mxu0 %v3816_v27  ;;  %1894 = vmatpush.msrb.mxu2 %v3816_v27  ;;  %v3849_v31 = vld [vmem:[%s4239_s6 + $0x30] sm:$0xff]  ;;  %v3875_v44 = vld [vmem:[%s4239_s6] sm:$0xff] }
0x1108   :  { %v1374_v55 = vmul.f32 %v3083_v54, %v1372_v30  ;;  %vm1379_vm5 = vweird.f32 %v3083_v54  ;;  %v1426_v5 = vmul.f32 %v1423_v33, %v3699_v9  ;;  %v3866_v51 = vld [vmem:[%s4239_s6 + $0x10] sm:$0xff] }
0x1109   :  { %vm1380_vm7 = vmor %vm1378_vm6, %vm1379_vm5  ;;  %1764 = vmatpush.msra.mxu0 %v3833_v29  ;;  %1895 = vmatpush.msrb.mxu2 %v3833_v29 }
0x110a   :  { %v1375_v45 = vsub.f32 1.0, %v1374_v55 }
0x110b   :  { %1765 = vmatpush.msra.mxu0 %v3849_v31  ;;  %1896 = vmatpush.msrb.mxu2 %v3849_v31 }
0x110c   :  { %v1376_v60 = vmul.f32 %v3083_v54, %v1375_v45 }
0x110d   :  { %1766 = vmatpush.msra.mxu0 %v3859_v37  ;;  %1897 = vmatpush.msrb.mxu2 %v3859_v37 }
0x110e   :  { %v1377_v1 = vadd.f32 %v3083_v54, %v1376_v60  ;;  %v1675_v60 = vpop.f32.mrf.mxu3 }
0x110f   :  { %1767 = vmatpush.msra.mxu0 %v3866_v51  ;;  %1898 = vmatpush.msrb.mxu2 %v3866_v51 }
0x1110   :  { %v1381_v10 = vsel %vm1380_vm7, %v3083_v54, %v1377_v1  ;;  %v1699_v1 = vld [vmem:[%s4238_s5] sm:$0x3] }
0x1111   :  { %v1386_v14 = vsel %vm1383_vm8, %v1385_v12, %v1381_v10  ;;  %1768 = vmatpush.msra.mxu0 %v3875_v44  ;;  %1899 = vmatpush.msrb.mxu2 %v3875_v44  ;;  %v1702_v10 = vperm.slane %v1699_v1, 1 }
0x1112   :  { %v1389_v43 = vmul.f32 %v1386_v14, %v3694_v61 }
0x1113   :  { %2154 = vmatpush.msra.mxu2 %v3782_v7 }
0x1115   :  { %2155 = vmatpush.msra.mxu2 %v3799_v21 }
0x1116   :  { %v1678_v6 = vpop.f32.mrf.mxu3 }
0x1117   :  { %2156 = vmatpush.msra.mxu2 %v3816_v27 }
0x1119   :  { %2157 = vmatpush.msra.mxu2 %v3833_v29 }
0x111b   :  { %2158 = vmatpush.msra.mxu2 %v3849_v31 }
0x111d   :  { %2159 = vmatpush.msra.mxu2 %v3859_v37 }
0x111f   :  { %2160 = vmatpush.msra.mxu2 %v3866_v51 }
0x1121   :  { %2161 = vmatpush.msra.mxu2 %v3875_v44 }
0x114e   :  { %v1429_v52 = vpop.permute.xlu2 %1428 }
0x114f   :  { %v1431_v38 = vmul.f32 %v1429_v52, %v1423_v33 }
0x1151   :  { %1433 = vrot.lane.b32.xlu0 %v1431_v38, %s3299_s2 }
0x1165   :  { %v1392_v11 = vpop.permute.xlu1 %1391 }
0x1166   :  { %v1394_v15 = vmul.f32 %v1392_v11, %v1386_v14 }
0x1168   :  { %1396 = vrot.lane.b32.xlu0 %v1394_v15, %s3299_s2 }
0x11c3   :  { %v1434_v46 = vpop.permute.xlu0 %1433 }
0x11c4   :  { %v1436_v40 = vadd.f32 %v1434_v46, %v1426_v5  ;;  %v1681_v46 = vpop.f32.mrf.mxu3 }
0x11c6   :  { %3084 = vtanh.f32 %v1436_v40 }
0x11cc   :  { %v3085_v17 = vpop.eup %3084 }
0x11cd   :  { %1439 = vrot.lane.b32.xlu2 %v3085_v17, %s3298_s0 }
0x11d5   :  { %1296 = vrot.lane.b32.xlu2 %v3703_v42, %s3299_s2 }
0x11da   :  { %v1397_v18 = vpop.permute.xlu0 %1396 }
0x11db   :  { %v1399_v20 = vadd.f32 %v1397_v18, %v1389_v43 }
0x11dd   :  { %3086 = vtanh.f32 %v1399_v20  ;;  %986 = vrot.lane.b32.xlu2 %v3651_v41, %s3299_s2  ;;  %v1701_v20 = vperm.slane %v1699_v1, 0 }
0x11e3   :  { %v3087_v48 = vpop.eup %3086 }
0x11e4   :  { %1402 = vrot.lane.b32.xlu0 %v3087_v48, %s3298_s0 }
0x11e5   :  { %521 = vrot.lane.b32.xlu2 %v3570_v53, %s3299_s2 }
0x11ec   :  { %831 = vrot.lane.b32.xlu0 %v3620_v49, %s3299_s2 }
0x1227   :  { %v1440_v9 = vpop.permute.xlu2 %1439 }
0x1228   :  { %v1442_v22 = vmul.f32 %v1440_v9, %v1423_v33 }
0x122a   :  { %1450 = vrot.lane.b32.xlu1 %v1442_v22, %s3299_s2 }
0x122f   :  { %v1297_v61 = vpop.permute.xlu2 %1296 }
0x1230   :  { %1300 = vst.msk [vmem:[#allocation4 + $0x48] sm:$0xff] %vm363_vm9, %v1297_v61 }
0x1232   :  { %1141 = vrot.lane.b32.xlu1 %v3677_v16, %s3299_s2  ;;  %v1486_v16 = vld [vmem:[#allocation9 + $0x78] sm:$0xff] }
0x1233   :  { %1564 = vmatpush.msrb.mxu1 %v1486_v16 }
0x1235   :  { %1565 = vmatpush.msrb.mxu1 %v1484_v62 }
0x1237   :  { %v987_v41 = vpop.permute.xlu2 %986  ;;  %v1464_v26 = vld [vmem:[#allocation4 + $0x48] sm:$0xff] }
0x1238   :  { %990 = vst.msk [vmem:[#allocation4 + $0x58] sm:$0xff] %vm363_vm9, %v987_v41 }
0x123a   :  { %676 = vrot.lane.b32.xlu1 %v3595_v47, %s3299_s2  ;;  %v1482_v47 = vld [vmem:[#allocation9 + $0x58] sm:$0xff] }
0x123b   :  { %1566 = vmatpush.msrb.mxu1 %v1482_v47 }
0x123d   :  { %1567 = vmatpush.msrb.mxu1 %v1480_v2 }
0x123f   :  { %v522_v53 = vpop.permute.xlu2 %521  ;;  %v1466_v30 = vld [vmem:[#allocation4 + $0x58] sm:$0xff] }
0x1240   :  { %525 = vst.msk [vmem:[#allocation4 + $0x70] sm:$0xff] %vm363_vm9, %v522_v53  ;;  %v1684_v53 = vpop.f32.mrf.mxu3 }
0x1242   :  { %366 = vrot.lane.b32.xlu1 %v3530_v58, %s3299_s2  ;;  %v3760_v58 = vld [vmem:[%s4239_s6 + $0x78] sm:$0xff] }
0x1243   :  { %1781 = vmatpush.msra.mxu1 %v3760_v58  ;;  %1912 = vmatpush.msrb.mxu3 %v3760_v58 }
0x1245   :  { %1782 = vmatpush.msra.mxu1 %v3767_v4  ;;  %1913 = vmatpush.msrb.mxu3 %v3767_v4 }
0x1247   :  { %1783 = vmatpush.msra.mxu1 %v3774_v56  ;;  %1914 = vmatpush.msrb.mxu3 %v3774_v56  ;;  %v1469_v55 = vld [vmem:[#allocation4 + $0x70] sm:$0xff] }
0x1248   :  { %v1687_v2 = vpop.f32.mrf.mxu3 }
0x1249   :  { %1784 = vmatpush.msra.mxu1 %v3787_v8  ;;  %1915 = vmatpush.msrb.mxu3 %v3787_v8 }
0x124b   :  { %1785 = vmatpush.msra.mxu1 %v3804_v24  ;;  %1916 = vmatpush.msrb.mxu3 %v3804_v24 }
0x124d   :  { %1786 = vmatpush.msra.mxu1 %v3821_v35  ;;  %1917 = vmatpush.msrb.mxu3 %v3821_v35 }
0x124f   :  { %1787 = vmatpush.msra.mxu1 %v3838_v32  ;;  %1918 = vmatpush.msrb.mxu3 %v3838_v32 }
0x1251   :  { %1788 = vmatpush.msra.mxu1 %v3854_v36  ;;  %1919 = vmatpush.msrb.mxu3 %v3854_v36 }
0x1253   :  { %2174 = vmatpush.msra.mxu3 %v3760_v58 }
0x1255   :  { %2175 = vmatpush.msra.mxu3 %v3767_v4 }
0x1256   :  { %v1403_v49 = vpop.permute.xlu0 %1402 }
0x1257   :  { %v1405_v42 = vmul.f32 %v1403_v49, %v1386_v14  ;;  %2176 = vmatpush.msra.mxu3 %v3774_v56 }
0x1259   :  { %1444 = vrot.lane.b32.xlu0 %v1405_v42, %s3299_s2  ;;  %2177 = vmatpush.msra.mxu3 %v3787_v8 }
0x125b   :  { %2178 = vmatpush.msra.mxu3 %v3804_v24 }
0x125d   :  { %2179 = vmatpush.msra.mxu3 %v3821_v35 }
0x125e   :  { %v832_v23 = vpop.permute.xlu0 %831 }
0x125f   :  { %835 = vst.msk [vmem:[#allocation4 + $0x60] sm:$0xff] %vm363_vm9, %v832_v23  ;;  %2180 = vmatpush.msra.mxu3 %v3838_v32 }
0x1261   :  { %2181 = vmatpush.msra.mxu3 %v3854_v36 }
0x1266   :  { %v1467_v52 = vld [vmem:[#allocation4 + $0x60] sm:$0xff] }
0x129c   :  { %v1451_v34 = vpop.permute.xlu1 %1450 }
0x129d   :  { %1454 = vst.msk [vmem:[#allocation4 + $0x40] sm:$0xff] %vm363_vm9, %v1451_v34 }
0x12a4   :  { %v1142_v13 = vpop.permute.xlu1 %1141  ;;  %v1463_v39 = vld [vmem:[#allocation4 + $0x40] sm:$0xff] }
0x12a5   :  { %1145 = vst.msk [vmem:[#allocation4 + $0x50] sm:$0xff] %vm363_vm9, %v1142_v13  ;;  %2888 = vmatmul.msk.f32.vlgmr.msrb.gmra.mxu0 %vm363_vm9, %v1463_v39  ;;  %2896 = vmatmul.msk.f32.vlgmr.msrb.gmra.mxu1 %vm363_vm9, %v1463_v39 }
0x12a6   :  { %2043 = vmatpush.msrb.mxu1 %v3760_v58  ;;  %2023 = vmatpush.msrb.mxu0 %v3782_v7 }
0x12a8   :  { %2044 = vmatpush.msrb.mxu1 %v3767_v4  ;;  %2024 = vmatpush.msrb.mxu0 %v3799_v21 }
0x12aa   :  { %2045 = vmatpush.msrb.mxu1 %v3774_v56  ;;  %2025 = vmatpush.msrb.mxu0 %v3816_v27 }
0x12ac   :  { %v677_v25 = vpop.permute.xlu1 %676  ;;  %v1465_v28 = vld [vmem:[#allocation4 + $0x50] sm:$0xff]  ;;  %2046 = vmatpush.msrb.mxu1 %v3787_v8  ;;  %2026 = vmatpush.msrb.mxu0 %v3833_v29 }
0x12ad   :  { %680 = vst.msk [vmem:[#allocation4 + $0x68] sm:$0xff] %vm363_vm9, %v677_v25  ;;  %2889 = vmatmul.msk.f32.gmra.mxu0 %vm363_vm9, %v1464_v26  ;;  %2897 = vmatmul.msk.f32.gmra.mxu1 %vm363_vm9, %v1464_v26 }
0x12ae   :  { %2047 = vmatpush.msrb.mxu1 %v3804_v24  ;;  %2027 = vmatpush.msrb.mxu0 %v3849_v31 }
0x12b0   :  { %2048 = vmatpush.msrb.mxu1 %v3821_v35  ;;  %2028 = vmatpush.msrb.mxu0 %v3859_v37 }
0x12b2   :  { %2049 = vmatpush.msrb.mxu1 %v3838_v32  ;;  %2029 = vmatpush.msrb.mxu0 %v3866_v51 }
0x12b4   :  { %v367_v59 = vpop.permute.xlu1 %366  ;;  %v1468_v54 = vld [vmem:[#allocation4 + $0x68] sm:$0xff]  ;;  %2050 = vmatpush.msrb.mxu1 %v3854_v36  ;;  %2030 = vmatpush.msrb.mxu0 %v3875_v44 }
0x12b5   :  { %370 = vst.msk [vmem:[#allocation4 + $0x78] sm:$0xff] %vm363_vm9, %v367_v59  ;;  %2890 = vmatmul.msk.f32.gmra.mxu0 %vm363_vm9, %v1465_v28  ;;  %2898 = vmatmul.msk.f32.gmra.mxu1 %vm363_vm9, %v1465_v28 }
0x12bc   :  { %v1470_v45 = vld [vmem:[#allocation4 + $0x78] sm:$0xff] }
0x12bd   :  { %2891 = vmatmul.msk.f32.gmra.mxu0 %vm363_vm9, %v1466_v30  ;;  %2899 = vmatmul.msk.f32.gmra.mxu1 %vm363_vm9, %v1466_v30 }
0x12c5   :  { %2892 = vmatmul.msk.f32.gmra.mxu0 %vm363_vm9, %v1467_v52  ;;  %2900 = vmatmul.msk.f32.gmra.mxu1 %vm363_vm9, %v1467_v52  ;;  %v1690_v52 = vpop.f32.mrf.mxu3 }
0x12cb   :  { %v1445_v33 = vpop.permute.xlu0 %1444 }
0x12cc   :  { %1448 = vst.msk [vmem:[#allocation4 + $0x38] sm:$0xff] %vm363_vm9, %v1445_v33 }
0x12cd   :  { %2893 = vmatmul.msk.f32.gmra.mxu0 %vm363_vm9, %v1468_v54  ;;  %2901 = vmatmul.msk.f32.gmra.mxu1 %vm363_vm9, %v1468_v54 }
0x12d3   :  { %v1462_v38 = vld [vmem:[#allocation4 + $0x38] sm:$0xff] }
0x12d4   :  { %2911 = vmatmul.msk.f32.gmra.mxu2 %vm363_vm9, %v1462_v38  ;;  %2919 = vmatmul.msk.f32.gmra.mxu3 %vm363_vm9, %v1462_v38 }
0x12d5   :  { %2894 = vmatmul.msk.f32.gmra.mxu0 %vm363_vm9, %v1469_v55  ;;  %2902 = vmatmul.msk.f32.gmra.mxu1 %vm363_vm9, %v1469_v55 }
0x12dd   :  { %2895 = vmatmul.msk.f32.gmra.mxu0 %vm363_vm9, %v1470_v45  ;;  %2903 = vmatmul.msk.f32.gmra.mxu1 %vm363_vm9, %v1470_v45 }
0x12e5   :  { %1769 = vmatmul.f32.vlgmr.msra.gmra.mxu0 %v3297_v19  ;;  %1789 = vmatmul.f32.vlgmr.msra.gmra.mxu1 %v3297_v19  ;;  %v1634_v19 = vpop.f32.mrf.mxu2 }
0x12e6   :  { %2285 = vmatpush.msra.mxu0 %v3782_v7  ;;  %2305 = vmatpush.msra.mxu1 %v3760_v58 }
0x12e8   :  { %2286 = vmatpush.msra.mxu0 %v3799_v21  ;;  %2306 = vmatpush.msra.mxu1 %v3767_v4 }
0x12ea   :  { %2287 = vmatpush.msra.mxu0 %v3816_v27  ;;  %2307 = vmatpush.msra.mxu1 %v3774_v56 }
0x12ec   :  { %2288 = vmatpush.msra.mxu0 %v3833_v29  ;;  %2308 = vmatpush.msra.mxu1 %v3787_v8 }
0x12ed   :  { %v1637_v3 = vpop.f32.mrf.mxu2 }
0x12ee   :  { %2289 = vmatpush.msra.mxu0 %v3849_v31  ;;  %2309 = vmatpush.msra.mxu1 %v3804_v24 }
0x12f0   :  { %2290 = vmatpush.msra.mxu0 %v3859_v37  ;;  %2310 = vmatpush.msra.mxu1 %v3821_v35 }
0x12f2   :  { %2291 = vmatpush.msra.mxu0 %v3866_v51  ;;  %2311 = vmatpush.msra.mxu1 %v3838_v32 }
0x12f4   :  { %2292 = vmatpush.msra.mxu0 %v3875_v44  ;;  %2312 = vmatpush.msra.mxu1 %v3854_v36 }
0x12f5   :  { %v1640_v5 = vpop.f32.mrf.mxu2 }
0x12fd   :  { %v1643_v41 = vpop.f32.mrf.mxu2 }
0x1305   :  { %v1646_v0 = vpop.f32.mrf.mxu2 }
0x130d   :  { %v1649_v30 = vpop.f32.mrf.mxu2 }
0x1315   :  { %v1652_v1 = vpop.f32.mrf.mxu2 }
0x1322   :  { %v1528_v12 = vpop.f32.mrf.mxu0  ;;  %v1569_v11 = vpop.f32.mrf.mxu1 }
0x1323   :  { %v1676_v14 = vadd.f32 %v1675_v60, %v1569_v11 }
0x1325   :  { %v3945_v15 = vadd.f32 %v1702_v10, %v1676_v14 }
0x132a   :  { %v1531_v40 = vpop.f32.mrf.mxu0  ;;  %v1572_v17 = vpop.f32.mrf.mxu1 }
0x132b   :  { %v1638_v43 = vadd.f32 %v1637_v3, %v1531_v40  ;;  %v1679_v18 = vadd.f32 %v1678_v6, %v1572_v17  ;;  %v1693_v3 = vpop.f32.mrf.mxu3 }
0x132d   :  { %v3947_v48 = vadd.f32 %v1701_v20, %v1638_v43  ;;  %v3949_v9 = vadd.f32 %v1702_v10, %v1679_v18 }
0x1332   :  { %v1534_v22 = vpop.f32.mrf.mxu0  ;;  %v1575_v61 = vpop.f32.mrf.mxu1 }
0x1333   :  { %v1641_v49 = vadd.f32 %v1640_v5, %v1534_v22  ;;  %v1682_v42 = vadd.f32 %v1681_v46, %v1575_v61 }
0x1335   :  { %v3951_v23 = vadd.f32 %v1701_v20, %v1641_v49  ;;  %v3953_v16 = vadd.f32 %v1702_v10, %v1682_v42 }
0x133a   :  { %v1537_v50 = vpop.f32.mrf.mxu0  ;;  %v1578_v62 = vpop.f32.mrf.mxu1 }
0x133b   :  { %v1644_v63 = vadd.f32 %v1643_v41, %v1537_v50  ;;  %v1685_v47 = vadd.f32 %v1684_v53, %v1578_v62  ;;  %v1635_v41 = vadd.f32 %v1634_v19, %v1528_v12 }
0x133d   :  { %v3955_v57 = vadd.f32 %v1701_v20, %v1644_v63  ;;  %v3957_v34 = vadd.f32 %v1702_v10, %v1685_v47  ;;  %v1705_v42 = vadd.f32 %v1701_v20, %v1635_v41 }
0x1342   :  { %v1540_v13 = vpop.f32.mrf.mxu0  ;;  %v1581_v39 = vpop.f32.mrf.mxu1 }
0x1343   :  { %v1647_v25 = vadd.f32 %v1646_v0, %v1540_v13  ;;  %v1688_v26 = vadd.f32 %v1687_v2, %v1581_v39 }
0x1345   :  { %v3959_v59 = vadd.f32 %v1702_v10, %v1688_v26  ;;  %v3961_v28 = vadd.f32 %v1701_v20, %v1647_v25 }
0x134a   :  { %v1543_v33 = vpop.f32.mrf.mxu0  ;;  %v1584_v54 = vpop.f32.mrf.mxu1 }
0x134b   :  { %v1650_v38 = vadd.f32 %v1649_v30, %v1543_v33  ;;  %v1691_v55 = vadd.f32 %v1690_v52, %v1584_v54 }
0x134d   :  { %v3963_v45 = vadd.f32 %v1702_v10, %v1691_v55  ;;  %v3965_v60 = vadd.f32 %v1701_v20, %v1650_v38 }
0x1352   :  { %v1546_v6 = vpop.f32.mrf.mxu0  ;;  %v1587_v11 = vpop.f32.mrf.mxu1 }
0x1353   :  { %v1653_v14 = vadd.f32 %v1652_v1, %v1546_v6  ;;  %v1694_v5 = vadd.f32 %v1693_v3, %v1587_v11 }
0x1355   :  { %v3967_v46 = vadd.f32 %v1702_v10, %v1694_v5  ;;  %v3969_v40 = vadd.f32 %v1701_v20, %v1653_v14 }
0x1357   :  { %v1655_v17 = vpop.f32.mrf.mxu2  ;;  %v1696_v61 = vpop.f32.mrf.mxu3 }
0x135a   :  { %v1549_v43 = vpop.f32.mrf.mxu0  ;;  %v1590_v18 = vpop.f32.mrf.mxu1 }
0x135b   :  { %v1656_v22 = vadd.f32 %v1655_v17, %v1549_v43  ;;  %v1697_v53 = vadd.f32 %v1696_v61, %v1590_v18 }
0x135d   :  { %v3971_v49 = vadd.f32 %v1701_v20, %v1656_v22  ;;  %v1720_v50 = vadd.f32 %v1702_v10, %v1697_v53 }
0x1362   :  { %v1770_v62 = vpop.f32.mrf.mxu0  ;;  %v1790_v63 = vpop.f32.mrf.mxu1 }
0x1363   :  { %v1794_v47 = vadd.f32 %v1770_v62, %v1705_v42  ;;  %v1796_v0 = vadd.f32 %v1790_v63, %v1720_v50 }
0x1365   :  { %3088 = vtanh.f32 %v1794_v47  ;;  %v2920_v39 = vmul.f32 -1.442695, %v1794_v47  ;;  %v2921_v20 = vmul.f32 -1.442695, %v1796_v0 }
0x1366   :  { %3090 = vtanh.f32 %v1796_v0 }
0x1367   :  { %3092 = vpow2.f32 %v2920_v39 }
0x136b   :  { %v3089_v2 = vpop.eup %3088 }
0x136c   :  { %v3091_v13 = vpop.eup %3090  ;;  %1819 = vrot.lane.b32.xlu2 %v3089_v2, %s3298_s0 }
0x136d   :  { %1856 = vrot.lane.b32.xlu0 %v3091_v13, %s3298_s0  ;;  %v3093_v19 = vpop.eup %3092 }
0x136e   :  { %v1800_v12 = vadd.f32 1.0, %v3093_v19 }
0x1370   :  { %3094 = vrcp.f32 %v1800_v12  ;;  %v1812_v38 = vand.u32 2147483648, %v1800_v12  ;;  %vm1806_vm12 = vweird.f32 %v1800_v12  ;;  %v1810_v55 = vand.u32 2147483647, %v1800_v12 }
0x1371   :  { %3096 = vpow2.f32 %v2921_v20 }
0x1372   :  { %v1813_v3 = vor.u32 1.1754944e-38, %v1812_v38  ;;  %vm1811_vm14 = vcmp.eq.f32.partialorder %v1810_v55, 8.507059e+37 }
0x1376   :  { %v3095_v25 = vpop.eup %3094 }
0x1377   :  { %v1802_v10 = vmul.f32 %v3095_v25, %v1800_v12  ;;  %v3097_v52 = vpop.eup %3096  ;;  %vm1807_vm11 = vweird.f32 %v3095_v25 }
0x1378   :  { %v1837_v33 = vadd.f32 1.0, %v3097_v52  ;;  %vm1808_vm13 = vmor %vm1806_vm12, %vm1807_vm11 }
0x1379   :  { %v1803_v26 = vsub.f32 1.0, %v1802_v10 }
0x137a   :  { %3098 = vrcp.f32 %v1837_v33  ;;  %v1849_v61 = vand.u32 2147483648, %v1837_v33  ;;  %vm1843_vm0 = vweird.f32 %v1837_v33  ;;  %v1847_v41 = vand.u32 2147483647, %v1837_v33 }
0x137b   :  { %v1804_v30 = vmul.f32 %v3095_v25, %v1803_v26 }
0x137c   :  { %v1850_v42 = vor.u32 1.1754944e-38, %v1849_v61  ;;  %vm1848_vm2 = vcmp.eq.f32.partialorder %v1847_v41, 8.507059e+37 }
0x137d   :  { %v1805_v54 = vadd.f32 %v3095_v25, %v1804_v30 }
0x137f   :  { %v1809_v1 = vsel %vm1808_vm13, %v3095_v25, %v1805_v54 }
0x1380   :  { %v1814_v11 = vsel %vm1811_vm14, %v1813_v3, %v1809_v1  ;;  %v3099_v5 = vpop.eup %3098 }
0x1381   :  { %v1839_v17 = vmul.f32 %v3099_v5, %v1837_v33  ;;  %vm1844_vm15 = vweird.f32 %v3099_v5  ;;  %v1817_v47 = vmul.f32 0.0, %v1814_v11 }
0x1382   :  { %vm1845_vm1 = vmor %vm1843_vm0, %vm1844_vm15 }
0x1383   :  { %v1840_v43 = vsub.f32 1.0, %v1839_v17 }
0x1385   :  { %v1841_v18 = vmul.f32 %v3099_v5, %v1840_v43 }
0x1387   :  { %v1842_v22 = vadd.f32 %v3099_v5, %v1841_v18 }
0x1389   :  { %v1846_v53 = vsel %vm1845_vm1, %v3099_v5, %v1842_v22 }
0x138a   :  { %v1851_v62 = vsel %vm1848_vm2, %v1850_v42, %v1846_v53 }
0x138b   :  { %v1854_v2 = vmul.f32 0.0, %v1851_v62 }
0x13c6   :  { %v1820_v6 = vpop.permute.xlu2 %1819 }
0x13c7   :  { %v1822_v14 = vmul.f32 %v1820_v6, %v1814_v11 }
0x13c9   :  { %1824 = vrot.lane.b32.xlu1 %v1822_v14, %s3299_s2 }
0x13df   :  { %v1857_v50 = vpop.permute.xlu0 %1856 }
0x13e0   :  { %v1859_v63 = vmul.f32 %v1857_v50, %v1851_v62 }
0x13e2   :  { %1861 = vrot.lane.b32.xlu2 %v1859_v63, %s3299_s2 }
0x143b   :  { %v1825_v0 = vpop.permute.xlu1 %1824 }
0x143c   :  { %v3977_v13 = vadd.f32 %v1825_v0, %v1817_v47  ;;  %v1862_v39 = vpop.permute.xlu2 %1861 }
0x143d   :  { %v3979_v19 = vadd.f32 %v1862_v39, %v1854_v2 }
0x143e   :  { %3100 = vtanh.f32 %v3977_v13 }
0x143f   :  { %3102 = vtanh.f32 %v3979_v19 }
0x1444   :  { %v3101_v12 = vpop.eup %3100 }
0x1445   :  { %v3103_v25 = vpop.eup %3102  ;;  %1830 = vrot.lane.b32.xlu0 %v3101_v12, %s3298_s0 }
0x1446   :  { %1867 = vrot.lane.b32.xlu1 %v3103_v25, %s3298_s0 }
0x14b7   :  { %v1831_v20 = vpop.permute.xlu0 %1830 }
0x14b8   :  { %v1833_v10 = vmul.f32 %v1831_v20, %v1814_v11  ;;  %v1868_v26 = vpop.permute.xlu1 %1867 }
0x14b9   :  { %v1870_v30 = vmul.f32 %v1868_v26, %v1851_v62 }
0x14ba   :  { %1872 = vrot.lane.b32.xlu2 %v1833_v10, %s3299_s2 }
0x14bb   :  { %1876 = vrot.lane.b32.xlu0 %v1870_v30, %s3298_s0 }
0x1514   :  { %v1873_v52 = vpop.permute.xlu2 %1872 }
0x152d   :  { %v1877_v33 = vpop.permute.xlu0 %1876 }
0x152e   :  { %v3988_v54 = vsel %vm363_vm9, %v1873_v52, %v1877_v33 }
0x152f   :  { %2922 = vmatmul.msk.f32.vlgmr.msrb.gmra.mxu2 %vm236_vm10, %v3988_v54  ;;  %2923 = vmatmul.msk.f32.vlgmr.msrb.gmra.mxu3 %vm236_vm10, %v3988_v54 }
0x1530   :  { %2416 = vmatpush.msrb.mxu2 %v3782_v7  ;;  %2436 = vmatpush.msrb.mxu3 %v3760_v58 }
0x1532   :  { %2417 = vmatpush.msrb.mxu2 %v3799_v21  ;;  %2437 = vmatpush.msrb.mxu3 %v3767_v4 }
0x1534   :  { %2418 = vmatpush.msrb.mxu2 %v3816_v27  ;;  %2438 = vmatpush.msrb.mxu3 %v3774_v56 }
0x1536   :  { %2419 = vmatpush.msrb.mxu2 %v3833_v29  ;;  %2439 = vmatpush.msrb.mxu3 %v3787_v8 }
0x1538   :  { %2420 = vmatpush.msrb.mxu2 %v3849_v31  ;;  %2440 = vmatpush.msrb.mxu3 %v3804_v24 }
0x153a   :  { %2421 = vmatpush.msrb.mxu2 %v3859_v37  ;;  %2441 = vmatpush.msrb.mxu3 %v3821_v35 }
0x153c   :  { %2422 = vmatpush.msrb.mxu2 %v3866_v51  ;;  %2442 = vmatpush.msrb.mxu3 %v3838_v32 }
0x153e   :  { %2423 = vmatpush.msrb.mxu2 %v3875_v44  ;;  %2443 = vmatpush.msrb.mxu3 %v3854_v36 }
0x15b2   :  { %v1901_v38 = vpop.f32.mrf.mxu2  ;;  %v1921_v55 = vpop.f32.mrf.mxu3 }
0x15b3   :  { %v1925_v1 = vadd.f32 %v1901_v38, %v3947_v48  ;;  %v1927_v3 = vadd.f32 %v1921_v55, %v3967_v46 }
0x15b5   :  { %3104 = vtanh.f32 %v1925_v1  ;;  %v2925_v14 = vmul.f32 -1.442695, %v1927_v3  ;;  %v2924_v18 = vmul.f32 -1.442695, %v1925_v1 }
0x15b6   :  { %3106 = vtanh.f32 %v1927_v3 }
0x15b7   :  { %3108 = vpow2.f32 %v2925_v14 }
0x15bb   :  { %v3105_v6 = vpop.eup %3104 }
0x15bc   :  { %v3107_v11 = vpop.eup %3106  ;;  %1950 = vrot.lane.b32.xlu1 %v3105_v6, %s3298_s0 }
0x15bd   :  { %1987 = vrot.lane.b32.xlu2 %v3107_v11, %s3298_s0  ;;  %v3109_v5 = vpop.eup %3108 }
0x15be   :  { %v1968_v17 = vadd.f32 1.0, %v3109_v5 }
0x15c0   :  { %3110 = vrcp.f32 %v1968_v17  ;;  %v1980_v42 = vand.u32 2147483648, %v1968_v17  ;;  %vm1974_vm4 = vweird.f32 %v1968_v17  ;;  %v1978_v50 = vand.u32 2147483647, %v1968_v17 }
0x15c1   :  { %3112 = vpow2.f32 %v2924_v18 }
0x15c2   :  { %v1981_v63 = vor.u32 1.1754944e-38, %v1980_v42  ;;  %vm1979_vm6 = vcmp.eq.f32.partialorder %v1978_v50, 8.507059e+37 }
0x15c6   :  { %v3111_v43 = vpop.eup %3110 }
0x15c7   :  { %v1970_v22 = vmul.f32 %v3111_v43, %v1968_v17  ;;  %v3113_v61 = vpop.eup %3112  ;;  %vm1975_vm3 = vweird.f32 %v3111_v43 }
0x15c8   :  { %v1931_v41 = vadd.f32 1.0, %v3113_v61  ;;  %vm1976_vm5 = vmor %vm1974_vm4, %vm1975_vm3 }
0x15c9   :  { %v1971_v48 = vsub.f32 1.0, %v1970_v22 }
0x15ca   :  { %3114 = vrcp.f32 %v1931_v41  ;;  %v1943_v26 = vand.u32 2147483648, %v1931_v41  ;;  %vm1937_vm8 = vweird.f32 %v1931_v41  ;;  %v1941_v30 = vand.u32 2147483647, %v1931_v41 }
0x15cb   :  { %v1972_v46 = vmul.f32 %v3111_v43, %v1971_v48 }
0x15cc   :  { %v1944_v33 = vor.u32 1.1754944e-38, %v1943_v26  ;;  %vm1942_vm12 = vcmp.eq.f32.partialorder %v1941_v30, 8.507059e+37 }
0x15cd   :  { %v1973_v53 = vadd.f32 %v3111_v43, %v1972_v46 }
0x15cf   :  { %v1977_v62 = vsel %vm1976_vm5, %v3111_v43, %v1973_v53 }
0x15d0   :  { %v1982_v0 = vsel %vm1979_vm6, %v1981_v63, %v1977_v62  ;;  %v3115_v2 = vpop.eup %3114 }
0x15d1   :  { %v1933_v12 = vmul.f32 %v3115_v2, %v1931_v41  ;;  %vm1938_vm7 = vweird.f32 %v3115_v2  ;;  %v1985_v3 = vmul.f32 %v1982_v0, %v3979_v19 }
0x15d2   :  { %vm1939_vm11 = vmor %vm1937_vm8, %vm1938_vm7 }
0x15d3   :  { %v1934_v25 = vsub.f32 1.0, %v1933_v12 }
0x15d5   :  { %v1935_v20 = vmul.f32 %v3115_v2, %v1934_v25 }
0x15d7   :  { %v1936_v10 = vadd.f32 %v3115_v2, %v1935_v20 }
0x15d9   :  { %v1940_v52 = vsel %vm1939_vm11, %v3115_v2, %v1936_v10 }
0x15da   :  { %v1945_v55 = vsel %vm1942_vm12, %v1944_v33, %v1940_v52 }
0x15db   :  { %v1948_v5 = vmul.f32 %v1945_v55, %v3977_v13 }
0x1617   :  { %v1988_v47 = vpop.permute.xlu2 %1987 }
0x1618   :  { %v1990_v39 = vmul.f32 %v1988_v47, %v1982_v0 }
0x161a   :  { %1992 = vrot.lane.b32.xlu1 %v1990_v39, %s3299_s2 }
0x162e   :  { %v1951_v38 = vpop.permute.xlu1 %1950 }
0x162f   :  { %v1953_v1 = vmul.f32 %v1951_v38, %v1945_v55 }
0x1631   :  { %1955 = vrot.lane.b32.xlu0 %v1953_v1, %s3299_s2 }
0x168c   :  { %v1993_v6 = vpop.permute.xlu1 %1992 }
0x168d   :  { %v4017_v11 = vadd.f32 %v1993_v6, %v1985_v3 }
0x168f   :  { %3116 = vtanh.f32 %v4017_v11 }
0x1695   :  { %v3117_v14 = vpop.eup %3116 }
0x1696   :  { %1998 = vrot.lane.b32.xlu0 %v3117_v14, %s3298_s0 }
0x16a3   :  { %v1956_v17 = vpop.permute.xlu0 %1955 }
0x16a4   :  { %v4022_v43 = vadd.f32 %v1956_v17, %v1948_v5 }
0x16a6   :  { %3118 = vtanh.f32 %v4022_v43 }
0x16ac   :  { %v3119_v18 = vpop.eup %3118 }
0x16ad   :  { %1961 = vrot.lane.b32.xlu2 %v3119_v18, %s3298_s0 }
0x1707   :  { %v1962_v22 = vpop.permute.xlu2 %1961 }
0x1708   :  { %v1999_v19 = vpop.permute.xlu0 %1998  ;;  %v1964_v48 = vmul.f32 %v1962_v22, %v1945_v55 }
0x1709   :  { %v2001_v61 = vmul.f32 %v1999_v19, %v1982_v0 }
0x170a   :  { %2003 = vrot.lane.b32.xlu1 %v1964_v48, %s3299_s2 }
0x170b   :  { %2007 = vrot.lane.b32.xlu2 %v2001_v61, %s3298_s0 }
0x1765   :  { %v2008_v46 = vpop.permute.xlu2 %2007 }
0x177c   :  { %v2004_v41 = vpop.permute.xlu1 %2003 }
0x177d   :  { %v4029_v13 = vsel %vm363_vm9, %v2004_v41, %v2008_v46 }
0x177e   :  { %2926 = vmatmul.msk.f32.vlgmr.msrb.gmra.mxu0 %vm236_vm10, %v4029_v13  ;;  %2927 = vmatmul.msk.f32.vlgmr.msrb.gmra.mxu1 %vm236_vm10, %v4029_v13 }
0x177f   :  { %2547 = vmatpush.msrb.mxu0 %v3782_v7  ;;  %2567 = vmatpush.msrb.mxu1 %v3760_v58 }
0x1781   :  { %2548 = vmatpush.msrb.mxu0 %v3799_v21  ;;  %2568 = vmatpush.msrb.mxu1 %v3767_v4 }
0x1783   :  { %2549 = vmatpush.msrb.mxu0 %v3816_v27  ;;  %2569 = vmatpush.msrb.mxu1 %v3774_v56 }
0x1785   :  { %2550 = vmatpush.msrb.mxu0 %v3833_v29  ;;  %2570 = vmatpush.msrb.mxu1 %v3787_v8 }
0x1787   :  { %2551 = vmatpush.msrb.mxu0 %v3849_v31  ;;  %2571 = vmatpush.msrb.mxu1 %v3804_v24 }
0x1789   :  { %2552 = vmatpush.msrb.mxu0 %v3859_v37  ;;  %2572 = vmatpush.msrb.mxu1 %v3821_v35 }
0x178b   :  { %2553 = vmatpush.msrb.mxu0 %v3866_v51  ;;  %2573 = vmatpush.msrb.mxu1 %v3838_v32 }
0x178d   :  { %2554 = vmatpush.msrb.mxu0 %v3875_v44  ;;  %2574 = vmatpush.msrb.mxu1 %v3854_v36 }
0x17fb   :  { %v2032_v53 = vpop.f32.mrf.mxu0  ;;  %v2052_v42 = vpop.f32.mrf.mxu1 }
0x17fc   :  { %v2056_v50 = vadd.f32 %v2032_v53, %v3951_v23  ;;  %v2058_v62 = vadd.f32 %v2052_v42, %v3963_v45 }
0x17fe   :  { %3120 = vtanh.f32 %v2056_v50  ;;  %v2928_v0 = vmul.f32 -1.442695, %v2056_v50  ;;  %v2929_v2 = vmul.f32 -1.442695, %v2058_v62 }
0x17ff   :  { %3122 = vtanh.f32 %v2058_v62 }
0x1800   :  { %3124 = vpow2.f32 %v2928_v0 }
0x1801   :  { %3126 = vpow2.f32 %v2929_v2 }
0x1804   :  { %v3121_v63 = vpop.eup %3120 }
0x1805   :  { %v3123_v47 = vpop.eup %3122  ;;  %2081 = vrot.lane.b32.xlu0 %v3121_v63, %s3298_s0 }
0x1806   :  { %2118 = vrot.lane.b32.xlu1 %v3123_v47, %s3298_s0  ;;  %v3125_v39 = vpop.eup %3124 }
0x1807   :  { %v3127_v12 = vpop.eup %3126  ;;  %v2062_v25 = vadd.f32 1.0, %v3125_v39 }
0x1808   :  { %v2099_v20 = vadd.f32 1.0, %v3127_v12 }
0x1809   :  { %3128 = vrcp.f32 %v2062_v25  ;;  %v2074_v3 = vand.u32 2147483648, %v2062_v25  ;;  %vm2068_vm15 = vweird.f32 %v2062_v25  ;;  %v2072_v14 = vand.u32 2147483647, %v2062_v25 }
0x180a   :  { %3130 = vrcp.f32 %v2099_v20  ;;  %v2111_v6 = vand.u32 2147483648, %v2099_v20  ;;  %vm2105_vm0 = vweird.f32 %v2099_v20  ;;  %v2109_v5 = vand.u32 2147483647, %v2099_v20 }
0x180b   :  { %v2075_v22 = vor.u32 1.1754944e-38, %v2074_v3  ;;  %vm2073_vm3 = vcmp.eq.f32.partialorder %v2072_v14, 8.507059e+37 }
0x180c   :  { %v2112_v19 = vor.u32 1.1754944e-38, %v2111_v6  ;;  %vm2110_vm4 = vcmp.eq.f32.partialorder %v2109_v5, 8.507059e+37 }
0x180f   :  { %v3129_v23 = vpop.eup %3128 }
0x1810   :  { %v3131_v45 = vpop.eup %3130  ;;  %v2064_v10 = vmul.f32 %v3129_v23, %v2062_v25  ;;  %vm2069_vm13 = vweird.f32 %v3129_v23 }
0x1811   :  { %v2101_v26 = vmul.f32 %v3131_v45, %v2099_v20  ;;  %vm2106_vm14 = vweird.f32 %v3131_v45  ;;  %vm2070_vm1 = vmor %vm2068_vm15, %vm2069_vm13 }
0x1812   :  { %v2065_v30 = vsub.f32 1.0, %v2064_v10  ;;  %vm2107_vm2 = vmor %vm2105_vm0, %vm2106_vm14 }
0x1813   :  { %v2102_v52 = vsub.f32 1.0, %v2101_v26 }
0x1814   :  { %v2066_v33 = vmul.f32 %v3129_v23, %v2065_v30 }
0x1815   :  { %v2103_v38 = vmul.f32 %v3131_v45, %v2102_v52 }
0x1816   :  { %v2067_v55 = vadd.f32 %v3129_v23, %v2066_v33 }
0x1817   :  { %v2104_v1 = vadd.f32 %v3131_v45, %v2103_v38 }
0x1818   :  { %v2071_v17 = vsel %vm2070_vm1, %v3129_v23, %v2067_v55 }
0x1819   :  { %v2108_v18 = vsel %vm2107_vm2, %v3131_v45, %v2104_v1  ;;  %v2076_v61 = vsel %vm2073_vm3, %v2075_v22, %v2071_v17 }
0x181a   :  { %v2113_v41 = vsel %vm2110_vm4, %v2112_v19, %v2108_v18  ;;  %v2079_v50 = vmul.f32 %v2076_v61, %v4022_v43 }
0x181b   :  { %v2116_v0 = vmul.f32 %v2113_v41, %v4017_v11  ;;  %v2011_v11 = vadd.f32 %v4029_v13, %v3988_v54 }
0x1877   :  { %v2082_v48 = vpop.permute.xlu0 %2081 }
0x1878   :  { %v2119_v46 = vpop.permute.xlu1 %2118  ;;  %v2084_v53 = vmul.f32 %v2082_v48, %v2076_v61 }
0x1879   :  { %v2121_v42 = vmul.f32 %v2119_v46, %v2113_v41 }
0x187a   :  { %2086 = vrot.lane.b32.xlu2 %v2084_v53, %s3299_s2 }
0x187b   :  { %2123 = vrot.lane.b32.xlu0 %v2121_v42, %s3299_s2 }
0x18d4   :  { %v2087_v62 = vpop.permute.xlu2 %2086 }
0x18d5   :  { %v4058_v63 = vadd.f32 %v2087_v62, %v2079_v50 }
0x18d7   :  { %3132 = vtanh.f32 %v4058_v63 }
0x18dd   :  { %v3133_v47 = vpop.eup %3132 }
0x18de   :  { %2092 = vrot.lane.b32.xlu1 %v3133_v47, %s3298_s0 }
0x18ed   :  { %v2124_v2 = vpop.permute.xlu0 %2123 }
0x18ee   :  { %v4063_v39 = vadd.f32 %v2124_v2, %v2116_v0 }
0x18f0   :  { %3134 = vtanh.f32 %v4063_v39 }
0x18f6   :  { %v3135_v12 = vpop.eup %3134 }
0x18f7   :  { %2129 = vrot.lane.b32.xlu2 %v3135_v12, %s3298_s0 }
0x1950   :  { %v2093_v25 = vpop.permute.xlu1 %2092 }
0x1951   :  { %v2130_v43 = vpop.permute.xlu2 %2129  ;;  %v2095_v20 = vmul.f32 %v2093_v25, %v2076_v61 }
0x1952   :  { %v2132_v23 = vmul.f32 %v2130_v43, %v2113_v41 }
0x1953   :  { %2134 = vrot.lane.b32.xlu0 %v2095_v20, %s3299_s2 }
0x1954   :  { %2138 = vrot.lane.b32.xlu1 %v2132_v23, %s3298_s0 }
0x19c5   :  { %v2135_v45 = vpop.permute.xlu0 %2134 }
0x19c6   :  { %v2139_v10 = vpop.permute.xlu1 %2138 }
0x19c7   :  { %v2141_v26 = vsel %vm363_vm9, %v2135_v45, %v2139_v10 }
0x19c8   :  { %v4072_v30 = vadd.f32 %v2141_v26, %v2011_v11  ;;  %2930 = vmatmul.msk.f32.vlgmr.msra.gmra.mxu2 %vm236_vm10, %v2141_v26  ;;  %2931 = vmatmul.msk.f32.vlgmr.msra.gmra.mxu3 %vm236_vm10, %v2141_v26 }
0x19c9   :  { %2678 = vmatpush.msra.mxu2 %v3782_v7  ;;  %2698 = vmatpush.msra.mxu3 %v3760_v58 }
0x19cb   :  { %2679 = vmatpush.msra.mxu2 %v3799_v21  ;;  %2699 = vmatpush.msra.mxu3 %v3767_v4 }
0x19cd   :  { %2680 = vmatpush.msra.mxu2 %v3816_v27  ;;  %2700 = vmatpush.msra.mxu3 %v3774_v56 }
0x19cf   :  { %2681 = vmatpush.msra.mxu2 %v3833_v29  ;;  %2701 = vmatpush.msra.mxu3 %v3787_v8 }
0x19d1   :  { %2682 = vmatpush.msra.mxu2 %v3849_v31  ;;  %2702 = vmatpush.msra.mxu3 %v3804_v24 }
0x19d3   :  { %2683 = vmatpush.msra.mxu2 %v3859_v37  ;;  %2703 = vmatpush.msra.mxu3 %v3821_v35 }
0x19d5   :  { %2684 = vmatpush.msra.mxu2 %v3866_v51  ;;  %2704 = vmatpush.msra.mxu3 %v3838_v32 }
0x19d7   :  { %2685 = vmatpush.msra.mxu2 %v3875_v44  ;;  %2705 = vmatpush.msra.mxu3 %v3854_v36 }
0x1a4b   :  { %v2163_v58 = vpop.f32.mrf.mxu2  ;;  %v2183_v4 = vpop.f32.mrf.mxu3 }
0x1a4c   :  { %v2187_v56 = vadd.f32 %v2163_v58, %v3955_v57  ;;  %v2189_v7 = vadd.f32 %v2183_v4, %v3959_v59 }
0x1a4e   :  { %3136 = vtanh.f32 %v2187_v56  ;;  %v2932_v24 = vmul.f32 -1.442695, %v2187_v56  ;;  %v2933_v32 = vmul.f32 -1.442695, %v2189_v7 }
0x1a4f   :  { %3138 = vtanh.f32 %v2189_v7 }
0x1a50   :  { %3140 = vpow2.f32 %v2932_v24 }
0x1a54   :  { %v3137_v8 = vpop.eup %3136 }
0x1a55   :  { %v3139_v21 = vpop.eup %3138  ;;  %2212 = vrot.lane.b32.xlu2 %v3137_v8, %s3298_s0 }
0x1a56   :  { %2249 = vrot.lane.b32.xlu0 %v3139_v21, %s3298_s0  ;;  %v3141_v27 = vpop.eup %3140 }
0x1a57   :  { %v2193_v35 = vadd.f32 1.0, %v3141_v27 }
0x1a59   :  { %3142 = vrcp.f32 %v2193_v35  ;;  %v2205_v59 = vand.u32 2147483648, %v2193_v35  ;;  %vm2199_vm6 = vweird.f32 %v2193_v35  ;;  %v2203_v54 = vand.u32 2147483647, %v2193_v35 }
0x1a5a   :  { %3144 = vpow2.f32 %v2933_v32 }
0x1a5b   :  { %v2206_v52 = vor.u32 1.1754944e-38, %v2205_v59  ;;  %vm2204_vm8 = vcmp.eq.f32.partialorder %v2203_v54, 8.507059e+37 }
0x1a5f   :  { %v3143_v29 = vpop.eup %3142 }
0x1a60   :  { %v2195_v31 = vmul.f32 %v3143_v29, %v2193_v35  ;;  %v3145_v51 = vpop.eup %3144  ;;  %vm2200_vm5 = vweird.f32 %v3143_v29 }
0x1a61   :  { %v2230_v44 = vadd.f32 1.0, %v3145_v51  ;;  %vm2201_vm7 = vmor %vm2199_vm6, %vm2200_vm5 }
0x1a62   :  { %v2196_v36 = vsub.f32 1.0, %v2195_v31 }
0x1a63   :  { %3146 = vrcp.f32 %v2230_v44  ;;  %v2242_v17 = vand.u32 2147483648, %v2230_v44  ;;  %vm2236_vm12 = vweird.f32 %v2230_v44  ;;  %v2240_v18 = vand.u32 2147483647, %v2230_v44 }
0x1a64   :  { %v2197_v37 = vmul.f32 %v3143_v29, %v2196_v36 }
0x1a65   :  { %v2243_v19 = vor.u32 1.1754944e-38, %v2242_v17  ;;  %vm2241_vm14 = vcmp.eq.f32.partialorder %v2240_v18, 8.507059e+37 }
0x1a66   :  { %v2198_v57 = vadd.f32 %v3143_v29, %v2197_v37 }
0x1a68   :  { %v2202_v13 = vsel %vm2201_vm7, %v3143_v29, %v2198_v57 }
0x1a69   :  { %v2207_v38 = vsel %vm2204_vm8, %v2206_v52, %v2202_v13  ;;  %v3147_v1 = vpop.eup %3146 }
0x1a6a   :  { %v2232_v3 = vmul.f32 %v3147_v1, %v2230_v44  ;;  %vm2237_vm11 = vweird.f32 %v3147_v1  ;;  %v2210_v41 = vmul.f32 %v2207_v38, %v4058_v63 }
0x1a6b   :  { %vm2238_vm13 = vmor %vm2236_vm12, %vm2237_vm11 }
0x1a6c   :  { %v2233_v6 = vsub.f32 1.0, %v2232_v3 }
0x1a6e   :  { %v2234_v14 = vmul.f32 %v3147_v1, %v2233_v6 }
0x1a70   :  { %v2235_v5 = vadd.f32 %v3147_v1, %v2234_v14 }
0x1a72   :  { %v2239_v22 = vsel %vm2238_vm13, %v3147_v1, %v2235_v5 }
0x1a73   :  { %v2244_v61 = vsel %vm2241_vm14, %v2243_v19, %v2239_v22 }
0x1a74   :  { %v2247_v53 = vmul.f32 %v2244_v61, %v4063_v39 }
0x1aaf   :  { %v2213_v33 = vpop.permute.xlu2 %2212 }
0x1ab0   :  { %v2215_v55 = vmul.f32 %v2213_v33, %v2207_v38 }
0x1ab2   :  { %2217 = vrot.lane.b32.xlu1 %v2215_v55, %s3299_s2 }
0x1ac8   :  { %v2250_v48 = vpop.permute.xlu0 %2249 }
0x1ac9   :  { %v2252_v46 = vmul.f32 %v2250_v48, %v2244_v61 }
0x1acb   :  { %2254 = vrot.lane.b32.xlu2 %v2252_v46, %s3299_s2 }
0x1b24   :  { %v2218_v42 = vpop.permute.xlu1 %2217 }
0x1b25   :  { %v2255_v50 = vpop.permute.xlu2 %2254  ;;  %v4100_v62 = vadd.f32 %v2218_v42, %v2210_v41 }
0x1b26   :  { %v4102_v47 = vadd.f32 %v2255_v50, %v2247_v53 }
0x1b27   :  { %3148 = vtanh.f32 %v4100_v62 }
0x1b28   :  { %3150 = vtanh.f32 %v4102_v47 }
0x1b2d   :  { %v3149_v0 = vpop.eup %3148 }
0x1b2e   :  { %v3151_v2 = vpop.eup %3150  ;;  %2223 = vrot.lane.b32.xlu0 %v3149_v0, %s3298_s0 }
0x1b2f   :  { %2260 = vrot.lane.b32.xlu1 %v3151_v2, %s3298_s0 }
0x1ba0   :  { %v2224_v12 = vpop.permute.xlu0 %2223 }
0x1ba1   :  { %v2261_v63 = vpop.permute.xlu1 %2260  ;;  %v2226_v25 = vmul.f32 %v2224_v12, %v2207_v38 }
0x1ba2   :  { %v2263_v39 = vmul.f32 %v2261_v63, %v2244_v61 }
0x1ba3   :  { %2265 = vrot.lane.b32.xlu2 %v2226_v25, %s3299_s2 }
0x1ba4   :  { %2269 = vrot.lane.b32.xlu0 %v2263_v39, %s3298_s0 }
0x1bfd   :  { %v2266_v43 = vpop.permute.xlu2 %2265 }
0x1c16   :  { %v2270_v20 = vpop.permute.xlu0 %2269 }
0x1c17   :  { %v2272_v23 = vsel %vm363_vm9, %v2266_v43, %v2270_v20 }
0x1c18   :  { %v4112_v45 = vadd.f32 %v2272_v23, %v4072_v30  ;;  %2934 = vmatmul.msk.f32.vlgmr.msra.gmra.mxu0 %vm236_vm10, %v2272_v23  ;;  %2935 = vmatmul.msk.f32.vlgmr.msra.gmra.mxu1 %vm236_vm10, %v2272_v23 }
0x1c95   :  { %v2294_v11 = vpop.f32.mrf.mxu0  ;;  %v2314_v10 = vpop.f32.mrf.mxu1 }
0x1c96   :  { %v2318_v26 = vadd.f32 %v2294_v11, %v3961_v28  ;;  %v2320_v58 = vadd.f32 %v2314_v10, %v3957_v34 }
0x1c98   :  { %3152 = vtanh.f32 %v2318_v26  ;;  %v2937_v30 = vmul.f32 -1.442695, %v2320_v58  ;;  %v2936_v24 = vmul.f32 -1.442695, %v2318_v26 }
0x1c99   :  { %3154 = vtanh.f32 %v2320_v58 }
0x1c9a   :  { %3156 = vpow2.f32 %v2937_v30 }
0x1c9e   :  { %v3153_v4 = vpop.eup %3152 }
0x1c9f   :  { %v3155_v56 = vpop.eup %3154  ;;  %2343 = vrot.lane.b32.xlu1 %v3153_v4, %s3298_s0 }
0x1ca0   :  { %2380 = vrot.lane.b32.xlu2 %v3155_v56, %s3298_s0  ;;  %v3157_v7 = vpop.eup %3156 }
0x1ca1   :  { %v2361_v8 = vadd.f32 1.0, %v3157_v7 }
0x1ca3   :  { %3158 = vrcp.f32 %v2361_v8  ;;  %v2373_v31 = vand.u32 2147483648, %v2361_v8  ;;  %vm2367_vm0 = vweird.f32 %v2361_v8  ;;  %v2371_v36 = vand.u32 2147483647, %v2361_v8 }
0x1ca4   :  { %3160 = vpow2.f32 %v2936_v24 }
0x1ca5   :  { %v2374_v51 = vor.u32 1.1754944e-38, %v2373_v31  ;;  %vm2372_vm2 = vcmp.eq.f32.partialorder %v2371_v36, 8.507059e+37 }
0x1ca9   :  { %v3159_v21 = vpop.eup %3158 }
0x1caa   :  { %v2363_v27 = vmul.f32 %v3159_v21, %v2361_v8  ;;  %v3161_v35 = vpop.eup %3160  ;;  %vm2368_vm15 = vweird.f32 %v3159_v21 }
0x1cab   :  { %v2324_v29 = vadd.f32 1.0, %v3161_v35  ;;  %vm2369_vm1 = vmor %vm2367_vm0, %vm2368_vm15 }
0x1cac   :  { %v2364_v28 = vsub.f32 1.0, %v2363_v27 }
0x1cad   :  { %3162 = vrcp.f32 %v2324_v29  ;;  %v2336_v55 = vand.u32 2147483648, %v2324_v29  ;;  %vm2330_vm4 = vweird.f32 %v2324_v29  ;;  %v2334_v1 = vand.u32 2147483647, %v2324_v29 }
0x1cae   :  { %v2365_v34 = vmul.f32 %v3159_v21, %v2364_v28 }
0x1caf   :  { %v2337_v6 = vor.u32 1.1754944e-38, %v2336_v55  ;;  %vm2335_vm6 = vcmp.eq.f32.partialorder %v2334_v1, 8.507059e+37 }
0x1cb0   :  { %v2366_v32 = vadd.f32 %v3159_v21, %v2365_v34 }
0x1cb2   :  { %v2370_v37 = vsel %vm2369_vm1, %v3159_v21, %v2366_v32 }
0x1cb3   :  { %v2375_v57 = vsel %vm2372_vm2, %v2374_v51, %v2370_v37  ;;  %v3163_v59 = vpop.eup %3162 }
0x1cb4   :  { %v2326_v13 = vmul.f32 %v3163_v59, %v2324_v29  ;;  %vm2331_vm3 = vweird.f32 %v3163_v59  ;;  %v2378_v18 = vmul.f32 %v2375_v57, %v4102_v47 }
0x1cb5   :  { %vm2332_vm5 = vmor %vm2330_vm4, %vm2331_vm3 }
0x1cb6   :  { %v2327_v52 = vsub.f32 1.0, %v2326_v13 }
0x1cb8   :  { %v2328_v33 = vmul.f32 %v3163_v59, %v2327_v52 }
0x1cba   :  { %v2329_v38 = vadd.f32 %v3163_v59, %v2328_v33 }
0x1cbc   :  { %v2333_v3 = vsel %vm2332_vm5, %v3163_v59, %v2329_v38 }
0x1cbd   :  { %v2338_v5 = vsel %vm2335_vm6, %v2337_v6, %v2333_v3 }
0x1cbe   :  { %v2341_v61 = vmul.f32 %v2338_v5, %v4100_v62 }
0x1cfa   :  { %v2381_v44 = vpop.permute.xlu2 %2380 }
0x1cfb   :  { %v2383_v54 = vmul.f32 %v2381_v44, %v2375_v57 }
0x1cfd   :  { %2385 = vrot.lane.b32.xlu1 %v2383_v54, %s3299_s2 }
0x1d11   :  { %v2344_v14 = vpop.permute.xlu1 %2343 }
0x1d12   :  { %v2346_v17 = vmul.f32 %v2344_v14, %v2338_v5 }
0x1d14   :  { %2348 = vrot.lane.b32.xlu0 %v2346_v17, %s3299_s2 }
0x1d6f   :  { %v2386_v22 = vpop.permute.xlu1 %2385 }
0x1d70   :  { %v4123_v19 = vadd.f32 %v2386_v22, %v2378_v18 }
0x1d72   :  { %3164 = vtanh.f32 %v4123_v19 }
0x1d78   :  { %v3165_v48 = vpop.eup %3164 }
0x1d79   :  { %2391 = vrot.lane.b32.xlu0 %v3165_v48, %s3298_s0 }
0x1d86   :  { %v2349_v46 = vpop.permute.xlu0 %2348 }
0x1d87   :  { %v4128_v41 = vadd.f32 %v2349_v46, %v2341_v61 }
0x1d89   :  { %3166 = vtanh.f32 %v4128_v41 }
0x1d8f   :  { %v3167_v53 = vpop.eup %3166 }
0x1d90   :  { %2354 = vrot.lane.b32.xlu2 %v3167_v53, %s3298_s0 }
0x1dea   :  { %v2355_v42 = vpop.permute.xlu2 %2354 }
0x1deb   :  { %v2392_v50 = vpop.permute.xlu0 %2391  ;;  %v2357_v47 = vmul.f32 %v2355_v42, %v2338_v5 }
0x1dec   :  { %v2394_v0 = vmul.f32 %v2392_v50, %v2375_v57 }
0x1ded   :  { %2396 = vrot.lane.b32.xlu1 %v2357_v47, %s3299_s2 }
0x1dee   :  { %2400 = vrot.lane.b32.xlu2 %v2394_v0, %s3298_s0 }
0x1e48   :  { %v2401_v2 = vpop.permute.xlu2 %2400 }
0x1e5f   :  { %v2397_v12 = vpop.permute.xlu1 %2396 }
0x1e60   :  { %v2403_v62 = vsel %vm363_vm9, %v2397_v12, %v2401_v2 }
0x1e61   :  { %v4136_v63 = vadd.f32 %v2403_v62, %v4112_v45  ;;  %2938 = vmatmul.msk.f32.vlgmr.msrb.gmra.mxu2 %vm236_vm10, %v2403_v62  ;;  %2939 = vmatmul.msk.f32.vlgmr.msrb.gmra.mxu3 %vm236_vm10, %v2403_v62 }
0x1ee4   :  { %v2425_v25 = vpop.f32.mrf.mxu2  ;;  %v2445_v39 = vpop.f32.mrf.mxu3 }
0x1ee5   :  { %v2449_v43 = vadd.f32 %v2425_v25, %v3965_v60  ;;  %v2451_v20 = vadd.f32 %v2445_v39, %v3953_v16 }
0x1ee7   :  { %3168 = vtanh.f32 %v2449_v43  ;;  %v2940_v45 = vmul.f32 -1.442695, %v2449_v43  ;;  %v2941_v10 = vmul.f32 -1.442695, %v2451_v20 }
0x1ee8   :  { %3170 = vtanh.f32 %v2451_v20 }
0x1ee9   :  { %3172 = vpow2.f32 %v2940_v45 }
0x1eea   :  { %3174 = vpow2.f32 %v2941_v10 }
0x1eed   :  { %v3169_v23 = vpop.eup %3168 }
0x1eee   :  { %v3171_v11 = vpop.eup %3170  ;;  %2474 = vrot.lane.b32.xlu0 %v3169_v23, %s3298_s0 }
0x1eef   :  { %2511 = vrot.lane.b32.xlu1 %v3171_v11, %s3298_s0  ;;  %v3173_v26 = vpop.eup %3172 }
0x1ef0   :  { %v3175_v58 = vpop.eup %3174  ;;  %v2455_v4 = vadd.f32 1.0, %v3173_v26 }
0x1ef1   :  { %v2492_v56 = vadd.f32 1.0, %v3175_v58 }
0x1ef2   :  { %3176 = vrcp.f32 %v2455_v4  ;;  %v2467_v34 = vand.u32 2147483648, %v2455_v4  ;;  %vm2461_vm11 = vweird.f32 %v2455_v4  ;;  %v2465_v32 = vand.u32 2147483647, %v2455_v4 }
0x1ef3   :  { %3178 = vrcp.f32 %v2492_v56  ;;  %v2504_v29 = vand.u32 2147483648, %v2492_v56  ;;  %vm2498_vm12 = vweird.f32 %v2492_v56  ;;  %v2502_v31 = vand.u32 2147483647, %v2492_v56 }
0x1ef4   :  { %v2468_v51 = vor.u32 1.1754944e-38, %v2467_v34  ;;  %vm2466_vm15 = vcmp.eq.f32.partialorder %v2465_v32, 8.507059e+37 }
0x1ef5   :  { %v2505_v44 = vor.u32 1.1754944e-38, %v2504_v29  ;;  %vm2503_vm0 = vcmp.eq.f32.partialorder %v2502_v31, 8.507059e+37 }
0x1ef8   :  { %v3177_v60 = vpop.eup %3176 }
0x1ef9   :  { %v3179_v16 = vpop.eup %3178  ;;  %v2457_v30 = vmul.f32 %v3177_v60, %v2455_v4  ;;  %vm2462_vm7 = vweird.f32 %v3177_v60 }
0x1efa   :  { %v2494_v7 = vmul.f32 %v3179_v16, %v2492_v56  ;;  %vm2499_vm8 = vweird.f32 %v3179_v16  ;;  %vm2463_vm13 = vmor %vm2461_vm11, %vm2462_vm7 }
0x1efb   :  { %v2458_v8 = vsub.f32 1.0, %v2457_v30  ;;  %vm2500_vm14 = vmor %vm2498_vm12, %vm2499_vm8 }
0x1efc   :  { %v2495_v21 = vsub.f32 1.0, %v2494_v7 }
0x1efd   :  { %v2459_v24 = vmul.f32 %v3177_v60, %v2458_v8 }
0x1efe   :  { %v2496_v27 = vmul.f32 %v3179_v16, %v2495_v21 }
0x1eff   :  { %v2460_v28 = vadd.f32 %v3177_v60, %v2459_v24 }
0x1f00   :  { %v2497_v35 = vadd.f32 %v3179_v16, %v2496_v27 }
0x1f01   :  { %v2464_v36 = vsel %vm2463_vm13, %v3177_v60, %v2460_v28 }
0x1f02   :  { %v2501_v37 = vsel %vm2500_vm14, %v3179_v16, %v2497_v35  ;;  %v2469_v59 = vsel %vm2466_vm15, %v2468_v51, %v2464_v36 }
0x1f03   :  { %v2506_v13 = vsel %vm2503_vm0, %v2505_v44, %v2501_v37  ;;  %v2472_v38 = vmul.f32 %v2469_v59, %v4128_v41 }
0x1f04   :  { %v2509_v6 = vmul.f32 %v2506_v13, %v4123_v19 }
0x1f60   :  { %v2475_v57 = vpop.permute.xlu0 %2474 }
0x1f61   :  { %v2512_v54 = vpop.permute.xlu1 %2511  ;;  %v2477_v52 = vmul.f32 %v2475_v57, %v2469_v59 }
0x1f62   :  { %v2514_v33 = vmul.f32 %v2512_v54, %v2506_v13 }
0x1f63   :  { %2479 = vrot.lane.b32.xlu2 %v2477_v52, %s3299_s2 }
0x1f64   :  { %2516 = vrot.lane.b32.xlu0 %v2514_v33, %s3299_s2 }
0x1fbd   :  { %v2480_v55 = vpop.permute.xlu2 %2479 }
0x1fbe   :  { %v4147_v1 = vadd.f32 %v2480_v55, %v2472_v38 }
0x1fc0   :  { %3180 = vtanh.f32 %v4147_v1 }
0x1fc6   :  { %v3181_v3 = vpop.eup %3180 }
0x1fc7   :  { %2485 = vrot.lane.b32.xlu1 %v3181_v3, %s3298_s0 }
0x1fd6   :  { %v2517_v14 = vpop.permute.xlu0 %2516 }
0x1fd7   :  { %v4152_v5 = vadd.f32 %v2517_v14, %v2509_v6 }
0x1fd9   :  { %3182 = vtanh.f32 %v4152_v5 }
0x1fdf   :  { %v3183_v17 = vpop.eup %3182 }
0x1fe0   :  { %2522 = vrot.lane.b32.xlu2 %v3183_v17, %s3298_s0 }
0x2039   :  { %v2486_v18 = vpop.permute.xlu1 %2485 }
0x203a   :  { %v2523_v22 = vpop.permute.xlu2 %2522  ;;  %v2488_v48 = vmul.f32 %v2486_v18, %v2469_v59 }
0x203b   :  { %v2525_v61 = vmul.f32 %v2523_v22, %v2506_v13 }
0x203c   :  { %2527 = vrot.lane.b32.xlu0 %v2488_v48, %s3299_s2 }
0x203d   :  { %2531 = vrot.lane.b32.xlu1 %v2525_v61, %s3298_s0 }
0x20ae   :  { %v2528_v46 = vpop.permute.xlu0 %2527 }
0x20af   :  { %v2532_v41 = vpop.permute.xlu1 %2531 }
0x20b0   :  { %v2534_v19 = vsel %vm363_vm9, %v2528_v46, %v2532_v41 }
0x20b1   :  { %v4160_v53 = vadd.f32 %v2534_v19, %v4136_v63  ;;  %2942 = vmatmul.msk.f32.vlgmr.msrb.gmra.mxu0 %vm236_vm10, %v2534_v19  ;;  %2943 = vmatmul.msk.f32.vlgmr.msrb.gmra.mxu1 %vm236_vm10, %v2534_v19 }
0x212e   :  { %v2556_v42 = vpop.f32.mrf.mxu0  ;;  %v2576_v50 = vpop.f32.mrf.mxu1 }
0x212f   :  { %v2580_v47 = vadd.f32 %v2556_v42, %v3969_v40  ;;  %v2582_v0 = vadd.f32 %v2576_v50, %v3949_v9 }
0x2131   :  { %3184 = vtanh.f32 %v2580_v47  ;;  %v2944_v62 = vmul.f32 -1.442695, %v2580_v47  ;;  %v2945_v43 = vmul.f32 -1.442695, %v2582_v0 }
0x2132   :  { %3186 = vtanh.f32 %v2582_v0 }
0x2133   :  { %3188 = vpow2.f32 %v2944_v62 }
0x2137   :  { %v3185_v2 = vpop.eup %3184 }
0x2138   :  { %v3187_v12 = vpop.eup %3186  ;;  %2605 = vrot.lane.b32.xlu2 %v3185_v2, %s3298_s0 }
0x2139   :  { %2642 = vrot.lane.b32.xlu0 %v3187_v12, %s3298_s0  ;;  %v3189_v63 = vpop.eup %3188 }
0x213a   :  { %v2586_v25 = vadd.f32 1.0, %v3189_v63 }
0x213c   :  { %3190 = vrcp.f32 %v2586_v25  ;;  %v2598_v10 = vand.u32 2147483648, %v2586_v25  ;;  %vm2592_vm2 = vweird.f32 %v2586_v25  ;;  %v2596_v26 = vand.u32 2147483647, %v2586_v25 }
0x213d   :  { %3192 = vpow2.f32 %v2945_v43 }
0x213e   :  { %v2599_v4 = vor.u32 1.1754944e-38, %v2598_v10  ;;  %vm2597_vm4 = vcmp.eq.f32.partialorder %v2596_v26, 8.507059e+37 }
0x2142   :  { %v3191_v39 = vpop.eup %3190 }
0x2143   :  { %v2588_v20 = vmul.f32 %v3191_v39, %v2586_v25  ;;  %v3193_v9 = vpop.eup %3192  ;;  %vm2593_vm1 = vweird.f32 %v3191_v39 }
0x2144   :  { %v2623_v11 = vadd.f32 1.0, %v3193_v9  ;;  %vm2594_vm3 = vmor %vm2592_vm2, %vm2593_vm1 }
0x2145   :  { %v2589_v40 = vsub.f32 1.0, %v2588_v20 }
0x2146   :  { %3194 = vrcp.f32 %v2623_v11  ;;  %v2635_v27 = vand.u32 2147483648, %v2623_v11  ;;  %vm2629_vm6 = vweird.f32 %v2623_v11  ;;  %v2633_v28 = vand.u32 2147483647, %v2623_v11 }
0x2147   :  { %v2590_v23 = vmul.f32 %v3191_v39, %v2589_v40 }
0x2148   :  { %v2636_v34 = vor.u32 1.1754944e-38, %v2635_v27  ;;  %vm2634_vm8 = vcmp.eq.f32.partialorder %v2633_v28, 8.507059e+37 }
0x2149   :  { %v2591_v45 = vadd.f32 %v3191_v39, %v2590_v23 }
0x214b   :  { %v2595_v58 = vsel %vm2594_vm3, %v3191_v39, %v2591_v45  ;;  %vm2834_vm3 = vcmask 48128  }
0x214c   :  { %v2600_v60 = vsel %vm2597_vm4, %v2599_v4, %v2595_v58  ;;  %v3195_v30 = vpop.eup %3194 }
0x214d   :  { %v2625_v7 = vmul.f32 %v3195_v30, %v2623_v11  ;;  %vm2630_vm5 = vweird.f32 %v3195_v30  ;;  %v2603_v36 = vmul.f32 %v2600_v60, %v4147_v1 }
0x214e   :  { %vm2631_vm7 = vmor %vm2629_vm6, %vm2630_vm5 }
0x214f   :  { %v2626_v8 = vsub.f32 1.0, %v2625_v7 }
0x2151   :  { %v2627_v21 = vmul.f32 %v3195_v30, %v2626_v8 }
0x2153   :  { %v2628_v24 = vadd.f32 %v3195_v30, %v2627_v21 }
0x2155   :  { %v2632_v35 = vsel %vm2631_vm7, %v3195_v30, %v2628_v24 }
0x2156   :  { %v2637_v32 = vsel %vm2634_vm8, %v2636_v34, %v2632_v35 }
0x2157   :  { %v2640_v37 = vmul.f32 %v2637_v32, %v4152_v5 }
0x2192   :  { %v2606_v56 = vpop.permute.xlu2 %2605 }
0x2193   :  { %v2608_v16 = vmul.f32 %v2606_v56, %v2600_v60 }
0x2195   :  { %2610 = vrot.lane.b32.xlu1 %v2608_v16, %s3299_s2 }
0x21ab   :  { %v2643_v29 = vpop.permute.xlu0 %2642 }
0x21ac   :  { %v2645_v31 = vmul.f32 %v2643_v29, %v2637_v32 }
0x21ae   :  { %2647 = vrot.lane.b32.xlu2 %v2645_v31, %s3299_s2 }
0x2207   :  { %v2611_v51 = vpop.permute.xlu1 %2610 }
0x2208   :  { %v2648_v44 = vpop.permute.xlu2 %2647  ;;  %v4172_v57 = vadd.f32 %v2611_v51, %v2603_v36  ;;  %v2806_v36 = vld [vmem:[%s4240_s7 + $0x38] sm:$0xff]  ;;  %v2804_v51 = vld [vmem:[%s4240_s7 + $0x28] sm:$0xff] }
0x2209   :  { %v4174_v59 = vadd.f32 %v2648_v44, %v2640_v37  ;;  %v2805_v37 = vld [vmem:[%s4240_s7 + $0x30] sm:$0xff]  ;;  %2822 = vmatpush.msra.mxu0 %v2806_v36  ;;  %v2803_v44 = vld [vmem:[%s4240_s7 + $0x20] sm:$0xff] }
0x220a   :  { %3196 = vtanh.f32 %v4172_v57 }
0x220b   :  { %3198 = vtanh.f32 %v4174_v59  ;;  %2823 = vmatpush.msra.mxu0 %v2805_v37 }
0x220d   :  { %2824 = vmatpush.msra.mxu0 %v2804_v51 }
0x220f   :  { %2825 = vmatpush.msra.mxu0 %v2803_v44 }
0x2210   :  { %v3197_v54 = vpop.eup %3196 }
0x2211   :  { %v3199_v13 = vpop.eup %3198  ;;  %2616 = vrot.lane.b32.xlu0 %v3197_v54, %s3298_s0  ;;  %v2800_v54 = vld [vmem:[%s4240_s7 + $0x8] sm:$0xff] }
0x2212   :  { %2653 = vrot.lane.b32.xlu1 %v3199_v13, %s3298_s0  ;;  %v2799_v13 = vld [vmem:[%s4240_s7] sm:$0xff] }
0x2283   :  { %v2617_v52 = vpop.permute.xlu0 %2616 }
0x2284   :  { %v2654_v33 = vpop.permute.xlu1 %2653  ;;  %v2619_v38 = vmul.f32 %v2617_v52, %v2600_v60 }
0x2285   :  { %v2656_v55 = vmul.f32 %v2654_v33, %v2637_v32 }
0x2286   :  { %2658 = vrot.lane.b32.xlu2 %v2619_v38, %s3299_s2 }
0x2287   :  { %2662 = vrot.lane.b32.xlu0 %v2656_v55, %s3298_s0 }
0x22e0   :  { %v2659_v1 = vpop.permute.xlu2 %2658 }
0x22f9   :  { %v2663_v3 = vpop.permute.xlu0 %2662 }
0x22fa   :  { %v2665_v6 = vsel %vm363_vm9, %v2659_v1, %v2663_v3  ;;  %v2959_v3 = vld [vmem:[%s4241_s8] ss:$0 sm:$0xff] }
0x22fb   :  { %v4184_v14 = vadd.f32 %v2665_v6, %v4160_v53  ;;  %2946 = vmatmul.msk.f32.vlgmr.msra.gmra.mxu2 %vm236_vm10, %v2665_v6  ;;  %2947 = vmatmul.msk.f32.vlgmr.msra.gmra.mxu3 %vm236_vm10, %v2665_v6 }
0x237e   :  { %v2687_v5 = vpop.f32.mrf.mxu2  ;;  %v2707_v17 = vpop.f32.mrf.mxu3 }
0x237f   :  { %v2711_v18 = vadd.f32 %v2687_v5, %v3971_v49  ;;  %v2713_v22 = vadd.f32 %v2707_v17, %v3945_v15 }
0x2381   :  { %3200 = vtanh.f32 %v2711_v18  ;;  %v2949_v46 = vmul.f32 -1.442695, %v2713_v22  ;;  %v2948_v42 = vmul.f32 -1.442695, %v2711_v18 }
0x2382   :  { %3202 = vtanh.f32 %v2713_v22 }
0x2383   :  { %3204 = vpow2.f32 %v2949_v46 }
0x2387   :  { %v3201_v48 = vpop.eup %3200 }
0x2388   :  { %v3203_v61 = vpop.eup %3202  ;;  %2736 = vrot.lane.b32.xlu1 %v3201_v48, %s3298_s0 }
0x2389   :  { %2773 = vrot.lane.b32.xlu2 %v3203_v61, %s3298_s0  ;;  %v3205_v41 = vpop.eup %3204 }
0x238a   :  { %v2754_v19 = vadd.f32 1.0, %v3205_v41 }
0x238c   :  { %3206 = vrcp.f32 %v2754_v19  ;;  %v2766_v12 = vand.u32 2147483648, %v2754_v19  ;;  %vm2760_vm12 = vweird.f32 %v2754_v19  ;;  %v2764_v62 = vand.u32 2147483647, %v2754_v19 }
0x238d   :  { %3208 = vpow2.f32 %v2948_v42 }
0x238e   :  { %v2767_v25 = vor.u32 1.1754944e-38, %v2766_v12  ;;  %vm2765_vm14 = vcmp.eq.f32.partialorder %v2764_v62, 8.507059e+37 }
0x2392   :  { %v3207_v53 = vpop.eup %3206 }
0x2393   :  { %v2756_v50 = vmul.f32 %v3207_v53, %v2754_v19  ;;  %v3209_v47 = vpop.eup %3208  ;;  %vm2761_vm11 = vweird.f32 %v3207_v53 }
0x2394   :  { %v2717_v0 = vadd.f32 1.0, %v3209_v47  ;;  %vm2762_vm13 = vmor %vm2760_vm12, %vm2761_vm11 }
0x2395   :  { %v2757_v49 = vsub.f32 1.0, %v2756_v50 }
0x2396   :  { %3210 = vrcp.f32 %v2717_v0  ;;  %v2729_v10 = vand.u32 2147483648, %v2717_v0  ;;  %vm2723_vm0 = vweird.f32 %v2717_v0  ;;  %v2727_v26 = vand.u32 2147483647, %v2717_v0 }
0x2397   :  { %v2758_v15 = vmul.f32 %v3207_v53, %v2757_v49 }
0x2398   :  { %v2730_v4 = vor.u32 1.1754944e-38, %v2729_v10  ;;  %vm2728_vm2 = vcmp.eq.f32.partialorder %v2727_v26, 8.507059e+37 }
0x2399   :  { %v2759_v2 = vadd.f32 %v3207_v53, %v2758_v15 }
0x239b   :  { %v2763_v63 = vsel %vm2762_vm13, %v3207_v53, %v2759_v2 }
0x239c   :  { %v2768_v43 = vsel %vm2765_vm14, %v2767_v25, %v2763_v63  ;;  %v3211_v20 = vpop.eup %3210 }
0x239d   :  { %v2719_v23 = vmul.f32 %v3211_v20, %v2717_v0  ;;  %vm2724_vm15 = vweird.f32 %v3211_v20  ;;  %v2771_v30 = vmul.f32 %v2768_v43, %v4174_v59  ;;  %v2801_v59 = vld [vmem:[%s4240_s7 + $0x10] sm:$0xff] }
0x239e   :  { %vm2725_vm1 = vmor %vm2723_vm0, %vm2724_vm15 }
0x239f   :  { %v2720_v9 = vsub.f32 1.0, %v2719_v23 }
0x23a1   :  { %v2721_v11 = vmul.f32 %v3211_v20, %v2720_v9 }
0x23a3   :  { %v2722_v45 = vadd.f32 %v3211_v20, %v2721_v11 }
0x23a5   :  { %v2726_v58 = vsel %vm2725_vm1, %v3211_v20, %v2722_v45 }
0x23a6   :  { %v2731_v60 = vsel %vm2728_vm2, %v2730_v4, %v2726_v58 }
0x23a7   :  { %v2734_v24 = vmul.f32 %v2731_v60, %v4172_v57  ;;  %v2802_v57 = vld [vmem:[%s4240_s7 + $0x18] sm:$0xff] }
0x23a8   :  { %2826 = vmatpush.msra.mxu0 %v2802_v57 }
0x23aa   :  { %2827 = vmatpush.msra.mxu0 %v2801_v59 }
0x23ac   :  { %2828 = vmatpush.msra.mxu0 %v2800_v54 }
0x23ae   :  { %2829 = vmatpush.msra.mxu0 %v2799_v13 }
0x23e3   :  { %v2774_v39 = vpop.permute.xlu2 %2773 }
0x23e4   :  { %v2776_v40 = vmul.f32 %v2774_v39, %v2768_v43 }
0x23e6   :  { %2778 = vrot.lane.b32.xlu1 %v2776_v40, %s3299_s2 }
0x23fa   :  { %v2737_v56 = vpop.permute.xlu1 %2736 }
0x23fb   :  { %v2739_v16 = vmul.f32 %v2737_v56, %v2731_v60 }
0x23fd   :  { %2741 = vrot.lane.b32.xlu0 %v2739_v16, %s3299_s2 }
0x2458   :  { %v2779_v7 = vpop.permute.xlu1 %2778 }
0x2459   :  { %v2781_v8 = vadd.f32 %v2779_v7, %v2771_v30 }
0x245b   :  { %3212 = vtanh.f32 %v2781_v8 }
0x2461   :  { %v3213_v21 = vpop.eup %3212 }
0x2462   :  { %2784 = vrot.lane.b32.xlu0 %v3213_v21, %s3298_s0 }
0x246f   :  { %v2742_v27 = vpop.permute.xlu0 %2741 }
0x2470   :  { %v2744_v28 = vadd.f32 %v2742_v27, %v2734_v24 }
0x2472   :  { %3214 = vtanh.f32 %v2744_v28 }
0x2478   :  { %v3215_v35 = vpop.eup %3214 }
0x2479   :  { %2747 = vrot.lane.b32.xlu2 %v3215_v35, %s3298_s0 }
0x24d3   :  { %v2748_v34 = vpop.permute.xlu2 %2747 }
0x24d4   :  { %v2785_v29 = vpop.permute.xlu0 %2784  ;;  %v2750_v32 = vmul.f32 %v2748_v34, %v2731_v60 }
0x24d5   :  { %v2787_v31 = vmul.f32 %v2785_v29, %v2768_v43 }
0x24d6   :  { %2789 = vrot.lane.b32.xlu1 %v2750_v32, %s3299_s2 }
0x24d7   :  { %2793 = vrot.lane.b32.xlu2 %v2787_v31, %s3298_s0 }
0x2531   :  { %v2794_v52 = vpop.permute.xlu2 %2793 }
0x2548   :  { %v2790_v33 = vpop.permute.xlu1 %2789 }
0x2549   :  { %v2796_v38 = vsel %vm363_vm9, %v2790_v33, %v2794_v52 }
0x254a   :  { %v2797_v55 = vadd.f32 %v2796_v38, %v4184_v14 }
0x254c   :  { %v2798_v1 = vmul.f32 0.125, %v2797_v55 }
0x254e   :  { %2950 = vmatmul.msk.f32.vlgmr.msra.gmra.mxu0 %vm236_vm10, %v2798_v1 }
0x25cb   :  { %v2831_v6 = vpop.f32.mrf.mxu0 }
0x25cc   :  { %v2832_v5 = vadd.f32 %v2959_v3, %v2831_v6 }
0x25ce   :  { %2835 = vst.msk [vmem:[%s4242_s9] sm:$0xff] %vm2834_vm3, %v2832_v5 }
0x25cf   :  { %2840 = vsyncpa [#allocation6], 1 }
0x25d0   :  { %2841 = vsyncpa [#allocation8], 1 }

</bundles_post_ra>
